<compile_context>
chip_gen: v6e
topology: v6e:2x2x1
jax: 0.10.0
libtpu: 0.0.40
codegen_flags: <defaults>
</compile_context>

<pallas_src>
import functools

import jax
import jax.numpy as jnp
import numpy as np
from jax.experimental import pallas as pl
from jax.experimental.pallas import tpu as pltpu

# ---- problem sizes (small, consistent with the module's forward) ----
B = 2            # batch
R = 128          # num_routes          -> lane axis
C = 8            # num_capsules
O = 16           # out_channels        -> C*O = 128 on sublanes
I = 8            # in_channels
ROUTING_ITERS = 3
EPS = 1e-20

_HIGHEST = jax.lax.Precision.HIGHEST
# Contract dim 1 of lhs with dim 1 of rhs (A @ B^T), same pattern as flash-attn q.k^T.
_NT_DIMS = (((1,), (1,)), ((), ()))


def _capsule_kernel(x_ref, w_ref, bias_ref, o_ref, *, bb):
    # x_ref:    (bb, I, R)     f32   routes on lanes
    # w_ref:    (I, C*O, R)    f32   W[0,r,c,o,i] rearranged to [i, c*O+o, r]  (precomputed)
    # bias_ref: (C, C*O)       f32   bias placed block-diagonally              (precomputed)
    # o_ref:    (bb, 1, C*O)   f32   lane-dense output rows
    bias_big = bias_ref[...]                                        # (C, C*O)

    # Block-diagonal mask: mask[c, k] = 1 iff c*O <= k < (c+1)*O   (k = c*O + o).
    # Built once per grid step (3 one-vreg VPU ops), hoisted out of all loops.
    lane = jax.lax.broadcasted_iota(jnp.int32, (C, C * O), 1)
    row = jax.lax.broadcasted_iota(jnp.int32, (C, C * O), 0)
    lo = row * O
    diag_mask = jnp.logical_and(lane >= lo, lane < lo + O).astype(jnp.float32)

    def batch_body(b, carry):
        x_b = x_ref[b]                                              # (I, R)

        # ---- u_flat[c*O+o, r] = sum_i W[i, c*O+o, r] * x[b, i, r]   (exact f32, VPU) ----
        u_flat = jnp.zeros((C * O, R), jnp.float32)
        for i in range(I):
            u_flat = u_flat + w_ref[i] * x_b[i:i + 1, :]            # (C*O, R)

        # ---- dynamic routing (static unroll; ROUTING_ITERS = 3) ----
        b_ij = jnp.zeros((C, R), jnp.float32)
        v_big = jnp.zeros((C, C * O), jnp.float32)
        for it in range(ROUTING_ITERS):
            if it == 0:
                # b_ij == 0  =>  softmax over capsules is exactly uniform (1/C).
                c_ij = jnp.full((C, R), 1.0 / C, jnp.float32)
            else:
                bmax = jnp.max(b_ij, axis=0, keepdims=True)         # (1, R)
                e = jnp.exp(b_ij - bmax)                            # (C, R)
                denom = jnp.sum(e, axis=0, keepdims=True)           # (1, R)
                c_ij = e * pl.reciprocal(denom, approx=True)        # (C, R)

            # full[c, c2*O+o] = sum_r c_ij[c, r] * u_hat[c2, o, r]     (MXU, A.B^T)
            # HIGHEST precision kept on purpose: DEFAULT bf16 rounding of u_flat puts
            # ~0.3-0.6% error into v, exceeding the rtol=2e-3 validation tolerance.
            full = jax.lax.dot_general(c_ij, u_flat, _NT_DIMS,
                                       preferred_element_type=jnp.float32,
                                       precision=_HIGHEST)          # (C, C*O)

            # Stay block-diagonal: no roll cascade / partial-lane slice / concat rebuild.
            s_big = full * diag_mask + bias_big                     # (C, C*O)

            # squash over out_channels (off-diagonal entries are exactly zero)
            ss = jnp.sum(s_big * s_big, axis=1, keepdims=True)      # (C, 1) full-lane reduce
            scale = jnp.sqrt(ss) / (1.0 + ss + EPS)                 # exact divide (tiny vector)
            v_big = scale * s_big                                   # (C, C*O), block-diagonal

            if it < ROUTING_ITERS - 1:
                # agreement a[c, r] = sum_o u_hat[c, o, r] * v[c, o]   (MXU, DEFAULT precision:
                # a is ~1e-5 scale, bf16 rounding here has no visible effect on the output)
                a = jnp.dot(v_big, u_flat,
                            preferred_element_type=jnp.float32)     # (C, R)
                b_ij = b_ij + a

        # Lane-dense output row: out[b, 0, c*O+o] = v[c, o]
        o_ref[b] = jnp.sum(v_big, axis=0, keepdims=True).astype(o_ref.dtype)
        return carry

    # unroll=True gives the LLO scheduler the whole (tiny) kernel to overlap; per the review,
    # switch to unroll=False only if a bundle dump shows vreg spills becoming the binding slot.
    jax.lax.fori_loop(0, bb, batch_body, 0, unroll=True)


def _default_batch_block(batch):
    """v7x (2 TensorCores/chip): keep batch on a parallel grid axis so the two batch
    elements can land on the two TCs.  v5e/v6e (1 TC): collapse to a single grid step to
    avoid per-step overhead.  (Heuristic; benchmark-verify on v7x if it matters.)"""
    try:
        kind = jax.devices()[0].device_kind.lower()
    except Exception:
        kind = ""
    if "v7" in kind or "7x" in kind:
        return 1
    return batch


def prepare_capsule_params(W, bias):
    """One-time parameter re-layout (call at init, NOT per forward).

    Hoisting this out of the per-call path removes a ~512 KB HBM read+write per forward,
    which was on the order of the whole kernel's HBM traffic (dominant on v5e).
      W:    (1, R, C, O, I)  ->  w_t:      (I, C*O, R)   routes on lanes
      bias: (1, 1, C, O)     ->  bias_big: (C, C*O)      placed block-diagonally
    """
    w_t = jnp.transpose(W[0], (3, 1, 2, 0)).reshape(I, C * O, R).astype(jnp.float32)
    eye = jnp.eye(C, dtype=jnp.float32)                                        # (C, C)
    bias_big = (eye[:, :, None] * bias[0, 0][None, :, :].astype(jnp.float32))  # (C, C, O)
    bias_big = bias_big.reshape(C, C * O)                                      # (C, C*O)
    return w_t, bias_big


@functools.partial(jax.jit, static_argnums=(3,))
def _capsule_forward(x, w_t, bias_big, bb):
    bsz = x.shape[0]
    grid = (bsz // bb,)

    # If the producer can emit x already as (B, I, R), this 8 KB transpose disappears too.
    x_t = jnp.transpose(x, (0, 2, 1)).astype(jnp.float32)                      # (B, I, R)

    out = pl.pallas_call(
        functools.partial(_capsule_kernel, bb=bb),
        out_shape=jax.ShapeDtypeStruct((bsz, 1, C * O), jnp.float32),
        grid=grid,
        in_specs=[
            pl.BlockSpec((bb, I, R), lambda g: (g, 0, 0)),
            pl.BlockSpec((I, C * O, R), lambda g: (0, 0, 0)),
            pl.BlockSpec((C, C * O), lambda g: (0, 0)),
        ],
        out_specs=pl.BlockSpec((bb, 1, C * O), lambda g: (g, 0, 0)),
        compiler_params=pltpu.CompilerParams(dimension_semantics=("parallel",)),
    )(x_t, w_t, bias_big)
    return out.reshape(bsz, C, O)


def capsule_layer_pallas(x, w_t, bias_big, *, batch_block=None):
    """x: (B, R, I) f32; (w_t, bias_big) from prepare_capsule_params.  Returns (B, C, O)."""
    bsz = x.shape[0]
    bb = batch_block if batch_block is not None else _default_batch_block(bsz)
    assert bsz % bb == 0
    return _capsule_forward(x, w_t, bias_big, bb)


def capsule_layer_ref(x, W, bias):
    """Pure-JAX mirror of the PyTorch forward (for sanity checking).

    u_hat is computed at HIGHEST precision: with default (bf16 MXU) precision the
    *reference* carries ~0.4% per-element error, which is what failed the previous check
    (the kernel builds u_hat in exact f32 on the VPU)."""
    u_hat = jnp.einsum("rcoi,bri->brco", W[0], x, precision=_HIGHEST)          # (B, R, C, O)
    b_ij = jnp.zeros((x.shape[0], R, C, 1), jnp.float32)
    v = None
    for it in range(ROUTING_ITERS):
        c_ij = jax.nn.softmax(b_ij, axis=2)
        s = jnp.sum(c_ij * u_hat, axis=1, keepdims=True) + bias                # (B, 1, C, O)
        norm = jnp.sqrt(jnp.sum(s * s, axis=-1, keepdims=True))
        v = norm / (1.0 + norm * norm + EPS) * s
        if it < ROUTING_ITERS - 1:
            a = jnp.sum(u_hat * v, axis=-1, keepdims=True)
            b_ij = b_ij + a
    return v[:, 0]                                                             # (B, C, O)


if __name__ == "__main__":
    key = jax.random.PRNGKey(0)
    kx, kw, kb = jax.random.split(key, 3)

    # deterministic "module parameters" (same shapes as the nn.Parameter init)
    W = jax.random.normal(kw, (1, R, C, O, I), jnp.float32) * 0.01
    bias = jax.random.uniform(kb, (1, 1, C, O), jnp.float32) * 0.01

    # input x: (B, num_routes, in_channels)
    x = jax.random.normal(kx, (B, R, I), jnp.float32)

    # One-time parameter prep (kept out of the per-call path, per the perf review).
    w_t, bias_big = prepare_capsule_params(W, bias)

    out = jax.block_until_ready(capsule_layer_pallas(x, w_t, bias_big))
    ref = jax.block_until_ready(capsule_layer_ref(x, W, bias))

    np.testing.assert_allclose(np.asarray(out), np.asarray(ref), rtol=2e-3, atol=2e-5)
    assert out.shape == (B, C, O)
    print("KERNEL_OK")
</pallas_src>

<mosaic_0001>
module attributes {stable_mosaic.version = 11 : i64} {
  func.func @_capsule_kernel(%arg0: i32, %arg1: memref<2x8x128xf32, #tpu.memory_space<vmem>>, %arg2: memref<8x128x128xf32, #tpu.memory_space<vmem>>, %arg3: memref<8x128xf32, #tpu.memory_space<vmem>>, %arg4: memref<2x1x128xf32, #tpu.memory_space<vmem>>) attributes {dimension_semantics = [#tpu.dimension_semantics<parallel>], iteration_bounds = array<i64: 1>, scalar_prefetch = 0 : i64, scratch_operands = 0 : i64, tpu.core_type = #tpu.core_type<tc>, window_params = [{transform_indices = @transform_0, window_bounds = array<i64: 2, 8, 128>}, {pipeline_mode = #tpu.pipeline_mode<synchronous>, transform_indices = @transform_1, window_bounds = array<i64: 8, 128, 128>}, {pipeline_mode = #tpu.pipeline_mode<synchronous>, transform_indices = @transform_2, window_bounds = array<i64: 8, 128>}, {transform_indices = @transform_3, window_bounds = array<i64: 2, 1, 128>}]} {
    %c0 = arith.constant 0 : index
    %c0_0 = arith.constant 0 : index
    %0 = vector.load %arg3[%c0, %c0_0] : memref<8x128xf32, #tpu.memory_space<vmem>>, vector<8x128xf32>
    %1 = tpu.iota {dimensions = array<i32: 1>} : vector<8x128xi32>
    %2 = tpu.iota {dimensions = array<i32: 0>} : vector<8x128xi32>
    %c16_i32 = arith.constant 16 : i32
    %3 = vector.broadcast %c16_i32 : i32 to vector<8x128xi32>
    %4 = arith.muli %2, %3 : vector<8x128xi32>
    %5 = arith.cmpi sge, %1, %4 : vector<8x128xi32>
    %c16_i32_1 = arith.constant 16 : i32
    %6 = vector.broadcast %c16_i32_1 : i32 to vector<8x128xi32>
    %7 = arith.addi %4, %6 : vector<8x128xi32>
    %8 = arith.cmpi slt, %1, %7 : vector<8x128xi32>
    %9 = arith.andi %5, %8 : vector<8x128xi1>
    %10 = arith.extui %9 : vector<8x128xi1> to vector<8x128xi32>
    %11 = arith.sitofp %10 : vector<8x128xi32> to vector<8x128xf32>
    %c0_i32 = arith.constant 0 : i32
    %12 = arith.index_cast %c0_i32 : i32 to index
    %c0_2 = arith.constant 0 : index
    %c0_3 = arith.constant 0 : index
    %13 = vector.load %arg1[%12, %c0_2, %c0_3] : memref<2x8x128xf32, #tpu.memory_space<vmem>>, vector<1x8x128xf32>
    %14 = vector.shape_cast %13 : vector<1x8x128xf32> to vector<8x128xf32>
    %cst = arith.constant 0.000000e+00 : f32
    %15 = vector.broadcast %cst : f32 to vector<128x128xf32>
    %c0_4 = arith.constant 0 : index
    %c0_5 = arith.constant 0 : index
    %c0_6 = arith.constant 0 : index
    %16 = vector.load %arg2[%c0_4, %c0_5, %c0_6] : memref<8x128x128xf32, #tpu.memory_space<vmem>>, vector<1x128x128xf32>
    %17 = vector.shape_cast %16 : vector<1x128x128xf32> to vector<128x128xf32>
    %18 = vector.extract_strided_slice %14 {offsets = [0, 0], sizes = [1, 128], strides = [1, 1]} : vector<8x128xf32> to vector<1x128xf32>
    %19 = vector.broadcast %18 : vector<1x128xf32> to vector<128x128xf32>
    %20 = arith.mulf %17, %19 : vector<128x128xf32>
    %21 = arith.addf %15, %20 : vector<128x128xf32>
    %c1 = arith.constant 1 : index
    %c0_7 = arith.constant 0 : index
    %c0_8 = arith.constant 0 : index
    %22 = vector.load %arg2[%c1, %c0_7, %c0_8] : memref<8x128x128xf32, #tpu.memory_space<vmem>>, vector<1x128x128xf32>
    %23 = vector.shape_cast %22 : vector<1x128x128xf32> to vector<128x128xf32>
    %24 = vector.extract_strided_slice %14 {offsets = [1, 0], sizes = [1, 128], strides = [1, 1]} : vector<8x128xf32> to vector<1x128xf32>
    %25 = vector.broadcast %24 : vector<1x128xf32> to vector<128x128xf32>
    %26 = arith.mulf %23, %25 : vector<128x128xf32>
    %27 = arith.addf %21, %26 : vector<128x128xf32>
    %c2 = arith.constant 2 : index
    %c0_9 = arith.constant 0 : index
    %c0_10 = arith.constant 0 : index
    %28 = vector.load %arg2[%c2, %c0_9, %c0_10] : memref<8x128x128xf32, #tpu.memory_space<vmem>>, vector<1x128x128xf32>
    %29 = vector.shape_cast %28 : vector<1x128x128xf32> to vector<128x128xf32>
    %30 = vector.extract_strided_slice %14 {offsets = [2, 0], sizes = [1, 128], strides = [1, 1]} : vector<8x128xf32> to vector<1x128xf32>
    %31 = vector.broadcast %30 : vector<1x128xf32> to vector<128x128xf32>
    %32 = arith.mulf %29, %31 : vector<128x128xf32>
    %33 = arith.addf %27, %32 : vector<128x128xf32>
    %c3 = arith.constant 3 : index
    %c0_11 = arith.constant 0 : index
    %c0_12 = arith.constant 0 : index
    %34 = vector.load %arg2[%c3, %c0_11, %c0_12] : memref<8x128x128xf32, #tpu.memory_space<vmem>>, vector<1x128x128xf32>
    %35 = vector.shape_cast %34 : vector<1x128x128xf32> to vector<128x128xf32>
    %36 = vector.extract_strided_slice %14 {offsets = [3, 0], sizes = [1, 128], strides = [1, 1]} : vector<8x128xf32> to vector<1x128xf32>
    %37 = vector.broadcast %36 : vector<1x128xf32> to vector<128x128xf32>
    %38 = arith.mulf %35, %37 : vector<128x128xf32>
    %39 = arith.addf %33, %38 : vector<128x128xf32>
    %c4 = arith.constant 4 : index
    %c0_13 = arith.constant 0 : index
    %c0_14 = arith.constant 0 : index
    %40 = vector.load %arg2[%c4, %c0_13, %c0_14] : memref<8x128x128xf32, #tpu.memory_space<vmem>>, vector<1x128x128xf32>
    %41 = vector.shape_cast %40 : vector<1x128x128xf32> to vector<128x128xf32>
    %42 = vector.extract_strided_slice %14 {offsets = [4, 0], sizes = [1, 128], strides = [1, 1]} : vector<8x128xf32> to vector<1x128xf32>
    %43 = vector.broadcast %42 : vector<1x128xf32> to vector<128x128xf32>
    %44 = arith.mulf %41, %43 : vector<128x128xf32>
    %45 = arith.addf %39, %44 : vector<128x128xf32>
    %c5 = arith.constant 5 : index
    %c0_15 = arith.constant 0 : index
    %c0_16 = arith.constant 0 : index
    %46 = vector.load %arg2[%c5, %c0_15, %c0_16] : memref<8x128x128xf32, #tpu.memory_space<vmem>>, vector<1x128x128xf32>
    %47 = vector.shape_cast %46 : vector<1x128x128xf32> to vector<128x128xf32>
    %48 = vector.extract_strided_slice %14 {offsets = [5, 0], sizes = [1, 128], strides = [1, 1]} : vector<8x128xf32> to vector<1x128xf32>
    %49 = vector.broadcast %48 : vector<1x128xf32> to vector<128x128xf32>
    %50 = arith.mulf %47, %49 : vector<128x128xf32>
    %51 = arith.addf %45, %50 : vector<128x128xf32>
    %c6 = arith.constant 6 : index
    %c0_17 = arith.constant 0 : index
    %c0_18 = arith.constant 0 : index
    %52 = vector.load %arg2[%c6, %c0_17, %c0_18] : memref<8x128x128xf32, #tpu.memory_space<vmem>>, vector<1x128x128xf32>
    %53 = vector.shape_cast %52 : vector<1x128x128xf32> to vector<128x128xf32>
    %54 = vector.extract_strided_slice %14 {offsets = [6, 0], sizes = [1, 128], strides = [1, 1]} : vector<8x128xf32> to vector<1x128xf32>
    %55 = vector.broadcast %54 : vector<1x128xf32> to vector<128x128xf32>
    %56 = arith.mulf %53, %55 : vector<128x128xf32>
    %57 = arith.addf %51, %56 : vector<128x128xf32>
    %c7 = arith.constant 7 : index
    %c0_19 = arith.constant 0 : index
    %c0_20 = arith.constant 0 : index
    %58 = vector.load %arg2[%c7, %c0_19, %c0_20] : memref<8x128x128xf32, #tpu.memory_space<vmem>>, vector<1x128x128xf32>
    %59 = vector.shape_cast %58 : vector<1x128x128xf32> to vector<128x128xf32>
    %60 = vector.extract_strided_slice %14 {offsets = [7, 0], sizes = [1, 128], strides = [1, 1]} : vector<8x128xf32> to vector<1x128xf32>
    %61 = vector.broadcast %60 : vector<1x128xf32> to vector<128x128xf32>
    %62 = arith.mulf %59, %61 : vector<128x128xf32>
    %63 = arith.addf %57, %62 : vector<128x128xf32>
    %cst_21 = arith.constant 0.000000e+00 : f32
    %64 = vector.broadcast %cst_21 : f32 to vector<8x128xf32>
    %cst_22 = arith.constant 1.250000e-01 : f32
    %65 = vector.broadcast %cst_22 : f32 to vector<8x128xf32>
    %cst_23 = arith.constant dense<0.000000e+00> : vector<8x128xf32>
    %66 = tpu.matmul %65, %63, %cst_23 {dimension_numbers = #tpu.dot_dimension_numbers<[1], [1], [0], [0], [0, 0, 1, 0], [], []>, precision = #tpu.contract_precision<fp32>} : vector<8x128xf32>, vector<128x128xf32>, vector<8x128xf32> -> vector<8x128xf32>
    %67 = arith.mulf %66, %11 : vector<8x128xf32>
    %68 = arith.addf %67, %0 : vector<8x128xf32>
    %69 = arith.mulf %68, %68 : vector<8x128xf32>
    %cst_24 = arith.constant dense<0.000000e+00> : vector<8xf32>
    %70 = vector.multi_reduction <add>, %69, %cst_24 [1] : vector<8x128xf32> to vector<8xf32>
    %71 = vector.shape_cast %70 : vector<8xf32> to vector<8x1xf32>
    %72 = math.sqrt %71 : vector<8x1xf32>
    %cst_25 = arith.constant 1.000000e+00 : f32
    %73 = vector.broadcast %cst_25 : f32 to vector<8x1xf32>
    %74 = arith.addf %73, %71 : vector<8x1xf32>
    %cst_26 = arith.constant 9.99999968E-21 : f32
    %75 = vector.broadcast %cst_26 : f32 to vector<8x1xf32>
    %76 = arith.addf %74, %75 : vector<8x1xf32>
    %77 = arith.divf %72, %76 : vector<8x1xf32>
    %78 = vector.broadcast %77 : vector<8x1xf32> to vector<8x128xf32>
    %79 = arith.mulf %78, %68 : vector<8x128xf32>
    %cst_27 = arith.constant dense<0.000000e+00> : vector<8x128xf32>
    %80 = tpu.matmul %79, %63, %cst_27 {dimension_numbers = #tpu.dot_dimension_numbers<[1], [0], [0], [1], [0, 0, 1, 1], [], []>} : vector<8x128xf32>, vector<128x128xf32>, vector<8x128xf32> -> vector<8x128xf32>
    %81 = arith.addf %64, %80 : vector<8x128xf32>
    %cst_28 = arith.constant dense<0xFF800000> : vector<128xf32>
    %82 = vector.multi_reduction <maximumf>, %81, %cst_28 [0] : vector<8x128xf32> to vector<128xf32>
    %83 = vector.shape_cast %82 : vector<128xf32> to vector<1x128xf32>
    %84 = vector.broadcast %83 : vector<1x128xf32> to vector<8x128xf32>
    %85 = arith.subf %81, %84 : vector<8x128xf32>
    %86 = math.exp %85 : vector<8x128xf32>
    %cst_29 = arith.constant dense<0.000000e+00> : vector<128xf32>
    %87 = vector.multi_reduction <add>, %86, %cst_29 [0] : vector<8x128xf32> to vector<128xf32>
    %88 = vector.shape_cast %87 : vector<128xf32> to vector<1x128xf32>
    %89 = tpu.reciprocal %88 {approx = true} : vector<1x128xf32> -> vector<1x128xf32>
    %90 = vector.broadcast %89 : vector<1x128xf32> to vector<8x128xf32>
    %91 = arith.mulf %86, %90 : vector<8x128xf32>
    %cst_30 = arith.constant dense<0.000000e+00> : vector<8x128xf32>
    %92 = tpu.matmul %91, %63, %cst_30 {dimension_numbers = #tpu.dot_dimension_numbers<[1], [1], [0], [0], [0, 0, 1, 0], [], []>, precision = #tpu.contract_precision<fp32>} : vector<8x128xf32>, vector<128x128xf32>, vector<8x128xf32> -> vector<8x128xf32>
    %93 = arith.mulf %92, %11 : vector<8x128xf32>
    %94 = arith.addf %93, %0 : vector<8x128xf32>
    %95 = arith.mulf %94, %94 : vector<8x128xf32>
    %cst_31 = arith.constant dense<0.000000e+00> : vector<8xf32>
    %96 = vector.multi_reduction <add>, %95, %cst_31 [1] : vector<8x128xf32> to vector<8xf32>
    %97 = vector.shape_cast %96 : vector<8xf32> to vector<8x1xf32>
    %98 = math.sqrt %97 : vector<8x1xf32>
    %cst_32 = arith.constant 1.000000e+00 : f32
    %99 = vector.broadcast %cst_32 : f32 to vector<8x1xf32>
    %100 = arith.addf %99, %97 : vector<8x1xf32>
    %cst_33 = arith.constant 9.99999968E-21 : f32
    %101 = vector.broadcast %cst_33 : f32 to vector<8x1xf32>
    %102 = arith.addf %100, %101 : vector<8x1xf32>
    %103 = arith.divf %98, %102 : vector<8x1xf32>
    %104 = vector.broadcast %103 : vector<8x1xf32> to vector<8x128xf32>
    %105 = arith.mulf %104, %94 : vector<8x128xf32>
    %cst_34 = arith.constant dense<0.000000e+00> : vector<8x128xf32>
    %106 = tpu.matmul %105, %63, %cst_34 {dimension_numbers = #tpu.dot_dimension_numbers<[1], [0], [0], [1], [0, 0, 1, 1], [], []>} : vector<8x128xf32>, vector<128x128xf32>, vector<8x128xf32> -> vector<8x128xf32>
    %107 = arith.addf %81, %106 : vector<8x128xf32>
    %cst_35 = arith.constant dense<0xFF800000> : vector<128xf32>
    %108 = vector.multi_reduction <maximumf>, %107, %cst_35 [0] : vector<8x128xf32> to vector<128xf32>
    %109 = vector.shape_cast %108 : vector<128xf32> to vector<1x128xf32>
    %110 = vector.broadcast %109 : vector<1x128xf32> to vector<8x128xf32>
    %111 = arith.subf %107, %110 : vector<8x128xf32>
    %112 = math.exp %111 : vector<8x128xf32>
    %cst_36 = arith.constant dense<0.000000e+00> : vector<128xf32>
    %113 = vector.multi_reduction <add>, %112, %cst_36 [0] : vector<8x128xf32> to vector<128xf32>
    %114 = vector.shape_cast %113 : vector<128xf32> to vector<1x128xf32>
    %115 = tpu.reciprocal %114 {approx = true} : vector<1x128xf32> -> vector<1x128xf32>
    %116 = vector.broadcast %115 : vector<1x128xf32> to vector<8x128xf32>
    %117 = arith.mulf %112, %116 : vector<8x128xf32>
    %cst_37 = arith.constant dense<0.000000e+00> : vector<8x128xf32>
    %118 = tpu.matmul %117, %63, %cst_37 {dimension_numbers = #tpu.dot_dimension_numbers<[1], [1], [0], [0], [0, 0, 1, 0], [], []>, precision = #tpu.contract_precision<fp32>} : vector<8x128xf32>, vector<128x128xf32>, vector<8x128xf32> -> vector<8x128xf32>
    %119 = arith.mulf %118, %11 : vector<8x128xf32>
    %120 = arith.addf %119, %0 : vector<8x128xf32>
    %121 = arith.mulf %120, %120 : vector<8x128xf32>
    %cst_38 = arith.constant dense<0.000000e+00> : vector<8xf32>
    %122 = vector.multi_reduction <add>, %121, %cst_38 [1] : vector<8x128xf32> to vector<8xf32>
    %123 = vector.shape_cast %122 : vector<8xf32> to vector<8x1xf32>
    %124 = math.sqrt %123 : vector<8x1xf32>
    %cst_39 = arith.constant 1.000000e+00 : f32
    %125 = vector.broadcast %cst_39 : f32 to vector<8x1xf32>
    %126 = arith.addf %125, %123 : vector<8x1xf32>
    %cst_40 = arith.constant 9.99999968E-21 : f32
    %127 = vector.broadcast %cst_40 : f32 to vector<8x1xf32>
    %128 = arith.addf %126, %127 : vector<8x1xf32>
    %129 = arith.divf %124, %128 : vector<8x1xf32>
    %130 = vector.broadcast %129 : vector<8x1xf32> to vector<8x128xf32>
    %131 = arith.mulf %130, %120 : vector<8x128xf32>
    %cst_41 = arith.constant dense<0.000000e+00> : vector<128xf32>
    %132 = vector.multi_reduction <add>, %131, %cst_41 [0] : vector<8x128xf32> to vector<128xf32>
    %133 = vector.shape_cast %132 : vector<128xf32> to vector<1x128xf32>
    %134 = arith.index_cast %c0_i32 : i32 to index
    %c0_42 = arith.constant 0 : index
    %c0_43 = arith.constant 0 : index
    %135 = vector.load %arg4[%134, %c0_42, %c0_43] : memref<2x1x128xf32, #tpu.memory_space<vmem>>, vector<1x1x128xf32>
    %136 = vector.shape_cast %135 : vector<1x1x128xf32> to vector<1x128xf32>
    %137 = vector.shape_cast %133 : vector<1x128xf32> to vector<1x1x128xf32>
    tpu.vector_store %arg4[%134, %c0_42, %c0_43], %137 {strides = array<i32>} : memref<2x1x128xf32, #tpu.memory_space<vmem>>, vector<1x1x128xf32>,
    %c1_i32 = arith.constant 1 : i32
    %138 = arith.index_cast %c1_i32 : i32 to index
    %c0_44 = arith.constant 0 : index
    %c0_45 = arith.constant 0 : index
    %139 = vector.load %arg1[%138, %c0_44, %c0_45] : memref<2x8x128xf32, #tpu.memory_space<vmem>>, vector<1x8x128xf32>
    %140 = vector.shape_cast %139 : vector<1x8x128xf32> to vector<8x128xf32>
    %cst_46 = arith.constant 0.000000e+00 : f32
    %141 = vector.broadcast %cst_46 : f32 to vector<128x128xf32>
    %c0_47 = arith.constant 0 : index
    %c0_48 = arith.constant 0 : index
    %c0_49 = arith.constant 0 : index
    %142 = vector.load %arg2[%c0_47, %c0_48, %c0_49] : memref<8x128x128xf32, #tpu.memory_space<vmem>>, vector<1x128x128xf32>
    %143 = vector.shape_cast %142 : vector<1x128x128xf32> to vector<128x128xf32>
    %144 = vector.extract_strided_slice %140 {offsets = [0, 0], sizes = [1, 128], strides = [1, 1]} : vector<8x128xf32> to vector<1x128xf32>
    %145 = vector.broadcast %144 : vector<1x128xf32> to vector<128x128xf32>
    %146 = arith.mulf %143, %145 : vector<128x128xf32>
    %147 = arith.addf %141, %146 : vector<128x128xf32>
    %c1_50 = arith.constant 1 : index
    %c0_51 = arith.constant 0 : index
    %c0_52 = arith.constant 0 : index
    %148 = vector.load %arg2[%c1_50, %c0_51, %c0_52] : memref<8x128x128xf32, #tpu.memory_space<vmem>>, vector<1x128x128xf32>
    %149 = vector.shape_cast %148 : vector<1x128x128xf32> to vector<128x128xf32>
    %150 = vector.extract_strided_slice %140 {offsets = [1, 0], sizes = [1, 128], strides = [1, 1]} : vector<8x128xf32> to vector<1x128xf32>
    %151 = vector.broadcast %150 : vector<1x128xf32> to vector<128x128xf32>
    %152 = arith.mulf %149, %151 : vector<128x128xf32>
    %153 = arith.addf %147, %152 : vector<128x128xf32>
    %c2_53 = arith.constant 2 : index
    %c0_54 = arith.constant 0 : index
    %c0_55 = arith.constant 0 : index
    %154 = vector.load %arg2[%c2_53, %c0_54, %c0_55] : memref<8x128x128xf32, #tpu.memory_space<vmem>>, vector<1x128x128xf32>
    %155 = vector.shape_cast %154 : vector<1x128x128xf32> to vector<128x128xf32>
    %156 = vector.extract_strided_slice %140 {offsets = [2, 0], sizes = [1, 128], strides = [1, 1]} : vector<8x128xf32> to vector<1x128xf32>
    %157 = vector.broadcast %156 : vector<1x128xf32> to vector<128x128xf32>
    %158 = arith.mulf %155, %157 : vector<128x128xf32>
    %159 = arith.addf %153, %158 : vector<128x128xf32>
    %c3_56 = arith.constant 3 : index
    %c0_57 = arith.constant 0 : index
    %c0_58 = arith.constant 0 : index
    %160 = vector.load %arg2[%c3_56, %c0_57, %c0_58] : memref<8x128x128xf32, #tpu.memory_space<vmem>>, vector<1x128x128xf32>
    %161 = vector.shape_cast %160 : vector<1x128x128xf32> to vector<128x128xf32>
    %162 = vector.extract_strided_slice %140 {offsets = [3, 0], sizes = [1, 128], strides = [1, 1]} : vector<8x128xf32> to vector<1x128xf32>
    %163 = vector.broadcast %162 : vector<1x128xf32> to vector<128x128xf32>
    %164 = arith.mulf %161, %163 : vector<128x128xf32>
    %165 = arith.addf %159, %164 : vector<128x128xf32>
    %c4_59 = arith.constant 4 : index
    %c0_60 = arith.constant 0 : index
    %c0_61 = arith.constant 0 : index
    %166 = vector.load %arg2[%c4_59, %c0_60, %c0_61] : memref<8x128x128xf32, #tpu.memory_space<vmem>>, vector<1x128x128xf32>
    %167 = vector.shape_cast %166 : vector<1x128x128xf32> to vector<128x128xf32>
    %168 = vector.extract_strided_slice %140 {offsets = [4, 0], sizes = [1, 128], strides = [1, 1]} : vector<8x128xf32> to vector<1x128xf32>
    %169 = vector.broadcast %168 : vector<1x128xf32> to vector<128x128xf32>
    %170 = arith.mulf %167, %169 : vector<128x128xf32>
    %171 = arith.addf %165, %170 : vector<128x128xf32>
    %c5_62 = arith.constant 5 : index
    %c0_63 = arith.constant 0 : index
    %c0_64 = arith.constant 0 : index
    %172 = vector.load %arg2[%c5_62, %c0_63, %c0_64] : memref<8x128x128xf32, #tpu.memory_space<vmem>>, vector<1x128x128xf32>
    %173 = vector.shape_cast %172 : vector<1x128x128xf32> to vector<128x128xf32>
    %174 = vector.extract_strided_slice %140 {offsets = [5, 0], sizes = [1, 128], strides = [1, 1]} : vector<8x128xf32> to vector<1x128xf32>
    %175 = vector.broadcast %174 : vector<1x128xf32> to vector<128x128xf32>
    %176 = arith.mulf %173, %175 : vector<128x128xf32>
    %177 = arith.addf %171, %176 : vector<128x128xf32>
    %c6_65 = arith.constant 6 : index
    %c0_66 = arith.constant 0 : index
    %c0_67 = arith.constant 0 : index
    %178 = vector.load %arg2[%c6_65, %c0_66, %c0_67] : memref<8x128x128xf32, #tpu.memory_space<vmem>>, vector<1x128x128xf32>
    %179 = vector.shape_cast %178 : vector<1x128x128xf32> to vector<128x128xf32>
    %180 = vector.extract_strided_slice %140 {offsets = [6, 0], sizes = [1, 128], strides = [1, 1]} : vector<8x128xf32> to vector<1x128xf32>
    %181 = vector.broadcast %180 : vector<1x128xf32> to vector<128x128xf32>
    %182 = arith.mulf %179, %181 : vector<128x128xf32>
    %183 = arith.addf %177, %182 : vector<128x128xf32>
    %c7_68 = arith.constant 7 : index
    %c0_69 = arith.constant 0 : index
    %c0_70 = arith.constant 0 : index
    %184 = vector.load %arg2[%c7_68, %c0_69, %c0_70] : memref<8x128x128xf32, #tpu.memory_space<vmem>>, vector<1x128x128xf32>
    %185 = vector.shape_cast %184 : vector<1x128x128xf32> to vector<128x128xf32>
    %186 = vector.extract_strided_slice %140 {offsets = [7, 0], sizes = [1, 128], strides = [1, 1]} : vector<8x128xf32> to vector<1x128xf32>
    %187 = vector.broadcast %186 : vector<1x128xf32> to vector<128x128xf32>
    %188 = arith.mulf %185, %187 : vector<128x128xf32>
    %189 = arith.addf %183, %188 : vector<128x128xf32>
    %cst_71 = arith.constant 0.000000e+00 : f32
    %190 = vector.broadcast %cst_71 : f32 to vector<8x128xf32>
    %cst_72 = arith.constant 1.250000e-01 : f32
    %191 = vector.broadcast %cst_72 : f32 to vector<8x128xf32>
    %cst_73 = arith.constant dense<0.000000e+00> : vector<8x128xf32>
    %192 = tpu.matmul %191, %189, %cst_73 {dimension_numbers = #tpu.dot_dimension_numbers<[1], [1], [0], [0], [0, 0, 1, 0], [], []>, precision = #tpu.contract_precision<fp32>} : vector<8x128xf32>, vector<128x128xf32>, vector<8x128xf32> -> vector<8x128xf32>
    %193 = arith.mulf %192, %11 : vector<8x128xf32>
    %194 = arith.addf %193, %0 : vector<8x128xf32>
    %195 = arith.mulf %194, %194 : vector<8x128xf32>
    %cst_74 = arith.constant dense<0.000000e+00> : vector<8xf32>
    %196 = vector.multi_reduction <add>, %195, %cst_74 [1] : vector<8x128xf32> to vector<8xf32>
    %197 = vector.shape_cast %196 : vector<8xf32> to vector<8x1xf32>
    %198 = math.sqrt %197 : vector<8x1xf32>
    %cst_75 = arith.constant 1.000000e+00 : f32
    %199 = vector.broadcast %cst_75 : f32 to vector<8x1xf32>
    %200 = arith.addf %199, %197 : vector<8x1xf32>
    %cst_76 = arith.constant 9.99999968E-21 : f32
    %201 = vector.broadcast %cst_76 : f32 to vector<8x1xf32>
    %202 = arith.addf %200, %201 : vector<8x1xf32>
    %203 = arith.divf %198, %202 : vector<8x1xf32>
    %204 = vector.broadcast %203 : vector<8x1xf32> to vector<8x128xf32>
    %205 = arith.mulf %204, %194 : vector<8x128xf32>
    %cst_77 = arith.constant dense<0.000000e+00> : vector<8x128xf32>
    %206 = tpu.matmul %205, %189, %cst_77 {dimension_numbers = #tpu.dot_dimension_numbers<[1], [0], [0], [1], [0, 0, 1, 1], [], []>} : vector<8x128xf32>, vector<128x128xf32>, vector<8x128xf32> -> vector<8x128xf32>
    %207 = arith.addf %190, %206 : vector<8x128xf32>
    %cst_78 = arith.constant dense<0xFF800000> : vector<128xf32>
    %208 = vector.multi_reduction <maximumf>, %207, %cst_78 [0] : vector<8x128xf32> to vector<128xf32>
    %209 = vector.shape_cast %208 : vector<128xf32> to vector<1x128xf32>
    %210 = vector.broadcast %209 : vector<1x128xf32> to vector<8x128xf32>
    %211 = arith.subf %207, %210 : vector<8x128xf32>
    %212 = math.exp %211 : vector<8x128xf32>
    %cst_79 = arith.constant dense<0.000000e+00> : vector<128xf32>
    %213 = vector.multi_reduction <add>, %212, %cst_79 [0] : vector<8x128xf32> to vector<128xf32>
    %214 = vector.shape_cast %213 : vector<128xf32> to vector<1x128xf32>
    %215 = tpu.reciprocal %214 {approx = true} : vector<1x128xf32> -> vector<1x128xf32>
    %216 = vector.broadcast %215 : vector<1x128xf32> to vector<8x128xf32>
    %217 = arith.mulf %212, %216 : vector<8x128xf32>
    %cst_80 = arith.constant dense<0.000000e+00> : vector<8x128xf32>
    %218 = tpu.matmul %217, %189, %cst_80 {dimension_numbers = #tpu.dot_dimension_numbers<[1], [1], [0], [0], [0, 0, 1, 0], [], []>, precision = #tpu.contract_precision<fp32>} : vector<8x128xf32>, vector<128x128xf32>, vector<8x128xf32> -> vector<8x128xf32>
    %219 = arith.mulf %218, %11 : vector<8x128xf32>
    %220 = arith.addf %219, %0 : vector<8x128xf32>
    %221 = arith.mulf %220, %220 : vector<8x128xf32>
    %cst_81 = arith.constant dense<0.000000e+00> : vector<8xf32>
    %222 = vector.multi_reduction <add>, %221, %cst_81 [1] : vector<8x128xf32> to vector<8xf32>
    %223 = vector.shape_cast %222 : vector<8xf32> to vector<8x1xf32>
    %224 = math.sqrt %223 : vector<8x1xf32>
    %cst_82 = arith.constant 1.000000e+00 : f32
    %225 = vector.broadcast %cst_82 : f32 to vector<8x1xf32>
    %226 = arith.addf %225, %223 : vector<8x1xf32>
    %cst_83 = arith.constant 9.99999968E-21 : f32
    %227 = vector.broadcast %cst_83 : f32 to vector<8x1xf32>
    %228 = arith.addf %226, %227 : vector<8x1xf32>
    %229 = arith.divf %224, %228 : vector<8x1xf32>
    %230 = vector.broadcast %229 : vector<8x1xf32> to vector<8x128xf32>
    %231 = arith.mulf %230, %220 : vector<8x128xf32>
    %cst_84 = arith.constant dense<0.000000e+00> : vector<8x128xf32>
    %232 = tpu.matmul %231, %189, %cst_84 {dimension_numbers = #tpu.dot_dimension_numbers<[1], [0], [0], [1], [0, 0, 1, 1], [], []>} : vector<8x128xf32>, vector<128x128xf32>, vector<8x128xf32> -> vector<8x128xf32>
    %233 = arith.addf %207, %232 : vector<8x128xf32>
    %cst_85 = arith.constant dense<0xFF800000> : vector<128xf32>
    %234 = vector.multi_reduction <maximumf>, %233, %cst_85 [0] : vector<8x128xf32> to vector<128xf32>
    %235 = vector.shape_cast %234 : vector<128xf32> to vector<1x128xf32>
    %236 = vector.broadcast %235 : vector<1x128xf32> to vector<8x128xf32>
    %237 = arith.subf %233, %236 : vector<8x128xf32>
    %238 = math.exp %237 : vector<8x128xf32>
    %cst_86 = arith.constant dense<0.000000e+00> : vector<128xf32>
    %239 = vector.multi_reduction <add>, %238, %cst_86 [0] : vector<8x128xf32> to vector<128xf32>
    %240 = vector.shape_cast %239 : vector<128xf32> to vector<1x128xf32>
    %241 = tpu.reciprocal %240 {approx = true} : vector<1x128xf32> -> vector<1x128xf32>
    %242 = vector.broadcast %241 : vector<1x128xf32> to vector<8x128xf32>
    %243 = arith.mulf %238, %242 : vector<8x128xf32>
    %cst_87 = arith.constant dense<0.000000e+00> : vector<8x128xf32>
    %244 = tpu.matmul %243, %189, %cst_87 {dimension_numbers = #tpu.dot_dimension_numbers<[1], [1], [0], [0], [0, 0, 1, 0], [], []>, precision = #tpu.contract_precision<fp32>} : vector<8x128xf32>, vector<128x128xf32>, vector<8x128xf32> -> vector<8x128xf32>
    %245 = arith.mulf %244, %11 : vector<8x128xf32>
    %246 = arith.addf %245, %0 : vector<8x128xf32>
    %247 = arith.mulf %246, %246 : vector<8x128xf32>
    %cst_88 = arith.constant dense<0.000000e+00> : vector<8xf32>
    %248 = vector.multi_reduction <add>, %247, %cst_88 [1] : vector<8x128xf32> to vector<8xf32>
    %249 = vector.shape_cast %248 : vector<8xf32> to vector<8x1xf32>
    %250 = math.sqrt %249 : vector<8x1xf32>
    %cst_89 = arith.constant 1.000000e+00 : f32
    %251 = vector.broadcast %cst_89 : f32 to vector<8x1xf32>
    %252 = arith.addf %251, %249 : vector<8x1xf32>
    %cst_90 = arith.constant 9.99999968E-21 : f32
    %253 = vector.broadcast %cst_90 : f32 to vector<8x1xf32>
    %254 = arith.addf %252, %253 : vector<8x1xf32>
    %255 = arith.divf %250, %254 : vector<8x1xf32>
    %256 = vector.broadcast %255 : vector<8x1xf32> to vector<8x128xf32>
    %257 = arith.mulf %256, %246 : vector<8x128xf32>
    %cst_91 = arith.constant dense<0.000000e+00> : vector<128xf32>
    %258 = vector.multi_reduction <add>, %257, %cst_91 [0] : vector<8x128xf32> to vector<128xf32>
    %259 = vector.shape_cast %258 : vector<128xf32> to vector<1x128xf32>
    %260 = arith.index_cast %c1_i32 : i32 to index
    %c0_92 = arith.constant 0 : index
    %c0_93 = arith.constant 0 : index
    %261 = vector.load %arg4[%260, %c0_92, %c0_93] : memref<2x1x128xf32, #tpu.memory_space<vmem>>, vector<1x1x128xf32>
    %262 = vector.shape_cast %261 : vector<1x1x128xf32> to vector<1x128xf32>
    %263 = vector.shape_cast %259 : vector<1x128xf32> to vector<1x1x128xf32>
    tpu.vector_store %arg4[%260, %c0_92, %c0_93], %263 {strides = array<i32>} : memref<2x1x128xf32, #tpu.memory_space<vmem>>, vector<1x1x128xf32>,
    %c2_i32 = arith.constant 2 : i32
    return
  }
  func.func @transform_0(%arg0: i32) -> (i32, i32, i32) {
    %c0_i32 = arith.constant 0 : i32
    %c0_i32_0 = arith.constant 0 : i32
    %c0_i32_1 = arith.constant 0 : i32
    return %arg0, %c0_i32, %c0_i32_0 : i32, i32, i32
  }
  func.func @transform_1(%arg0: i32) -> (i32, i32, i32) {
    %c0_i32 = arith.constant 0 : i32
    %c0_i32_0 = arith.constant 0 : i32
    %c0_i32_1 = arith.constant 0 : i32
    %c0_i32_2 = arith.constant 0 : i32
    return %c0_i32, %c0_i32_0, %c0_i32_1 : i32, i32, i32
  }
  func.func @transform_2(%arg0: i32) -> (i32, i32) {
    %c0_i32 = arith.constant 0 : i32
    %c0_i32_0 = arith.constant 0 : i32
    %c0_i32_1 = arith.constant 0 : i32
    return %c0_i32, %c0_i32_0 : i32, i32
  }
  func.func @transform_3(%arg0: i32) -> (i32, i32, i32) {
    %c0_i32 = arith.constant 0 : i32
    %c0_i32_0 = arith.constant 0 : i32
    %c0_i32_1 = arith.constant 0 : i32
    return %arg0, %c0_i32, %c0_i32_0 : i32, i32, i32
  }
}

</mosaic_0001>

<bundles_post_ra>
// kernel: _capsule_forward.1
= control target key start
LH: loop header
LB: loop body
LE: loop exit
PB: predicated region body
PF: predicated region fallthrough
CT: control target
= control target key end

     0   :  { %8 = vsyncpa [#allocation3], 0  ;;  %s9788_s0 = inlined_call_operand.hbm [shape: f32[2,8,128], index: 0, kind: input, shape index: {}]   ;;  %s9789_s1 = inlined_call_operand.hbm [shape: f32[8,128,128], index: 1, kind: input, shape index: {}]   ;;  %s9790_s2 = inlined_call_operand.hbm [shape: f32[8,128], index: 2, kind: input, shape index: {}]   ;;  %s9791_s3 = inlined_call_operand.vmem [shape: f32[2,1,128], index: 3, kind: output, shape index: {}]  }
   0x1   :  { %9 = vsyncpa [#allocation5], 0  ;;  %s7396_s12 = smov [#allocation4]   ;;  %s7397_s14 = smov [#allocation2]  }
   0x2   :  { %s27_s13 = sshll.u32 %s7396_s12, 4  ;;  %s15_s15 = sshll.u32 %s7397_s14, 4  ;;  %s28_s13 = int_to_ptr.vmem [resolvable:$true] %s27_s13  ;;  %s16_s15 = int_to_ptr.vmem [resolvable:$true] %s15_s15 }
   0x3   :  { %s7340_s16 = scalar_lea.vmem %s28_s13, 16384  ;;  %p7345_p1 = scmp.lt.s32.totalorder %s28_s13, %s28_s13 }
   0x4   :  { %p7341_p0 = scmp.ne.s32.totalorder %s28_s13, %s7340_s16  ;;  %p7346_p2 = scmp.lt.s32.totalorder %s7340_s16, %s7340_s16 }
   0x6   :  { %p7347_p3 = por %p7346_p2, %p7345_p1 }
   0x8   :  { %p7348_p4 = pnand %p7347_p3, %p7341_p0 }
   0xa   :  { %7351 = shalt.err (!%p7348_p4)
}
   0xb   :  { %s7398_s17 = smov 128   ;;  %s7399_s18 = smov 8  }
   0xc   :  { %33 = dma.hbm_to_vmem [thread:$0]  %s9789_s1, 16384, %s28_s13, [#allocation5], %s7398_s17, %s7398_s17, %s7399_s18  }
   0xd   :  { %s7360_s21 = scalar_lea.vmem %s16_s15, 256  ;;  %p7365_p6 = scmp.lt.s32.totalorder %s16_s15, %s16_s15 }
   0xe   :  { %p7361_p5 = scmp.ne.s32.totalorder %s16_s15, %s7360_s21  ;;  %p7366_p7 = scmp.lt.s32.totalorder %s7360_s21, %s7360_s21 }
  0x10   :  { %p7367_p8 = por %p7366_p7, %p7365_p6 }
  0x12   :  { %p7368_p9 = pnand %p7367_p8, %p7361_p5 }
  0x14   :  { %7371 = shalt.err (!%p7368_p9)
}
  0x15   :  { %21 = dma.hbm_to_vmem [thread:$0]  %s9788_s0, 256, %s16_s15, [#allocation3], %s7398_s17, %s7398_s17, %s7399_s18  }
  0x16   :  { %s7400_s24 = smov [#allocation6]  }
  0x17   :  { %s40_s25 = sshll.u32 %s7400_s24, 4  ;;  %s41_s25 = int_to_ptr.vmem [resolvable:$true] %s40_s25 }
  0x18   :  { %s7380_s26 = scalar_lea.vmem %s41_s25, 128  ;;  %p7385_p11 = scmp.lt.s32.totalorder %s41_s25, %s41_s25 }
  0x19   :  { %p7381_p10 = scmp.ne.s32.totalorder %s41_s25, %s7380_s26  ;;  %p7386_p12 = scmp.lt.s32.totalorder %s7380_s26, %s7380_s26 }
  0x1b   :  { %p7387_p13 = por %p7386_p12, %p7385_p11 }
  0x1d   :  { %p7388_p0 = pnand %p7387_p13, %p7381_p10 }
  0x1f   :  { %7391 = shalt.err (!%p7388_p0)
}
  0x20   :  { %43 = dma.hbm_to_vmem [thread:$0]  %s9790_s2, 128, %s41_s25, [#allocation5]  }
  0x21   :  { %7392 = dma.done.wait [#allocation3], 256  }
  0x22   :  { %7393 = vsyncadd [#allocation3], 4294967040 }
  0x23   :  { %7394 = dma.done.wait [#allocation5], 16512  }
  0x24   :  { %7395 = vsyncadd [#allocation5], 4294950784  ;;  %v9800_v0 = vlaneseq  ;;  %v9819_v1 = vmov 0.0   ;;  %vm7402_vm0 = vmmov 0   ;;  %v65_v11 = vld [vmem:[#allocation2] sm:$0xff]  ;;  %v81_v12 = vld [vmem:[#allocation4 + $0x78] sm:$0xff] }
  0x25   :  { %5882 = vmatprep.subr.mxu0 %v9819_v1  ;;  %5917 = vmatprep.subr.mxu1 %v9819_v1  ;;  %v134_v13 = vld [vmem:[#allocation4 + $0xf8] sm:$0xff]  ;;  %v80_v32 = vld [vmem:[#allocation4 + $0x70] sm:$0xff]  ;;  %v79_v48 = vld [vmem:[#allocation4 + $0x68] sm:$0xff] }
  0x26   :  { %v7436_v2 = vshrl.u32 %v9800_v0, 7  ;;  %5914 = vmatprep.mubr.msk.f32.mxu0 %vm7402_vm0, %v9819_v1  ;;  %5949 = vmatprep.mubr.msk.f32.mxu1 %vm7402_vm0, %v9819_v1  ;;  %v187_v16 = vld [vmem:[#allocation4 + $0x178] sm:$0xff]  ;;  %v133_v33 = vld [vmem:[#allocation4 + $0xf0] sm:$0xff]  ;;  %v132_v53 = vld [vmem:[#allocation4 + $0xe8] sm:$0xff] }
  0x27   :  { %v240_v18 = vld [vmem:[#allocation4 + $0x1f8] sm:$0xff]  ;;  %v186_v34 = vld [vmem:[#allocation4 + $0x170] sm:$0xff]  ;;  %v185_v54 = vld [vmem:[#allocation4 + $0x168] sm:$0xff] }
  0x28   :  { %9970 = vst [vmem:[#allocation9_spill] sm:$0xff] %v7436_v2  ;;  %v9799_v3 = vsub.s32 0, %v7436_v2  ;;  %v9798_v4 = vsub.s32 1, %v7436_v2  ;;  %v9797_v5 = vsub.s32 2, %v7436_v2  ;;  %v9796_v6 = vsub.s32 3, %v7436_v2  ;;  %v293_v20 = vld [vmem:[#allocation4 + $0x278] sm:$0xff] }
  0x29   :  { %v9795_v7 = vsub.s32 4, %v7436_v2  ;;  %v9794_v8 = vsub.s32 5, %v7436_v2  ;;  %v9793_v9 = vsub.s32 6, %v7436_v2  ;;  %v9792_v10 = vsub.s32 7, %v7436_v2  ;;  %v346_v22 = vld [vmem:[#allocation4 + $0x2f8] sm:$0xff]  ;;  %v239_v39 = vld [vmem:[#allocation4 + $0x1f0] sm:$0xff] }
  0x2a   :  { %v7452_v14 = vrot.slane %v65_v11, %v9799_v3  ;;  %v7456_v15 = vrot.slane %v65_v11, %v9798_v4  ;;  %v7460_v17 = vrot.slane %v65_v11, %v9797_v5  ;;  %v7464_v19 = vrot.slane %v65_v11, %v9796_v6  ;;  %v399_v24 = vld [vmem:[#allocation4 + $0x378] sm:$0xff]  ;;  %v292_v40 = vld [vmem:[#allocation4 + $0x270] sm:$0xff]  ;;  %v238_v55 = vld [vmem:[#allocation4 + $0x1e8] sm:$0xff] }
  0x2b   :  { %v7468_v21 = vrot.slane %v65_v11, %v9795_v7  ;;  %v7472_v23 = vrot.slane %v65_v11, %v9794_v8  ;;  %v7476_v25 = vrot.slane %v65_v11, %v9793_v9  ;;  %v452_v26 = vld [vmem:[#allocation4 + $0x3f8] sm:$0xff]  ;;  %v7480_v27 = vrot.slane %v65_v11, %v9792_v10  ;;  %v345_v41 = vld [vmem:[#allocation4 + $0x2f0] sm:$0xff]  ;;  %v291_v60 = vld [vmem:[#allocation4 + $0x268] sm:$0xff] }
  0x2c   :  { %v101_v28 = vmul.f32 %v7452_v14, %v81_v12  ;;  %v154_v29 = vmul.f32 %v7456_v15, %v134_v13  ;;  %v207_v30 = vmul.f32 %v7460_v17, %v187_v16  ;;  %v260_v31 = vmul.f32 %v7464_v19, %v240_v18  ;;  %v398_v46 = vld [vmem:[#allocation4 + $0x370] sm:$0xff]  ;;  %v344_v61 = vld [vmem:[#allocation4 + $0x2e8] sm:$0xff]  ;;  %v78_v18 = vld [vmem:[#allocation4 + $0x60] sm:$0xff] }
  0x2d   :  { %v313_v35 = vmul.f32 %v7468_v21, %v293_v20  ;;  %v366_v36 = vmul.f32 %v7472_v23, %v346_v22  ;;  %v7489_v37 = vmul.f32 %v7476_v25, %v399_v24  ;;  %v7492_v38 = vmul.f32 %v7480_v27, %v452_v26  ;;  %v451_v47 = vld [vmem:[#allocation4 + $0x3f0] sm:$0xff]  ;;  %v397_v62 = vld [vmem:[#allocation4 + $0x368] sm:$0xff]  ;;  %v131_v20 = vld [vmem:[#allocation4 + $0xe0] sm:$0xff] }
  0x2e   :  { %v170_v42 = vadd.f32 %v154_v29, %v101_v28  ;;  %v100_v43 = vmul.f32 %v7452_v14, %v80_v32  ;;  %v153_v44 = vmul.f32 %v7456_v15, %v133_v33  ;;  %v206_v45 = vmul.f32 %v7460_v17, %v186_v34  ;;  %v450_v16 = vld [vmem:[#allocation4 + $0x3e8] sm:$0xff]  ;;  %v184_v29 = vld [vmem:[#allocation4 + $0x160] sm:$0xff]  ;;  %v179_v8 = vld [vmem:[#allocation4 + $0x138] sm:$0xff] }
  0x2f   :  { %v259_v49 = vmul.f32 %v7464_v19, %v239_v39  ;;  %v312_v50 = vmul.f32 %v7468_v21, %v292_v40  ;;  %v365_v51 = vmul.f32 %v7472_v23, %v345_v41  ;;  %v7501_v52 = vmul.f32 %v7476_v25, %v398_v46  ;;  %v290_v32 = vld [vmem:[#allocation4 + $0x260] sm:$0xff]  ;;  %v285_v6 = vld [vmem:[#allocation4 + $0x238] sm:$0xff]  ;;  %v72_v0 = vld [vmem:[#allocation4 + $0x30] sm:$0xff] }
  0x30   :  { %v223_v56 = vadd.f32 %v207_v30, %v170_v42  ;;  %v169_v57 = vadd.f32 %v153_v44, %v100_v43  ;;  %v7504_v58 = vmul.f32 %v7480_v27, %v451_v47  ;;  %v99_v59 = vmul.f32 %v7452_v14, %v79_v48  ;;  %v237_v30 = vld [vmem:[#allocation4 + $0x1e0] sm:$0xff]  ;;  %v77_v47 = vld [vmem:[#allocation4 + $0x58] sm:$0xff] }
  0x31   :  { %v152_v63 = vmul.f32 %v7456_v15, %v132_v53  ;;  %v205_v11 = vmul.f32 %v7460_v17, %v185_v54  ;;  %v258_v12 = vmul.f32 %v7464_v19, %v238_v55  ;;  %v311_v13 = vmul.f32 %v7468_v21, %v291_v60  ;;  %v343_v41 = vld [vmem:[#allocation4 + $0x2e0] sm:$0xff]  ;;  %v130_v48 = vld [vmem:[#allocation4 + $0xd8] sm:$0xff] }
  0x32   :  { %v276_v22 = vadd.f32 %v260_v31, %v223_v56  ;;  %v222_v24 = vadd.f32 %v206_v45, %v169_v57  ;;  %v364_v26 = vmul.f32 %v7472_v23, %v344_v61  ;;  %v417_v28 = vmul.f32 %v7476_v25, %v397_v62  ;;  %v396_v42 = vld [vmem:[#allocation4 + $0x360] sm:$0xff]  ;;  %v183_v57 = vld [vmem:[#allocation4 + $0x158] sm:$0xff] }
  0x33   :  { %v168_v33 = vadd.f32 %v152_v63, %v99_v59  ;;  %v7514_v34 = vmul.f32 %v7480_v27, %v450_v16  ;;  %v98_v39 = vmul.f32 %v7452_v14, %v78_v18  ;;  %v151_v40 = vmul.f32 %v7456_v15, %v131_v20  ;;  %v449_v43 = vld [vmem:[#allocation4 + $0x3e0] sm:$0xff]  ;;  %v236_v59 = vld [vmem:[#allocation4 + $0x1d8] sm:$0xff] }
  0x34   :  { %v329_v31 = vadd.f32 %v313_v35, %v276_v22  ;;  %v275_v44 = vadd.f32 %v259_v49, %v222_v24  ;;  %v204_v45 = vmul.f32 %v7460_v17, %v184_v29  ;;  %v257_v46 = vmul.f32 %v7464_v19, %v237_v30  ;;  %v289_v49 = vld [vmem:[#allocation4 + $0x258] sm:$0xff]  ;;  %v339_v9 = vld [vmem:[#allocation4 + $0x2c0] sm:$0xff] }
  0x35   :  { %v221_v53 = vadd.f32 %v205_v11, %v168_v33  ;;  %v167_v54 = vadd.f32 %v151_v40, %v98_v39  ;;  %v310_v55 = vmul.f32 %v7468_v21, %v290_v32  ;;  %v363_v56 = vmul.f32 %v7472_v23, %v343_v41  ;;  %v342_v20 = vld [vmem:[#allocation4 + $0x2d8] sm:$0xff]  ;;  %v76_v40 = vld [vmem:[#allocation4 + $0x50] sm:$0xff] }
  0x36   :  { %v382_v60 = vadd.f32 %v366_v36, %v329_v31  ;;  %v328_v61 = vadd.f32 %v312_v50, %v275_v44  ;;  %v416_v62 = vmul.f32 %v7476_v25, %v396_v42  ;;  %v469_v35 = vmul.f32 %v7480_v27, %v449_v43  ;;  %v395_v22 = vld [vmem:[#allocation4 + $0x358] sm:$0xff]  ;;  %v129_v41 = vld [vmem:[#allocation4 + $0xd0] sm:$0xff] }
  0x37   :  { %v274_v63 = vadd.f32 %v258_v12, %v221_v53  ;;  %v220_v16 = vadd.f32 %v204_v45, %v167_v54  ;;  %v97_v18 = vmul.f32 %v7452_v14, %v77_v47  ;;  %v150_v11 = vmul.f32 %v7456_v15, %v130_v48  ;;  %v448_v50 = vld [vmem:[#allocation4 + $0x3d8] sm:$0xff]  ;;  %v182_v31 = vld [vmem:[#allocation4 + $0x150] sm:$0xff] }
  0x38   :  { %v435_v24 = vadd.f32 %v7489_v37, %v382_v60  ;;  %v381_v29 = vadd.f32 %v365_v51, %v328_v61  ;;  %v203_v30 = vmul.f32 %v7460_v17, %v183_v57  ;;  %v256_v36 = vmul.f32 %v7464_v19, %v236_v59  ;;  %v288_v54 = vld [vmem:[#allocation4 + $0x250] sm:$0xff] }
  0x39   :  { %v327_v32 = vadd.f32 %v311_v13, %v274_v63  ;;  %v273_v33 = vadd.f32 %v257_v46, %v220_v16  ;;  %v166_v39 = vadd.f32 %v150_v11, %v97_v18  ;;  %v309_v12 = vmul.f32 %v7468_v21, %v289_v49  ;;  %v235_v46 = vld [vmem:[#allocation4 + $0x1d0] sm:$0xff] }
  0x3a   :  { %v7531_v42 = vadd.f32 %v7492_v38, %v435_v24  ;;  %v434_v43 = vadd.f32 %v7501_v52, %v381_v29  ;;  %v362_v37 = vmul.f32 %v7472_v23, %v342_v20  ;;  %v415_v51 = vmul.f32 %v7476_v25, %v395_v22  ;;  %v394_v16 = vld [vmem:[#allocation4 + $0x350] sm:$0xff] }
  0x3b   :  { %v380_v44 = vadd.f32 %v364_v26, %v327_v32  ;;  %v326_v45 = vadd.f32 %v310_v55, %v273_v33  ;;  %v219_v47 = vadd.f32 %v203_v30, %v166_v39  ;;  %v468_v13 = vmul.f32 %v7480_v27, %v448_v50  ;;  %v341_v55 = vld [vmem:[#allocation4 + $0x2d0] sm:$0xff]  ;;  %v128_v33 = vld [vmem:[#allocation4 + $0xc8] sm:$0xff] }
  0x3c   :  { %9971 = vst [vmem:[#allocation10_spill] sm:$0xff] %v7531_v42  ;;  %v7538_v48 = vand.u32 4294901760, %v7531_v42  ;;  %v7541_v53 = vadd.f32 %v7504_v58, %v434_v43  ;;  %v96_v38 = vmul.f32 %v7452_v14, %v76_v40  ;;  %v149_v52 = vmul.f32 %v7456_v15, %v129_v41  ;;  %v447_v20 = vld [vmem:[#allocation4 + $0x3d0] sm:$0xff]  ;;  %v181_v43 = vld [vmem:[#allocation4 + $0x148] sm:$0xff] }
  0x3d   :  { %v433_v57 = vadd.f32 %v417_v28, %v380_v44  ;;  %v379_v59 = vadd.f32 %v363_v56, %v326_v45  ;;  %v272_v60 = vadd.f32 %v256_v36, %v219_v47  ;;  %v202_v26 = vmul.f32 %v7460_v17, %v182_v31  ;;  %v75_v36 = vld [vmem:[#allocation4 + $0x48] sm:$0xff] }
  0x3e   :  { %9972 = vst [vmem:[#allocation11_spill] sm:$0xff] %v7541_v53  ;;  %5883 = vmatpush3.xpose.msra.mxu0 %v7538_v48  ;;  %v7548_v61 = vand.u32 4294901760, %v7541_v53  ;;  %v7552_v58 = vsub.f32 %v7531_v42, %v7538_v48  ;;  %v165_v49 = vadd.f32 %v149_v52, %v96_v38  ;;  %v255_v63 = vmul.f32 %v7464_v19, %v235_v46  ;;  %v234_v45 = vld [vmem:[#allocation4 + $0x1c8] sm:$0xff] }
  0x3f   :  { %5884 = vmatprep.subr.mxu0 %v9819_v1  ;;  %v7557_v28 = vadd.f32 %v7514_v34, %v433_v57  ;;  %v432_v56 = vadd.f32 %v416_v62, %v379_v59  ;;  %v325_v18 = vadd.f32 %v309_v12, %v272_v60  ;;  %v308_v11 = vmul.f32 %v7468_v21, %v288_v54  ;;  %v287_v60 = vld [vmem:[#allocation4 + $0x248] sm:$0xff] }
  0x40   :  { %v7561_v22 = vand.u32 4294901760, %v7552_v58  ;;  %v7565_v24 = vsub.f32 %v7541_v53, %v7548_v61  ;;  %v218_v29 = vadd.f32 %v202_v26, %v165_v49  ;;  %v361_v30 = vmul.f32 %v7472_v23, %v341_v55  ;;  %v67_v42 = vld [vmem:[#allocation4 + $0x8] sm:$0xff] }
  0x41   :  { %9973 = vst [vmem:[#allocation12_spill] sm:$0xff] %v7557_v28  ;;  %v7569_v50 = vand.u32 4294901760, %v7557_v28  ;;  %v7571_v34 = vadd.f32 %v469_v35, %v432_v56  ;;  %v378_v62 = vadd.f32 %v362_v37, %v325_v18  ;;  %v414_v32 = vmul.f32 %v7476_v25, %v394_v16 }
  0x42   :  { %5885 = vmatpush3.xpose.msra.mxu0 %v7548_v61  ;;  %v579_v39 = vsub.f32 %v7552_v58, %v7561_v22  ;;  %v7578_v12 = vand.u32 4294901760, %v7565_v24  ;;  %v271_v40 = vadd.f32 %v255_v63, %v218_v29  ;;  %v467_v41 = vmul.f32 %v7480_v27, %v447_v20  ;;  %v340_v63 = vld [vmem:[#allocation4 + $0x2c8] sm:$0xff] }
  0x43   :  { %9974 = vst [vmem:[#allocation13_spill] sm:$0xff] %v7571_v34  ;;  %5886 = vmatprep.subr.mxu0 %v9819_v1  ;;  %v7583_v35 = vand.u32 4294901760, %v7571_v34  ;;  %v431_v37 = vadd.f32 %v415_v51, %v378_v62  ;;  %v7587_v31 = vsub.f32 %v7557_v28, %v7569_v50  ;;  %v95_v44 = vmul.f32 %v7452_v14, %v75_v36  ;;  %v127_v36 = vld [vmem:[#allocation4 + $0xc0] sm:$0xff] }
  0x44   :  { %v7590_v47 = vand.u32 4294901760, %v579_v39  ;;  %v586_v46 = vsub.f32 %v7565_v24, %v7578_v12  ;;  %v324_v38 = vadd.f32 %v308_v11, %v271_v40  ;;  %v148_v52 = vmul.f32 %v7456_v15, %v128_v33  ;;  %v74_v11 = vld [vmem:[#allocation4 + $0x40] sm:$0xff]  ;;  %v393_v40 = vld [vmem:[#allocation4 + $0x348] sm:$0xff] }
  0x45   :  { %v7595_v54 = vadd.f32 %v468_v13, %v431_v37  ;;  %v7598_v57 = vand.u32 4294901760, %v7587_v31  ;;  %v7602_v51 = vsub.f32 %v7571_v34, %v7583_v35  ;;  %v201_v59 = vmul.f32 %v7460_v17, %v181_v43  ;;  %v180_v62 = vld [vmem:[#allocation4 + $0x140] sm:$0xff] }
  0x46   :  { %9975 = vst [vmem:[#allocation14_spill] sm:$0xff] %v7590_v47  ;;  %5887 = vmatpush3.xpose.msra.mxu0 %v7569_v50  ;;  %5918 = vmatpush3.xpose.msra.mxu1 %v7590_v47  ;;  %v7607_v26 = vand.u32 4294901760, %v586_v46  ;;  %v377_v55 = vadd.f32 %v361_v30, %v324_v38  ;;  %v164_v49 = vadd.f32 %v148_v52, %v95_v44  ;;  %v233_v38 = vld [vmem:[#allocation4 + $0x1c0] sm:$0xff] }
  0x47   :  { %9976 = vst [vmem:[#allocation15_spill] sm:$0xff] %v7595_v54  ;;  %v254_v13 = vmul.f32 %v7464_v19, %v234_v45  ;;  %5888 = vmatprep.subr.mxu0 %v9819_v1  ;;  %5919 = vmatprep.subr.mxu1 %v9819_v1  ;;  %v7613_v16 = vand.u32 4294901760, %v7595_v54  ;;  %v593_v56 = vsub.f32 %v7587_v31, %v7598_v57  ;;  %v7618_v18 = vand.u32 4294901760, %v7602_v51  ;;  %v446_v45 = vld [vmem:[#allocation4 + $0x3c8] sm:$0xff]  ;;  %v286_v52 = vld [vmem:[#allocation4 + $0x240] sm:$0xff] }
  0x48   :  { %9977 = vst [vmem:[#allocation16_spill] sm:$0xff] %v7607_v26  ;;  %v430_v20 = vadd.f32 %v414_v32, %v377_v55  ;;  %v217_v29 = vadd.f32 %v201_v59, %v164_v49  ;;  %v307_v30 = vmul.f32 %v7468_v21, %v287_v60  ;;  %v360_v39 = vmul.f32 %v7472_v23, %v340_v63  ;;  %v73_v63 = vld [vmem:[#allocation4 + $0x38] sm:$0xff] }
  0x49   :  { %v600_v33 = vsub.f32 %v7602_v51, %v7618_v18  ;;  %v7626_v43 = vsub.f32 %v7595_v54, %v7613_v16  ;;  %v7630_v32 = vand.u32 4294901760, %v593_v56  ;;  %v94_v46 = vmul.f32 %v7452_v14, %v74_v11  ;;  %v126_v56 = vld [vmem:[#allocation4 + $0xb8] sm:$0xff] }
  0x4a   :  { %5889 = vmatpush3.xpose.msra.mxu0 %v7583_v35  ;;  %5920 = vmatpush3.xpose.msra.mxu1 %v7607_v26  ;;  %v7632_v37 = vadd.f32 %v467_v41, %v430_v20  ;;  %v270_v44 = vadd.f32 %v254_v13, %v217_v29  ;;  %v147_v60 = vmul.f32 %v7456_v15, %v127_v36  ;;  %v228_v54 = vld [vmem:[#allocation4 + $0x198] sm:$0xff] }
  0x4b   :  { %9978 = vst [vmem:[#allocation17_spill] sm:$0xff] %v7630_v32  ;;  %5890 = vmatprep.subr.mxu0 %v9819_v1  ;;  %5921 = vmatprep.subr.mxu1 %v9819_v1  ;;  %v7638_v59 = vand.u32 4294901760, %v7626_v43  ;;  %v200_v55 = vmul.f32 %v7460_v17, %v180_v62  ;;  %v413_v13 = vmul.f32 %v7476_v25, %v393_v40  ;;  %v7651_v36 = vand.u32 4294901760, %v600_v33  ;;  %v392_v40 = vld [vmem:[#allocation4 + $0x340] sm:$0xff] }
  0x4c   :  { %9979 = vst [vmem:[#allocation18_spill] sm:$0xff] %v7632_v37  ;;  %v7643_v41 = vand.u32 4294901760, %v7632_v37  ;;  %v323_v49 = vadd.f32 %v307_v30, %v270_v44  ;;  %v466_v11 = vmul.f32 %v7480_v27, %v446_v45  ;;  %v163_v20 = vadd.f32 %v147_v60, %v94_v46  ;;  %v232_v45 = vld [vmem:[#allocation4 + $0x1b8] sm:$0xff] }
  0x4d   :  { %v253_v29 = vmul.f32 %v7464_v19, %v233_v38  ;;  %v306_v10 = vmul.f32 %v7468_v21, %v286_v52  ;;  %9980 = vst [vmem:[#allocation19_spill] sm:$0xff] %v7651_v36  ;;  %v607_v62 = vsub.f32 %v7626_v43, %v7638_v59  ;;  %v445_v38 = vld [vmem:[#allocation4 + $0x3c0] sm:$0xff]  ;;  %v93_v52 = vmul.f32 %v7452_v14, %v73_v63  ;;  %v125_v63 = vld [vmem:[#allocation4 + $0xb0] sm:$0xff] }
  0x4e   :  { %5891 = vmatpush3.xpose.msra.mxu0 %v7613_v16  ;;  %5922 = vmatpush3.xpose.msra.mxu1 %v7630_v32  ;;  %v376_v30 = vadd.f32 %v360_v39, %v323_v49  ;;  %v7657_v44 = vsub.f32 %v7632_v37, %v7643_v41  ;;  %v216_v46 = vadd.f32 %v200_v55, %v163_v20  ;;  %v338_v20 = vld [vmem:[#allocation4 + $0x2b8] sm:$0xff] }
  0x4f   :  { %5892 = vmatprep.subr.mxu0 %v9819_v1  ;;  %5923 = vmatprep.subr.mxu1 %v9819_v1  ;;  %v146_v33 = vmul.f32 %v7456_v15, %v126_v56  ;;  %v359_v60 = vmul.f32 %v7472_v23, %v339_v9  ;;  %v199_v7 = vmul.f32 %v7460_v17, %v179_v8 }
  0x50   :  { %v429_v39 = vadd.f32 %v413_v13, %v376_v30  ;;  %v7665_v49 = vand.u32 4294901760, %v7657_v44  ;;  %v269_v5 = vadd.f32 %v253_v29, %v216_v46  ;;  %v412_v4 = vmul.f32 %v7476_v25, %v392_v40  ;;  %v391_v29 = vld [vmem:[#allocation4 + $0x338] sm:$0xff]  ;;  %v178_v30 = vld [vmem:[#allocation4 + $0x130] sm:$0xff] }
  0x51   :  { %v162_v3 = vadd.f32 %v146_v33, %v93_v52  ;;  %v252_v55 = vmul.f32 %v7464_v19, %v232_v45  ;;  %v7674_v13 = vand.u32 4294901760, %v607_v62  ;;  %v465_v8 = vmul.f32 %v7480_v27, %v445_v38  ;;  %v231_v52 = vld [vmem:[#allocation4 + $0x1b0] sm:$0xff]  ;;  %v444_v38 = vld [vmem:[#allocation4 + $0x3b8] sm:$0xff] }
  0x52   :  { %9981 = vst [vmem:[#allocation20_spill] sm:$0xff] %v7665_v49  ;;  %5893 = vmatpush3.xpose.msra.mxu0 %v7643_v41  ;;  %5924 = vmatpush3.xpose.msra.mxu1 %v7651_v36  ;;  %v7672_v9 = vadd.f32 %v466_v11, %v429_v39  ;;  %v614_v56 = vsub.f32 %v7657_v44, %v7665_v49 }
  0x53   :  { %9983 = vst [vmem:[#allocation22_spill] sm:$0xff] %v7674_v13  ;;  %5894 = vmatprep.subr.mxu0 %v9819_v1  ;;  %5925 = vmatprep.subr.mxu1 %v9819_v1  ;;  %v322_v40 = vadd.f32 %v306_v10, %v269_v5  ;;  %v215_v45 = vadd.f32 %v199_v7, %v162_v3  ;;  %v284_v3 = vld [vmem:[#allocation4 + $0x230] sm:$0xff] }
  0x54   :  { %9982 = vst [vmem:[#allocation21_spill] sm:$0xff] %v7672_v9  ;;  %v305_v46 = vmul.f32 %v7468_v21, %v285_v6  ;;  %v7683_v11 = vand.u32 4294901760, %v7672_v9  ;;  %v358_v62 = vmul.f32 %v7472_v23, %v338_v20  ;;  %v92_v33 = vmul.f32 %v7452_v14, %v72_v0  ;;  %v337_v7 = vld [vmem:[#allocation4 + $0x2b0] sm:$0xff]  ;;  %v124_v20 = vld [vmem:[#allocation4 + $0xa8] sm:$0xff] }
  0x55   :  { %v145_v39 = vmul.f32 %v7456_v15, %v125_v63  ;;  %v375_v36 = vadd.f32 %v359_v60, %v322_v40  ;;  %v268_v32 = vadd.f32 %v252_v55, %v215_v45  ;;  %v411_v26 = vmul.f32 %v7476_v25, %v391_v29  ;;  %v71_v55 = vld [vmem:[#allocation4 + $0x28] sm:$0xff]  ;;  %v390_v40 = vld [vmem:[#allocation4 + $0x330] sm:$0xff] }
  0x56   :  { %v198_v5 = vmul.f32 %v7460_v17, %v178_v30  ;;  %5895 = vmatpush3.xpose.msra.mxu0 %v7683_v11  ;;  %5926 = vmatpush3.xpose.msra.mxu1 %v7674_v13  ;;  %v7692_v6 = vand.u32 4294901760, %v614_v56  ;;  %v7696_v10 = vsub.f32 %v7672_v9, %v7683_v11  ;;  %v251_v60 = vmul.f32 %v7464_v19, %v231_v52  ;;  %v177_v56 = vld [vmem:[#allocation4 + $0x128] sm:$0xff]  ;;  %v443_v9 = vld [vmem:[#allocation4 + $0x3b0] sm:$0xff] }
  0x57   :  { %v161_v0 = vadd.f32 %v145_v39, %v92_v33  ;;  %5896 = vmatprep.subr.mxu0 %v9819_v1  ;;  %5927 = vmatprep.subr.mxu1 %v9819_v1  ;;  %v428_v63 = vadd.f32 %v412_v4, %v375_v36  ;;  %v321_v29 = vadd.f32 %v305_v46, %v268_v32  ;;  %v230_v39 = vld [vmem:[#allocation4 + $0x1a8] sm:$0xff] }
  0x58   :  { %9984 = vst [vmem:[#allocation23_spill] sm:$0xff] %v7692_v6  ;;  %v464_v30 = vmul.f32 %v7480_v27, %v444_v38  ;;  %v7703_v45 = vand.u32 4294901760, %v7696_v10  ;;  %v304_v33 = vmul.f32 %v7468_v21, %v284_v3  ;;  %v357_v52 = vmul.f32 %v7472_v23, %v337_v7  ;;  %v283_v36 = vld [vmem:[#allocation4 + $0x228] sm:$0xff] }
  0x59   :  { %v214_v13 = vadd.f32 %v198_v5, %v161_v0  ;;  %v7707_v47 = vadd.f32 %v465_v8, %v428_v63  ;;  %v374_v2 = vadd.f32 %v358_v62, %v321_v29  ;;  %v91_v4 = vmul.f32 %v7452_v14, %v71_v55  ;;  %v336_v7 = vld [vmem:[#allocation4 + $0x2a8] sm:$0xff]  ;;  %v123_v63 = vld [vmem:[#allocation4 + $0xa0] sm:$0xff] }
  0x5a   :  { %9985 = vst [vmem:[#allocation24_spill] sm:$0xff] %v7703_v45  ;;  %v144_v32 = vmul.f32 %v7456_v15, %v124_v20  ;;  %5928 = vmatpush3.xpose.msra.mxu1 %v7692_v6  ;;  %v621_v46 = vsub.f32 %v7696_v10, %v7703_v45  ;;  %v410_v5 = vmul.f32 %v7476_v25, %v390_v40  ;;  %v70_v20 = vld [vmem:[#allocation4 + $0x20] sm:$0xff] }
  0x5b   :  { %9986 = vst [vmem:[#allocation25_spill] sm:$0xff] %v7707_v47  ;;  %v267_v38 = vadd.f32 %v251_v60, %v214_v13  ;;  %v197_v3 = vmul.f32 %v7460_v17, %v177_v56  ;;  %v7717_v8 = vand.u32 4294901760, %v7707_v47  ;;  %5929 = vmatprep.subr.mxu1 %v9819_v1  ;;  %v427_v62 = vadd.f32 %v411_v26, %v374_v2  ;;  %v176_v40 = vld [vmem:[#allocation4 + $0x120] sm:$0xff] }
  0x5c   :  { %v160_v0 = vadd.f32 %v144_v32, %v91_v4  ;;  %v250_v55 = vmul.f32 %v7464_v19, %v230_v39  ;;  %v7721_v29 = vand.u32 4294901760, %v621_v46  ;;  %v463_v13 = vmul.f32 %v7480_v27, %v443_v9  ;;  %v389_v4 = vld [vmem:[#allocation4 + $0x328] sm:$0xff]  ;;  %v229_v32 = vld [vmem:[#allocation4 + $0x1a0] sm:$0xff] }
  0x5d   :  { %v320_v6 = vadd.f32 %v304_v33, %v267_v38  ;;  %v303_v60 = vmul.f32 %v7468_v21, %v283_v36  ;;  %5897 = vmatpush3.xpose.msra.mxu0 %v7717_v8  ;;  %v7726_v56 = vadd.f32 %v464_v30, %v427_v62  ;;  %v7730_v2 = vsub.f32 %v7707_v47, %v7717_v8  ;;  %v442_v33 = vld [vmem:[#allocation4 + $0x3a8] sm:$0xff]  ;;  %v282_v62 = vld [vmem:[#allocation4 + $0x220] sm:$0xff] }
  0x5e   :  { %9987 = vst [vmem:[#allocation26_spill] sm:$0xff] %v7721_v29  ;;  %v213_v26 = vadd.f32 %v197_v3, %v160_v0  ;;  %v356_v39 = vmul.f32 %v7472_v23, %v336_v7  ;;  %5898 = vmatprep.subr.mxu0 %v9819_v1  ;;  %5930 = vmatpush3.xpose.msra.mxu1 %v7721_v29  ;;  %v335_v0 = vld [vmem:[#allocation4 + $0x2a0] sm:$0xff] }
  0x5f   :  { %9988 = vst [vmem:[#allocation27_spill] sm:$0xff] %v7726_v56  ;;  %v373_v9 = vadd.f32 %v357_v52, %v320_v6  ;;  %v90_v36 = vmul.f32 %v7452_v14, %v70_v20  ;;  %v143_v30 = vmul.f32 %v7456_v15, %v123_v63  ;;  %v7738_v46 = vand.u32 4294901760, %v7726_v56  ;;  %5931 = vmatprep.subr.mxu1 %v9819_v1  ;;  %v69_v63 = vld [vmem:[#allocation4 + $0x18] sm:$0xff]  ;;  %v172_v45 = vld [vmem:[#allocation4 + $0x100] sm:$0xff] }
  0x60   :  { %v7742_v38 = vand.u32 4294901760, %v7730_v2  ;;  %v266_v3 = vadd.f32 %v250_v55, %v213_v26  ;;  %v196_v7 = vmul.f32 %v7460_v17, %v176_v40  ;;  %v409_v6 = vmul.f32 %v7476_v25, %v389_v4  ;;  %v122_v40 = vld [vmem:[#allocation4 + $0x98] sm:$0xff] }
  0x61   :  { %v426_v29 = vadd.f32 %v410_v5, %v373_v9  ;;  %v159_v52 = vadd.f32 %v143_v30, %v90_v36  ;;  %v249_v20 = vmul.f32 %v7464_v19, %v229_v32  ;;  %5899 = vmatpush3.xpose.msra.mxu0 %v7738_v46  ;;  %v462_v37 = vmul.f32 %v7480_v27, %v442_v33  ;;  %v175_v5 = vld [vmem:[#allocation4 + $0x118] sm:$0xff]  ;;  %v388_v30 = vld [vmem:[#allocation4 + $0x320] sm:$0xff] }
  0x62   :  { %9989 = vst [vmem:[#allocation28_spill] sm:$0xff] %v7742_v38  ;;  %v628_v1 = vsub.f32 %v7730_v2, %v7742_v38  ;;  %v319_v47 = vadd.f32 %v303_v60, %v266_v3  ;;  %v7753_v55 = vsub.f32 %v7726_v56, %v7738_v46  ;;  %v9990_v26 = vmov 0.0  }
  0x63   :  { %5900 = vmatprep.subr.mxu0 %v9990_v26  ;;  %v7756_v4 = vadd.f32 %v463_v13, %v426_v29  ;;  %v212_v32 = vadd.f32 %v196_v7, %v159_v52  ;;  %v302_v9 = vmul.f32 %v7468_v21, %v282_v62  ;;  %v355_v36 = vmul.f32 %v7472_v23, %v335_v0  ;;  %v441_v13 = vld [vmem:[#allocation4 + $0x3a0] sm:$0xff]  ;;  %v281_v52 = vld [vmem:[#allocation4 + $0x218] sm:$0xff] }
  0x64   :  { %v7760_v60 = vand.u32 4294901760, %v628_v1  ;;  %v372_v33 = vadd.f32 %v356_v39, %v319_v47  ;;  %v7763_v3 = vand.u32 4294901760, %v7753_v55  ;;  %v89_v56 = vmul.f32 %v7452_v14, %v69_v63 }
  0x65   :  { %9991 = vst [vmem:[#allocation29_spill] sm:$0xff] %v7756_v4  ;;  %v7767_v34 = vand.u32 4294901760, %v7756_v4  ;;  %v265_v29 = vadd.f32 %v249_v20, %v212_v32  ;;  %v142_v7 = vmul.f32 %v7456_v15, %v122_v40  ;;  %v195_v62 = vmul.f32 %v7460_v17, %v175_v5  ;;  %v68_v5 = vld [vmem:[#allocation4 + $0x10] sm:$0xff] }
  0x66   :  { %9992 = vst [vmem:[#allocation30_spill] sm:$0xff] %v7760_v60  ;;  %9993 = vst [vmem:[#allocation31_spill] sm:$0xff] %v7763_v3  ;;  %5932 = vmatpush3.xpose.msra.mxu1 %v7760_v60  ;;  %v425_v0 = vadd.f32 %v409_v6, %v372_v33  ;;  %v635_v1 = vsub.f32 %v7753_v55, %v7763_v3  ;;  %v408_v47 = vmul.f32 %v7476_v25, %v388_v30  ;;  %v121_v6 = vld [vmem:[#allocation4 + $0x90] sm:$0xff]  ;;  %v334_v60 = vld [vmem:[#allocation4 + $0x298] sm:$0xff] }
  0x67   :  { %v248_v39 = vmul.f32 %v7464_v19, %v228_v54  ;;  %5901 = vmatpush3.xpose.msra.mxu0 %v7767_v34  ;;  %5933 = vmatprep.subr.mxu1 %v9990_v26  ;;  %v318_v20 = vadd.f32 %v302_v9, %v265_v29  ;;  %v7780_v63 = vsub.f32 %v7756_v4, %v7767_v34  ;;  %v174_v32 = vld [vmem:[#allocation4 + $0x110] sm:$0xff] }
  0x68   :  { %v158_v40 = vadd.f32 %v142_v7, %v89_v56  ;;  %5902 = vmatprep.subr.mxu0 %v9990_v26  ;;  %v7783_v33 = vadd.f32 %v462_v37, %v425_v0  ;;  %v7785_v30 = vand.u32 4294901760, %v635_v1  ;;  %v461_v54 = vmul.f32 %v7480_v27, %v441_v13  ;;  %v387_v56 = vld [vmem:[#allocation4 + $0x318] sm:$0xff]  ;;  %v227_v7 = vld [vmem:[#allocation4 + $0x190] sm:$0xff] }
  0x69   :  { %v371_v28 = vadd.f32 %v355_v36, %v318_v20  ;;  %v7789_v9 = vand.u32 4294901760, %v7780_v63  ;;  %v301_v4 = vmul.f32 %v7468_v21, %v281_v52  ;;  %v440_v37 = vld [vmem:[#allocation4 + $0x398] sm:$0xff]  ;;  %v88_v0 = vmul.f32 %v7452_v14, %v68_v5  ;;  %v333_v3 = vld [vmem:[#allocation4 + $0x290] sm:$0xff] }
  0x6a   :  { %9994 = vst [vmem:[#allocation32_spill] sm:$0xff] %v7783_v33  ;;  %9995 = vst [vmem:[#allocation33_spill] sm:$0xff] %v7785_v30  ;;  %v211_v29 = vadd.f32 %v195_v62, %v158_v40  ;;  %v7793_v53 = vand.u32 4294901760, %v7783_v33  ;;  %5934 = vmatpush3.xpose.msra.mxu1 %v7785_v30  ;;  %v141_v13 = vmul.f32 %v7456_v15, %v121_v6  ;;  %v280_v40 = vld [vmem:[#allocation4 + $0x210] sm:$0xff] }
  0x6b   :  { %9996 = vst [vmem:[#allocation34_spill] sm:$0xff] %v7789_v9  ;;  %v194_v36 = vmul.f32 %v7460_v17, %v174_v32  ;;  %5935 = vmatprep.subr.mxu1 %v9990_v26  ;;  %v424_v1 = vadd.f32 %v408_v47, %v371_v28  ;;  %v642_v62 = vsub.f32 %v7780_v63, %v7789_v9  ;;  %v120_v28 = vld [vmem:[#allocation4 + $0x88] sm:$0xff] }
  0x6c   :  { %v264_v52 = vadd.f32 %v248_v39, %v211_v29  ;;  %v354_v20 = vmul.f32 %v7472_v23, %v334_v60  ;;  %5903 = vmatpush3.xpose.msra.mxu0 %v7793_v53  ;;  %v407_v30 = vmul.f32 %v7476_v25, %v387_v56  ;;  %v7807_v5 = vsub.f32 %v7783_v33, %v7793_v53  ;;  %v173_v47 = vld [vmem:[#allocation4 + $0x108] sm:$0xff] }
  0x6d   :  { %v157_v6 = vadd.f32 %v141_v13, %v88_v0  ;;  %v247_v32 = vmul.f32 %v7464_v19, %v227_v7  ;;  %5904 = vmatprep.subr.mxu0 %v9990_v26  ;;  %v7811_v39 = vadd.f32 %v461_v54, %v424_v1  ;;  %v7813_v60 = vand.u32 4294901760, %v642_v62  ;;  %v226_v13 = vld [vmem:[#allocation4 + $0x188] sm:$0xff]  ;;  %v386_v1 = vld [vmem:[#allocation4 + $0x310] sm:$0xff] }
  0x6e   :  { %v317_v29 = vadd.f32 %v301_v4, %v264_v52  ;;  %v460_v9 = vmul.f32 %v7480_v27, %v440_v37  ;;  %v7817_v56 = vand.u32 4294901760, %v7807_v5  ;;  %v300_v0 = vmul.f32 %v7468_v21, %v280_v40  ;;  %v279_v62 = vld [vmem:[#allocation4 + $0x208] sm:$0xff]  ;;  %v66_v40 = vld [vmem:[#allocation4] sm:$0xff] }
  0x6f   :  { %9997 = vst [vmem:[#allocation35_spill] sm:$0xff] %v7811_v39  ;;  %9998 = vst [vmem:[#allocation36_spill] sm:$0xff] %v7813_v60  ;;  %v210_v33 = vadd.f32 %v194_v36, %v157_v6  ;;  %v87_v7 = vmul.f32 %v7452_v14, %v67_v42  ;;  %v7822_v38 = vand.u32 4294901760, %v7811_v39  ;;  %5936 = vmatpush3.xpose.msra.mxu1 %v7813_v60  ;;  %v439_v60 = vld [vmem:[#allocation4 + $0x390] sm:$0xff] }
  0x70   :  { %9999 = vst [vmem:[#allocation37_spill] sm:$0xff] %v7817_v56  ;;  %v370_v54 = vadd.f32 %v354_v20, %v317_v29  ;;  %v140_v4 = vmul.f32 %v7456_v15, %v120_v28  ;;  %v193_v37 = vmul.f32 %v7460_v17, %v173_v47  ;;  %5937 = vmatprep.subr.mxu1 %v9990_v26  ;;  %v119_v29 = vld [vmem:[#allocation4 + $0x80] sm:$0xff] }
  0x71   :  { %v649_v36 = vsub.f32 %v7807_v5, %v7817_v56  ;;  %v263_v52 = vadd.f32 %v247_v32, %v210_v33  ;;  %v353_v42 = vmul.f32 %v7472_v23, %v333_v3  ;;  %5905 = vmatpush3.xpose.msra.mxu0 %v7822_v38  ;;  %v7834_v20 = vsub.f32 %v7811_v39, %v7822_v38 }
  0x72   :  { %v423_v6 = vadd.f32 %v407_v30, %v370_v54  ;;  %v156_v28 = vadd.f32 %v140_v4, %v87_v7  ;;  %v246_v47 = vmul.f32 %v7464_v19, %v226_v13  ;;  %5906 = vmatprep.subr.mxu0 %v9990_v26  ;;  %v406_v3 = vmul.f32 %v7476_v25, %v386_v1  ;;  %v332_v30 = vld [vmem:[#allocation4 + $0x288] sm:$0xff]  ;;  %v225_v4 = vld [vmem:[#allocation4 + $0x180] sm:$0xff] }
  0x73   :  { %v7838_v56 = vand.u32 4294901760, %v649_v36  ;;  %v316_v33 = vadd.f32 %v300_v0, %v263_v52  ;;  %v299_v32 = vmul.f32 %v7468_v21, %v279_v62  ;;  %v7845_v39 = vand.u32 4294901760, %v7834_v20  ;;  %v385_v0 = vld [vmem:[#allocation4 + $0x308] sm:$0xff] }
  0x74   :  { %v7842_v54 = vadd.f32 %v460_v9, %v423_v6  ;;  %v209_v7 = vadd.f32 %v193_v37, %v156_v28  ;;  %v86_v13 = vmul.f32 %v7452_v14, %v66_v40  ;;  %v459_v36 = vmul.f32 %v7480_v27, %v439_v60  ;;  %v278_v40 = vld [vmem:[#allocation4 + $0x200] sm:$0xff]  ;;  %v438_v6 = vld [vmem:[#allocation4 + $0x388] sm:$0xff] }
  0x75   :  { %10000 = vst [vmem:[#allocation38_spill] sm:$0xff] %v7838_v56  ;;  %10002 = vst [vmem:[#allocation40_spill] sm:$0xff] %v7845_v39  ;;  %5938 = vmatpush3.xpose.msra.mxu1 %v7838_v56  ;;  %v369_v49 = vadd.f32 %v353_v42, %v316_v33  ;;  %v139_v1 = vmul.f32 %v7456_v15, %v119_v29  ;;  %v192_v62 = vmul.f32 %v7460_v17, %v172_v45 }
  0x76   :  { %10001 = vst [vmem:[#allocation39_spill] sm:$0xff] %v7842_v54  ;;  %v7853_v9 = vand.u32 4294901760, %v7842_v54  ;;  %5939 = vmatprep.subr.mxu1 %v9990_v26  ;;  %v656_v37 = vsub.f32 %v7834_v20, %v7845_v39  ;;  %v262_v14 = vadd.f32 %v246_v47, %v209_v7  ;;  %v352_v52 = vmul.f32 %v7472_v23, %v332_v30  ;;  %v331_v47 = vld [vmem:[#allocation4 + $0x280] sm:$0xff] }
  0x77   :  { %v422_v42 = vadd.f32 %v406_v3, %v369_v49  ;;  %v155_v60 = vadd.f32 %v139_v1, %v86_v13  ;;  %v245_v28 = vmul.f32 %v7464_v19, %v225_v4  ;;  %v405_v45 = vmul.f32 %v7476_v25, %v385_v0  ;;  %v384_v7 = vld [vmem:[#allocation4 + $0x300] sm:$0xff] }
  0x78   :  { %5907 = vmatpush3.xpose.msra.mxu0 %v7853_v9  ;;  %v7861_v15 = vand.u32 4294901760, %v656_v37  ;;  %v315_v17 = vadd.f32 %v299_v32, %v262_v14  ;;  %v7866_v29 = vsub.f32 %v7842_v54, %v7853_v9  ;;  %v298_v3 = vmul.f32 %v7468_v21, %v278_v40  ;;  %v437_v1 = vld [vmem:[#allocation4 + $0x380] sm:$0xff] }
  0x79   :  { %5908 = vmatprep.subr.mxu0 %v9990_v26  ;;  %v7869_v33 = vadd.f32 %v459_v36, %v422_v42  ;;  %v208_v49 = vadd.f32 %v192_v62, %v155_v60  ;;  %v458_v30 = vmul.f32 %v7480_v27, %v438_v6  ;;  %v351_v36 = vmul.f32 %v7472_v23, %v331_v47 }
  0x7a   :  { %10003 = vst [vmem:[#allocation41_spill] sm:$0xff] %v7861_v15  ;;  %5940 = vmatpush3.xpose.msra.mxu1 %v7861_v15  ;;  %v368_v19 = vadd.f32 %v352_v52, %v315_v17  ;;  %v7875_v32 = vand.u32 4294901760, %v7866_v29  ;;  %v404_v37 = vmul.f32 %v7476_v25, %v384_v7  ;;  %v457_v42 = vmul.f32 %v7480_v27, %v437_v1  ;;  %v10016_v1 = vld [vmem:[#allocation24_spill] sm:$0xff] }
  0x7b   :  { %10004 = vst [vmem:[#allocation42_spill] sm:$0xff] %v7869_v33  ;;  %v7878_v13 = vand.u32 4294901760, %v7869_v33  ;;  %5941 = vmatprep.subr.mxu1 %v9990_v26  ;;  %v261_v4 = vadd.f32 %v245_v28, %v208_v49 }
  0x7c   :  { %10005 = vst [vmem:[#allocation43_spill] sm:$0xff] %v7875_v32  ;;  %v421_v0 = vadd.f32 %v405_v45, %v368_v19  ;;  %v663_v21 = vsub.f32 %v7866_v29, %v7875_v32 }
  0x7d   :  { %5909 = vmatpush3.xpose.msra.mxu0 %v7878_v13  ;;  %v314_v62 = vadd.f32 %v298_v3, %v261_v4  ;;  %v7888_v14 = vsub.f32 %v7869_v33, %v7878_v13 }
  0x7e   :  { %5910 = vmatprep.subr.mxu0 %v9990_v26  ;;  %v7891_v52 = vadd.f32 %v458_v30, %v421_v0  ;;  %v7893_v40 = vand.u32 4294901760, %v663_v21  ;;  %v9861_v0 = vmov 0.125   ;;  %v10015_v21 = vld [vmem:[#allocation20_spill] sm:$0xff] }
  0x7f   :  { %v367_v23 = vadd.f32 %v351_v36, %v314_v62  ;;  %v7897_v6 = vand.u32 4294901760, %v7888_v14  ;;  %v10017_v62 = vld [vmem:[#allocation28_spill] sm:$0xff] }
  0x80   :  { %10006 = vst [vmem:[#allocation44_spill] sm:$0xff] %v7891_v52  ;;  %10007 = vst [vmem:[#allocation45_spill] sm:$0xff] %v7893_v40  ;;  %v7900_v60 = vand.u32 4294901760, %v7891_v52  ;;  %5942 = vmatpush3.xpose.msra.mxu1 %v7893_v40 }
  0x81   :  { %10008 = vst [vmem:[#allocation46_spill] sm:$0xff] %v7897_v6  ;;  %5943 = vmatprep.subr.mxu1 %v9990_v26  ;;  %v420_v25 = vadd.f32 %v404_v37, %v367_v23  ;;  %v670_v28 = vsub.f32 %v7888_v14, %v7897_v6  ;;  %v10018_v37 = vld [vmem:[#allocation31_spill] sm:$0xff]  ;;  %v10019_v23 = vld [vmem:[#allocation34_spill] sm:$0xff] }
  0x82   :  { %5911 = vmatpush3.xpose.msra.mxu0 %v7900_v60  ;;  %v7909_v17 = vsub.f32 %v7891_v52, %v7900_v60 }
  0x83   :  { %5912 = vmatprep.subr.mxu0 %v9990_v26  ;;  %v7912_v27 = vadd.f32 %v457_v42, %v420_v25  ;;  %v7914_v45 = vand.u32 4294901760, %v670_v28  ;;  %v10020_v42 = vld [vmem:[#allocation37_spill] sm:$0xff]  ;;  %v10021_v25 = vld [vmem:[#allocation10_spill] sm:$0xff]  ;;  %v10022_v28 = vld [vmem:[#allocation11_spill] sm:$0xff] }
  0x84   :  { %v7917_v47 = vand.u32 4294901760, %v7909_v17 }
  0x85   :  { %10009 = vst [vmem:[#allocation47_spill] sm:$0xff] %v7912_v27  ;;  %10010 = vst [vmem:[#allocation48_spill] sm:$0xff] %v7914_v45  ;;  %v7920_v49 = vand.u32 4294901760, %v7912_v27  ;;  %5944 = vmatpush3.xpose.msra.mxu1 %v7914_v45 }
  0x86   :  { %10011 = vst [vmem:[#allocation49_spill] sm:$0xff] %v7917_v47  ;;  %5945 = vmatprep.subr.mxu1 %v9990_v26  ;;  %v677_v3 = vsub.f32 %v7909_v17, %v7917_v47 }
  0x87   :  { %5913 = vmatpush3.xpose.msra.mxu0 %v7920_v49  ;;  %v7929_v19 = vsub.f32 %v7912_v27, %v7920_v49 }
  0x88   :  { %5952 = vmatprep.subr.mxu0 %v9990_v26  ;;  %v7932_v30 = vand.u32 4294901760, %v677_v3  ;;  %v10023_v3 = vld [vmem:[#allocation12_spill] sm:$0xff] }
  0x89   :  { %v7935_v7 = vand.u32 4294901760, %v7929_v19 }
  0x8a   :  { %10012 = vst [vmem:[#allocation50_spill] sm:$0xff] %v7932_v30  ;;  %5915 = vmatmul.mubr.f32.vlgmr.msra.gmra.mxu0 %v9990_v26  ;;  %5946 = vmatpush3.xpose.msra.mxu1 %v7932_v30 }
  0x8b   :  { %10013 = vst [vmem:[#allocation51_spill] sm:$0xff] %v7935_v7  ;;  %5953 = vmatpush3.xpose.msra.mxu0 %v7552_v58  ;;  %5947 = vmatprep.subr.mxu1 %v9990_v26  ;;  %v684_v4 = vsub.f32 %v7929_v19, %v7935_v7 }
  0x8c   :  { %5954 = vmatprep.subr.mxu0 %v9990_v26  ;;  %5984 = vmatprep.mubr.msk.f32.mxu0 %vm7402_vm0, %v9990_v26 }
  0x8d   :  { %v7946_v36 = vand.u32 4294901760, %v684_v4  ;;  %v10024_v4 = vld [vmem:[#allocation13_spill] sm:$0xff] }
  0x8f   :  { %10014 = vst [vmem:[#allocation52_spill] sm:$0xff] %v7946_v36  ;;  %5948 = vmatpush3.xpose.msra.mxu1 %v7946_v36  ;;  %5955 = vmatpush3.xpose.msra.mxu0 %v7565_v24 }
  0x90   :  { %5956 = vmatprep.subr.mxu0 %v9990_v26  ;;  %5987 = vmatprep.subr.mxu1 %v9990_v26 }
  0x92   :  { %5950 = vmatmul.mubr.f32.vlgmr.msra.gmra.mxu1 %v9861_v0 }
  0x93   :  { %5957 = vmatpush3.xpose.msra.mxu0 %v7587_v31  ;;  %5988 = vmatpush3.xpose.msra.mxu1 %v7538_v48 }
  0x94   :  { %5958 = vmatprep.subr.mxu0 %v9990_v26  ;;  %5989 = vmatprep.subr.mxu1 %v9990_v26 }
  0x95   :  { %6019 = vmatprep.mubr.msk.f32.mxu1 %vm7402_vm0, %v9990_v26 }
  0x97   :  { %5959 = vmatpush3.xpose.msra.mxu0 %v7602_v51  ;;  %5990 = vmatpush3.xpose.msra.mxu1 %v7548_v61 }
  0x98   :  { %5960 = vmatprep.subr.mxu0 %v9990_v26  ;;  %5991 = vmatprep.subr.mxu1 %v9990_v26 }
  0x9b   :  { %5961 = vmatpush3.xpose.msra.mxu0 %v7626_v43  ;;  %5992 = vmatpush3.xpose.msra.mxu1 %v7569_v50 }
  0x9c   :  { %5962 = vmatprep.subr.mxu0 %v9990_v26  ;;  %5993 = vmatprep.subr.mxu1 %v9990_v26 }
  0x9f   :  { %5963 = vmatpush3.xpose.msra.mxu0 %v7657_v44  ;;  %5994 = vmatpush3.xpose.msra.mxu1 %v7583_v35 }
  0xa0   :  { %5964 = vmatprep.subr.mxu0 %v9990_v26  ;;  %5995 = vmatprep.subr.mxu1 %v9990_v26 }
  0xa3   :  { %5965 = vmatpush3.xpose.msra.mxu0 %v7696_v10  ;;  %5996 = vmatpush3.xpose.msra.mxu1 %v7613_v16 }
  0xa4   :  { %5966 = vmatprep.subr.mxu0 %v9990_v26  ;;  %5997 = vmatprep.subr.mxu1 %v9990_v26 }
  0xa7   :  { %5967 = vmatpush3.xpose.msra.mxu0 %v7730_v2  ;;  %5998 = vmatpush3.xpose.msra.mxu1 %v7643_v41 }
  0xa8   :  { %5968 = vmatprep.subr.mxu0 %v9990_v26  ;;  %5999 = vmatprep.subr.mxu1 %v9990_v26 }
  0xab   :  { %5969 = vmatpush3.xpose.msra.mxu0 %v7753_v55  ;;  %6000 = vmatpush3.xpose.msra.mxu1 %v7683_v11 }
  0xac   :  { %5970 = vmatprep.subr.mxu0 %v9990_v26  ;;  %6001 = vmatprep.subr.mxu1 %v9990_v26 }
  0xaf   :  { %5971 = vmatpush3.xpose.msra.mxu0 %v7780_v63  ;;  %6002 = vmatpush3.xpose.msra.mxu1 %v7717_v8 }
  0xb0   :  { %5972 = vmatprep.subr.mxu0 %v9990_v26  ;;  %6003 = vmatprep.subr.mxu1 %v9990_v26 }
  0xb3   :  { %5973 = vmatpush3.xpose.msra.mxu0 %v7807_v5  ;;  %6004 = vmatpush3.xpose.msra.mxu1 %v7738_v46 }
  0xb4   :  { %5974 = vmatprep.subr.mxu0 %v9990_v26  ;;  %6005 = vmatprep.subr.mxu1 %v9990_v26 }
  0xb7   :  { %5975 = vmatpush3.xpose.msra.mxu0 %v7834_v20  ;;  %6006 = vmatpush3.xpose.msra.mxu1 %v7767_v34 }
  0xb8   :  { %5976 = vmatprep.subr.mxu0 %v9990_v26  ;;  %6007 = vmatprep.subr.mxu1 %v9990_v26 }
  0xbb   :  { %5977 = vmatpush3.xpose.msra.mxu0 %v7866_v29  ;;  %6008 = vmatpush3.xpose.msra.mxu1 %v7793_v53 }
  0xbc   :  { %5978 = vmatprep.subr.mxu0 %v9990_v26  ;;  %6009 = vmatprep.subr.mxu1 %v9990_v26 }
  0xbf   :  { %5979 = vmatpush3.xpose.msra.mxu0 %v7888_v14  ;;  %6010 = vmatpush3.xpose.msra.mxu1 %v7822_v38 }
  0xc0   :  { %5980 = vmatprep.subr.mxu0 %v9990_v26  ;;  %6011 = vmatprep.subr.mxu1 %v9990_v26 }
  0xc3   :  { %5981 = vmatpush3.xpose.msra.mxu0 %v7909_v17  ;;  %6012 = vmatpush3.xpose.msra.mxu1 %v7853_v9 }
  0xc4   :  { %5982 = vmatprep.subr.mxu0 %v9990_v26  ;;  %6013 = vmatprep.subr.mxu1 %v9990_v26 }
  0xc7   :  { %5983 = vmatpush3.xpose.msra.mxu0 %v7929_v19  ;;  %6014 = vmatpush3.xpose.msra.mxu1 %v7878_v13 }
  0xc8   :  { %6015 = vmatprep.subr.mxu1 %v9990_v26  ;;  %6022 = vmatprep.subr.mxu0 %v9990_v26 }
  0xca   :  { %5985 = vmatmul.mubr.f32.vlgmr.msra.gmra.mxu0 %v9990_v26 }
  0xcb   :  { %6016 = vmatpush3.xpose.msra.mxu1 %v7900_v60  ;;  %6023 = vmatpush3.xpose.msra.mxu0 %v7561_v22 }
  0xcc   :  { %6017 = vmatprep.subr.mxu1 %v9990_v26  ;;  %6024 = vmatprep.subr.mxu0 %v9990_v26 }
  0xcd   :  { %6054 = vmatprep.mubr.msk.f32.mxu0 %vm7402_vm0, %v9990_v26 }
  0xcf   :  { %6018 = vmatpush3.xpose.msra.mxu1 %v7920_v49  ;;  %6025 = vmatpush3.xpose.msra.mxu0 %v7578_v12 }
  0xd0   :  { %6026 = vmatprep.subr.mxu0 %v9990_v26  ;;  %6057 = vmatprep.subr.mxu1 %v9990_v26 }
  0xd2   :  { %6020 = vmatmul.mubr.f32.vlgmr.msra.gmra.mxu1 %v9990_v26 }
  0xd3   :  { %6027 = vmatpush3.xpose.msra.mxu0 %v7598_v57  ;;  %6058 = vmatpush3.xpose.msra.mxu1 %v7538_v48 }
  0xd4   :  { %6028 = vmatprep.subr.mxu0 %v9990_v26  ;;  %6059 = vmatprep.subr.mxu1 %v9990_v26 }
  0xd5   :  { %6089 = vmatprep.mubr.msk.f32.mxu1 %vm7402_vm0, %v9990_v26 }
  0xd7   :  { %6029 = vmatpush3.xpose.msra.mxu0 %v7618_v18  ;;  %6060 = vmatpush3.xpose.msra.mxu1 %v7548_v61 }
  0xd8   :  { %6030 = vmatprep.subr.mxu0 %v9990_v26  ;;  %6061 = vmatprep.subr.mxu1 %v9990_v26 }
  0xdb   :  { %6031 = vmatpush3.xpose.msra.mxu0 %v7638_v59  ;;  %6062 = vmatpush3.xpose.msra.mxu1 %v7569_v50 }
  0xdc   :  { %6032 = vmatprep.subr.mxu0 %v9990_v26  ;;  %6063 = vmatprep.subr.mxu1 %v9990_v26 }
  0xdf   :  { %6033 = vmatpush3.xpose.msra.mxu0 %v10015_v21  ;;  %6064 = vmatpush3.xpose.msra.mxu1 %v7583_v35 }
  0xe0   :  { %6034 = vmatprep.subr.mxu0 %v9990_v26  ;;  %6065 = vmatprep.subr.mxu1 %v9990_v26 }
  0xe3   :  { %6035 = vmatpush3.xpose.msra.mxu0 %v10016_v1  ;;  %6066 = vmatpush3.xpose.msra.mxu1 %v7613_v16 }
  0xe4   :  { %6036 = vmatprep.subr.mxu0 %v9990_v26  ;;  %6067 = vmatprep.subr.mxu1 %v9990_v26 }
  0xe7   :  { %6037 = vmatpush3.xpose.msra.mxu0 %v10017_v62  ;;  %6068 = vmatpush3.xpose.msra.mxu1 %v7643_v41 }
  0xe8   :  { %6038 = vmatprep.subr.mxu0 %v9990_v26  ;;  %6069 = vmatprep.subr.mxu1 %v9990_v26 }
  0xeb   :  { %6039 = vmatpush3.xpose.msra.mxu0 %v10018_v37  ;;  %6070 = vmatpush3.xpose.msra.mxu1 %v7683_v11 }
  0xec   :  { %6040 = vmatprep.subr.mxu0 %v9990_v26  ;;  %6071 = vmatprep.subr.mxu1 %v9990_v26 }
  0xef   :  { %6041 = vmatpush3.xpose.msra.mxu0 %v10019_v23  ;;  %6072 = vmatpush3.xpose.msra.mxu1 %v7717_v8 }
  0xf0   :  { %6042 = vmatprep.subr.mxu0 %v9990_v26  ;;  %6073 = vmatprep.subr.mxu1 %v9990_v26 }
  0xf3   :  { %6043 = vmatpush3.xpose.msra.mxu0 %v10020_v42  ;;  %6074 = vmatpush3.xpose.msra.mxu1 %v7738_v46 }
  0xf4   :  { %6044 = vmatprep.subr.mxu0 %v9990_v26  ;;  %6075 = vmatprep.subr.mxu1 %v9990_v26 }
  0xf7   :  { %6045 = vmatpush3.xpose.msra.mxu0 %v7845_v39  ;;  %6076 = vmatpush3.xpose.msra.mxu1 %v7767_v34 }
  0xf8   :  { %6046 = vmatprep.subr.mxu0 %v9990_v26  ;;  %6077 = vmatprep.subr.mxu1 %v9990_v26 }
  0xfb   :  { %6047 = vmatpush3.xpose.msra.mxu0 %v7875_v32  ;;  %6078 = vmatpush3.xpose.msra.mxu1 %v7793_v53  ;;  %v10034_v32 = vlaneseq }
  0xfc   :  { %6048 = vmatprep.subr.mxu0 %v9990_v26  ;;  %6079 = vmatprep.subr.mxu1 %v9990_v26 }
  0xfd   :  { %v55_v39 = vand.u32 127, %v10034_v32 }
  0xff   :  { %6049 = vmatpush3.xpose.msra.mxu0 %v7897_v6  ;;  %6080 = vmatpush3.xpose.msra.mxu1 %v7822_v38 }
 0x100   :  { %6050 = vmatprep.subr.mxu0 %v9990_v26  ;;  %6081 = vmatprep.subr.mxu1 %v9990_v26 }
 0x103   :  { %6051 = vmatpush3.xpose.msra.mxu0 %v7917_v47  ;;  %6082 = vmatpush3.xpose.msra.mxu1 %v7853_v9  ;;  %v10033_v47 = vld [vmem:[#allocation9_spill] sm:$0xff] }
 0x104   :  { %6052 = vmatprep.subr.mxu0 %v9990_v26  ;;  %6083 = vmatprep.subr.mxu1 %v9990_v26  ;;  %v58_v6 = vmul.u32 16, %v10033_v47 }
 0x106   :  { %v60_v42 = vadd.s32 16, %v58_v6  ;;  %vm59_vm1 = vcmp.ge.s32.totalorder %v55_v39, %v58_v6 }
 0x107   :  { %6053 = vmatpush3.xpose.msra.mxu0 %v7935_v7  ;;  %6084 = vmatpush3.xpose.msra.mxu1 %v7878_v13 }
 0x108   :  { %6085 = vmatprep.subr.mxu1 %v9990_v26  ;;  %6092 = vmatprep.subr.mxu0 %v9990_v26  ;;  %vm61_vm2 = vcmp.lt.s32.totalorder %v55_v39, %v60_v42 }
 0x109   :  { %vm62_vm3 = vmand %vm59_vm1, %vm61_vm2 }
 0x10a   :  { %6055 = vmatmul.mubr.f32.vlgmr.msra.gmra.mxu0 %v9861_v0 }
 0x10b   :  { %6086 = vmatpush3.xpose.msra.mxu1 %v7900_v60  ;;  %6093 = vmatpush3.msra.mxu0 %v10021_v25  ;;  %v10026_v25 = vld [vmem:[#allocation18_spill] sm:$0xff] }
 0x10c   :  { %6087 = vmatprep.subr.mxu1 %v9990_v26  ;;  %6094 = vmatprep.subr.mxu0 %v9990_v26 }
 0x10d   :  { %6095 = vmatpush3.msra.mxu0 %v10022_v28  ;;  %6124 = vmatprep.mubr.msk.f32.mxu0 %vm7402_vm0, %v9990_v26  ;;  %v10025_v28 = vld [vmem:[#allocation15_spill] sm:$0xff] }
 0x10e   :  { %6096 = vmatprep.subr.mxu0 %v9990_v26 }
 0x10f   :  { %6088 = vmatpush3.xpose.msra.mxu1 %v7920_v49  ;;  %6097 = vmatpush3.msra.mxu0 %v10023_v3 }
 0x110   :  { %6098 = vmatprep.subr.mxu0 %v9990_v26  ;;  %6127 = vmatprep.subr.mxu1 %v9990_v26 }
 0x111   :  { %6099 = vmatpush3.msra.mxu0 %v10024_v4  ;;  %v10027_v4 = vld [vmem:[#allocation21_spill] sm:$0xff] }
 0x112   :  { %6090 = vmatmul.mubr.f32.vlgmr.msra.gmra.mxu1 %v9861_v0  ;;  %6100 = vmatprep.subr.mxu0 %v9990_v26  ;;  %v10028_v0 = vld [vmem:[#allocation25_spill] sm:$0xff] }
 0x113   :  { %6101 = vmatpush3.msra.mxu0 %v10025_v28  ;;  %6128 = vmatpush3.xpose.msra.mxu1 %v7538_v48  ;;  %v10029_v28 = vld [vmem:[#allocation27_spill] sm:$0xff] }
 0x114   :  { %6102 = vmatprep.subr.mxu0 %v9990_v26  ;;  %6129 = vmatprep.subr.mxu1 %v9990_v26 }
 0x115   :  { %6103 = vmatpush3.msra.mxu0 %v10026_v25  ;;  %6159 = vmatprep.mubr.msk.f32.mxu1 %vm7402_vm0, %v9990_v26  ;;  %v10030_v25 = vld [vmem:[#allocation29_spill] sm:$0xff] }
 0x116   :  { %6104 = vmatprep.subr.mxu0 %v9990_v26 }
 0x117   :  { %6105 = vmatpush3.msra.mxu0 %v10027_v4  ;;  %6130 = vmatpush3.xpose.msra.mxu1 %v7548_v61  ;;  %v10031_v4 = vld [vmem:[#allocation32_spill] sm:$0xff] }
 0x118   :  { %6106 = vmatprep.subr.mxu0 %v9990_v26  ;;  %6131 = vmatprep.subr.mxu1 %v9990_v26 }
 0x119   :  { %6107 = vmatpush3.msra.mxu0 %v10028_v0  ;;  %v10032_v0 = vld [vmem:[#allocation35_spill] sm:$0xff] }
 0x11a   :  { %6108 = vmatprep.subr.mxu0 %v9990_v26 }
 0x11b   :  { %6109 = vmatpush3.msra.mxu0 %v10029_v28  ;;  %6132 = vmatpush3.xpose.msra.mxu1 %v7569_v50 }
 0x11c   :  { %6110 = vmatprep.subr.mxu0 %v9990_v26  ;;  %6133 = vmatprep.subr.mxu1 %v9990_v26 }
 0x11d   :  { %6111 = vmatpush3.msra.mxu0 %v10030_v25 }
 0x11e   :  { %6112 = vmatprep.subr.mxu0 %v9990_v26 }
 0x11f   :  { %6113 = vmatpush3.msra.mxu0 %v10031_v4  ;;  %6134 = vmatpush3.xpose.msra.mxu1 %v7583_v35 }
 0x120   :  { %6114 = vmatprep.subr.mxu0 %v9990_v26  ;;  %6135 = vmatprep.subr.mxu1 %v9990_v26 }
 0x121   :  { %6115 = vmatpush3.msra.mxu0 %v10032_v0 }
 0x122   :  { %6116 = vmatprep.subr.mxu0 %v9990_v26 }
 0x123   :  { %6117 = vmatpush3.msra.mxu0 %v7842_v54  ;;  %6136 = vmatpush3.xpose.msra.mxu1 %v7613_v16 }
 0x124   :  { %6118 = vmatprep.subr.mxu0 %v9990_v26  ;;  %6137 = vmatprep.subr.mxu1 %v9990_v26 }
 0x125   :  { %6119 = vmatpush3.msra.mxu0 %v7869_v33 }
 0x126   :  { %6120 = vmatprep.subr.mxu0 %v9990_v26 }
 0x127   :  { %6121 = vmatpush3.msra.mxu0 %v7891_v52  ;;  %6138 = vmatpush3.xpose.msra.mxu1 %v7643_v41 }
 0x128   :  { %6122 = vmatprep.subr.mxu0 %v9990_v26  ;;  %6139 = vmatprep.subr.mxu1 %v9990_v26 }
 0x129   :  { %6123 = vmatpush3.msra.mxu0 %v7912_v27 }
 0x12a   :  { %6162 = vmatprep.subr.mxu0 %v9990_v26 }
 0x12b   :  { %6140 = vmatpush3.xpose.msra.mxu1 %v7683_v11 }
 0x12c   :  { %6141 = vmatprep.subr.mxu1 %v9990_v26 }
 0x12f   :  { %6142 = vmatpush3.xpose.msra.mxu1 %v7717_v8 }
 0x130   :  { %6143 = vmatprep.subr.mxu1 %v9990_v26 }
 0x133   :  { %6144 = vmatpush3.xpose.msra.mxu1 %v7738_v46 }
 0x134   :  { %6145 = vmatprep.subr.mxu1 %v9990_v26 }
 0x137   :  { %6146 = vmatpush3.xpose.msra.mxu1 %v7767_v34 }
 0x138   :  { %6147 = vmatprep.subr.mxu1 %v9990_v26 }
 0x13b   :  { %6148 = vmatpush3.xpose.msra.mxu1 %v7793_v53 }
 0x13c   :  { %6149 = vmatprep.subr.mxu1 %v9990_v26 }
 0x13f   :  { %6150 = vmatpush3.xpose.msra.mxu1 %v7822_v38 }
 0x140   :  { %6151 = vmatprep.subr.mxu1 %v9990_v26 }
 0x143   :  { %6152 = vmatpush3.xpose.msra.mxu1 %v7853_v9 }
 0x144   :  { %6153 = vmatprep.subr.mxu1 %v9990_v26 }
 0x147   :  { %6154 = vmatpush3.xpose.msra.mxu1 %v7878_v13 }
 0x148   :  { %6155 = vmatprep.subr.mxu1 %v9990_v26 }
 0x14a   :  { %v571_v27 = vpop.f32.mrf.mxu0 }
 0x14b   :  { %6156 = vmatpush3.xpose.msra.mxu1 %v7900_v60 }
 0x14c   :  { %v5916_v52 = vpop.f32.mrf.mxu0  ;;  %6157 = vmatprep.subr.mxu1 %v9990_v26 }
 0x14f   :  { %6158 = vmatpush3.xpose.msra.mxu1 %v7920_v49 }
 0x150   :  { %6197 = vmatprep.subr.mxu1 %v9990_v26 }
 0x152   :  { %v721_v33 = vpop.f32.mrf.mxu1 }
 0x153   :  { %v722_v54 = vadd.f32 %v721_v33, %v571_v27  ;;  %v8158_v33 = vsel %vm62_vm3, 1.0, %v9990_v26 }
 0x154   :  { %v5951_v0 = vpop.f32.mrf.mxu1  ;;  %10035 = vst [vmem:[#allocation20_spill] sm:$0xff] %v8158_v33 }
 0x18a   :  { %v823_v4 = vpop.f32.mrf.mxu0 }
 0x18b   :  { %v824_v25 = vadd.f32 %v823_v4, %v722_v54 }
 0x18c   :  { %v5986_v28 = vpop.f32.mrf.mxu0 }
 0x18d   :  { %v8160_v28 = vld [vmem:[#allocation6] sm:$0xff] }
 0x192   :  { %v909_v3 = vpop.f32.mrf.mxu1 }
 0x193   :  { %v910_v37 = vadd.f32 %v909_v3, %v824_v25 }
 0x194   :  { %v6021_v7 = vpop.f32.mrf.mxu1 }
 0x1ca   :  { %v1027_v52 = vpop.f32.mrf.mxu0 }
 0x1cb   :  { %v1028_v62 = vadd.f32 %v1027_v52, %v910_v37 }
 0x1cc   :  { %v6056_v23 = vpop.f32.mrf.mxu0 }
 0x1d2   :  { %v1113_v27 = vpop.f32.mrf.mxu1 }
 0x1d3   :  { %v1114_v54 = vadd.f32 %v1113_v27, %v1028_v62 }
 0x1d4   :  { %v6091_v0 = vpop.f32.mrf.mxu1 }
 0x1d5   :  { %v1117_v7 = vmul.f32 %v8158_v33, %v1114_v54  ;;  %v10036_v54 = vld [vmem:[#allocation14_spill] sm:$0xff] }
 0x1d7   :  { %v1118_v32 = vadd.f32 %v1117_v7, %v8160_v28  ;;  %v10037_v7 = vld [vmem:[#allocation16_spill] sm:$0xff] }
 0x1d9   :  { %v1119_v4 = vmul.f32 %v1118_v32, %v1118_v32 }
 0x1db   :  { %1120 = vadd.xlane.f32.xlu0 %v1119_v4  ;;  %v10038_v4 = vld [vmem:[#allocation17_spill] sm:$0xff] }
 0x264   :  { %v1121_v23 = vpop.xlane.xlu0 %1120 }
 0x265   :  { %7290 = vrsqrt.f32 %v1121_v23  ;;  %v1129_v39 = vadd.f32 1.0, %v1121_v23  ;;  %vm1124_vm4 = vcmp.eq.f32.partialorder %v1121_v23, inf  ;;  %v1127_v25 = vand.u32 2147483648, %v1121_v23 }
 0x266   :  { %vm1126_vm5 = vcmp.eq.f32.partialorder %v1121_v23, 0.0 }
 0x267   :  { %v1130_v6 = vadd.f32 1e-20, %v1129_v39  ;;  %v10041_v39 = vld [vmem:[#allocation23_spill] sm:$0xff] }
 0x269   :  { %7292 = vrcp.f32 %v1130_v6  ;;  %v10042_v6 = vld [vmem:[#allocation26_spill] sm:$0xff] }
 0x272   :  { %v7291_v37 = vpop.eup %7290 }
 0x273   :  { %v1123_v42 = vmul.f32 %v7291_v37, %v1121_v23  ;;  %v10043_v37 = vld [vmem:[#allocation30_spill] sm:$0xff] }
 0x275   :  { %v1125_v3 = vsel %vm1124_vm4, %v1121_v23, %v1123_v42  ;;  %v10039_v23 = vld [vmem:[#allocation19_spill] sm:$0xff]  ;;  %v10044_v42 = vld [vmem:[#allocation33_spill] sm:$0xff] }
 0x276   :  { %v7293_v62 = vpop.eup %7292  ;;  %v1128_v52 = vsel %vm1126_vm5, %v1127_v25, %v1125_v3  ;;  %v10045_v25 = vld [vmem:[#allocation36_spill] sm:$0xff] }
 0x277   :  { %v1132_v27 = vmul.f32 %v7293_v62, %v1128_v52 }
 0x279   :  { %v1133_v0 = vmul.f32 %v1132_v27, %v1118_v32  ;;  %v10040_v32 = vld [vmem:[#allocation22_spill] sm:$0xff] }
 0x27b   :  { %6125 = vmatmul.mubr.f32.vlgmr.msra.gmra.mxu0 %v1133_v0 }
 0x27c   :  { %6163 = vmatpush3.xpose.msra.mxu0 %v10036_v54  ;;  %6194 = vmatprep.mubr.msk.f32.mxu0 %vm7402_vm0, %v9990_v26 }
 0x27d   :  { %6164 = vmatprep.subr.mxu0 %v9990_v26 }
 0x280   :  { %6165 = vmatpush3.xpose.msra.mxu0 %v10037_v7 }
 0x281   :  { %6166 = vmatprep.subr.mxu0 %v9990_v26 }
 0x284   :  { %6167 = vmatpush3.xpose.msra.mxu0 %v10038_v4 }
 0x285   :  { %6168 = vmatprep.subr.mxu0 %v9990_v26 }
 0x288   :  { %6169 = vmatpush3.xpose.msra.mxu0 %v10039_v23 }
 0x289   :  { %6170 = vmatprep.subr.mxu0 %v9990_v26 }
 0x28c   :  { %6171 = vmatpush3.xpose.msra.mxu0 %v10040_v32 }
 0x28d   :  { %6172 = vmatprep.subr.mxu0 %v9990_v26 }
 0x290   :  { %6173 = vmatpush3.xpose.msra.mxu0 %v10041_v39 }
 0x291   :  { %6174 = vmatprep.subr.mxu0 %v9990_v26 }
 0x294   :  { %6175 = vmatpush3.xpose.msra.mxu0 %v10042_v6 }
 0x295   :  { %6176 = vmatprep.subr.mxu0 %v9990_v26 }
 0x298   :  { %6177 = vmatpush3.xpose.msra.mxu0 %v10043_v37 }
 0x299   :  { %6178 = vmatprep.subr.mxu0 %v9990_v26 }
 0x29c   :  { %6179 = vmatpush3.xpose.msra.mxu0 %v10044_v42 }
 0x29d   :  { %6180 = vmatprep.subr.mxu0 %v9990_v26 }
 0x2a0   :  { %6181 = vmatpush3.xpose.msra.mxu0 %v10045_v25 }
 0x2a1   :  { %6182 = vmatprep.subr.mxu0 %v9990_v26 }
 0x2a4   :  { %6183 = vmatpush3.xpose.msra.mxu0 %v7838_v56 }
 0x2a5   :  { %6184 = vmatprep.subr.mxu0 %v9990_v26 }
 0x2a8   :  { %6185 = vmatpush3.xpose.msra.mxu0 %v7861_v15 }
 0x2a9   :  { %6186 = vmatprep.subr.mxu0 %v9990_v26 }
 0x2ac   :  { %6187 = vmatpush3.xpose.msra.mxu0 %v7893_v40 }
 0x2ad   :  { %6188 = vmatprep.subr.mxu0 %v9990_v26 }
 0x2b0   :  { %6189 = vmatpush3.xpose.msra.mxu0 %v7914_v45 }
 0x2b1   :  { %6190 = vmatprep.subr.mxu0 %v9990_v26 }
 0x2b4   :  { %6191 = vmatpush3.xpose.msra.mxu0 %v7932_v30 }
 0x2b5   :  { %6192 = vmatprep.subr.mxu0 %v9990_v26 }
 0x2b8   :  { %6193 = vmatpush3.xpose.msra.mxu0 %v7946_v36 }
 0x2b9   :  { %6232 = vmatprep.subr.mxu0 %v9990_v26 }
 0x33b   :  { %v8198_v3 = vpop.f32.mrf.mxu0 }
 0x33c   :  { %v1204_v62 = vrot.slane %v8198_v3, 4 }
 0x33d   :  { %v6126_v52 = vpop.f32.mrf.mxu0 }
 0x33e   :  { %v1205_v27 = vmax.f32 %v8198_v3, %v1204_v62 }
 0x340   :  { %v1206_v0 = vrot.slane %v1205_v27, 2 }
 0x342   :  { %v1207_v47 = vmax.f32 %v1205_v27, %v1206_v0  ;;  %v10056_v27 = vld [vmem:[#allocation11_spill] sm:$0xff]  ;;  %v10057_v0 = vld [vmem:[#allocation12_spill] sm:$0xff] }
 0x344   :  { %v1208_v45 = vrot.slane %v1207_v47, 1 }
 0x346   :  { %v1209_v40 = vmax.f32 %v1207_v47, %v1208_v45  ;;  %v10046_v45 = vld [vmem:[#allocation28_spill] sm:$0xff]  ;;  %v10047_v47 = vld [vmem:[#allocation31_spill] sm:$0xff] }
 0x348   :  { %v1210_v15 = vsub.f32 %v8198_v3, %v1209_v40 }
 0x34a   :  { %v1211_v30 = vmul.f32 1.442695, %v1210_v15 }
 0x34c   :  { %7294 = vpow2.f32 %v1211_v30  ;;  %v10048_v30 = vld [vmem:[#allocation34_spill] sm:$0xff] }
 0x359   :  { %v7295_v56 = vpop.eup %7294 }
 0x35a   :  { %v1213_v25 = vrot.slane %v7295_v56, 4 }
 0x35c   :  { %v1214_v36 = vadd.f32 %v7295_v56, %v1213_v25  ;;  %v10055_v25 = vld [vmem:[#allocation10_spill] sm:$0xff] }
 0x35e   :  { %v1215_v42 = vrot.slane %v1214_v36, 2 }
 0x360   :  { %v1216_v37 = vadd.f32 %v1215_v42, %v1214_v36  ;;  %v10049_v36 = vld [vmem:[#allocation37_spill] sm:$0xff]  ;;  %v10054_v42 = vld [vmem:[#allocation51_spill] sm:$0xff] }
 0x362   :  { %v1217_v6 = vrot.slane %v1216_v37, 1 }
 0x364   :  { %v1218_v39 = vadd.f32 %v1217_v6, %v1216_v37  ;;  %v10052_v6 = vld [vmem:[#allocation46_spill] sm:$0xff]  ;;  %v10053_v37 = vld [vmem:[#allocation49_spill] sm:$0xff] }
 0x366   :  { %7296 = vrcp.f32 %v1218_v39  ;;  %v10051_v39 = vld [vmem:[#allocation43_spill] sm:$0xff] }
 0x373   :  { %v7297_v32 = vpop.eup %7296 }
 0x374   :  { %v1220_v52 = vmul.f32 %v7297_v32, %v7295_v56  ;;  %v10050_v32 = vld [vmem:[#allocation40_spill] sm:$0xff] }
 0x376   :  { %v8203_v23 = vand.u32 4294901760, %v1220_v52 }
 0x378   :  { %v8206_v62 = vsub.f32 %v1220_v52, %v8203_v23  ;;  %6195 = vmatmul.mubr.f32.vlgmr.msra.gmra.mxu0 %v8203_v23  ;;  %v10059_v52 = vld [vmem:[#allocation15_spill] sm:$0xff] }
 0x379   :  { %6233 = vmatpush3.xpose.msra.mxu0 %v7538_v48  ;;  %6264 = vmatprep.mubr.msk.f32.mxu0 %vm7402_vm0, %v9990_v26 }
 0x37a   :  { %6234 = vmatprep.subr.mxu0 %v9990_v26  ;;  %v1304_v15 = vand.u32 4294901760, %v8206_v62 }
 0x37c   :  { %v1305_v40 = vsub.f32 %v8206_v62, %v1304_v15 }
 0x37d   :  { %6235 = vmatpush3.xpose.msra.mxu0 %v7548_v61 }
 0x37e   :  { %6236 = vmatprep.subr.mxu0 %v9990_v26  ;;  %v1306_v56 = vand.u32 4294901760, %v1305_v40  ;;  %v10062_v40 = vld [vmem:[#allocation25_spill] sm:$0xff] }
 0x380   :  { %6160 = vmatmul.mubr.f32.vlgmr.msra.gmra.mxu1 %v1306_v56  ;;  %v10063_v56 = vld [vmem:[#allocation27_spill] sm:$0xff] }
 0x381   :  { %6198 = vmatpush3.xpose.msra.mxu1 %v7552_v58  ;;  %6237 = vmatpush3.xpose.msra.mxu0 %v7569_v50 }
 0x382   :  { %6199 = vmatprep.subr.mxu1 %v9990_v26  ;;  %6238 = vmatprep.subr.mxu0 %v9990_v26 }
 0x383   :  { %6229 = vmatprep.mubr.msk.f32.mxu1 %vm7402_vm0, %v9990_v26 }
 0x385   :  { %6200 = vmatpush3.xpose.msra.mxu1 %v7565_v24  ;;  %6239 = vmatpush3.xpose.msra.mxu0 %v7583_v35 }
 0x386   :  { %6201 = vmatprep.subr.mxu1 %v9990_v26  ;;  %6240 = vmatprep.subr.mxu0 %v9990_v26 }
 0x389   :  { %6202 = vmatpush3.xpose.msra.mxu1 %v7587_v31  ;;  %6241 = vmatpush3.xpose.msra.mxu0 %v7613_v16 }
 0x38a   :  { %6203 = vmatprep.subr.mxu1 %v9990_v26  ;;  %6242 = vmatprep.subr.mxu0 %v9990_v26 }
 0x38d   :  { %6204 = vmatpush3.xpose.msra.mxu1 %v7602_v51  ;;  %6243 = vmatpush3.xpose.msra.mxu0 %v7643_v41 }
 0x38e   :  { %6205 = vmatprep.subr.mxu1 %v9990_v26  ;;  %6244 = vmatprep.subr.mxu0 %v9990_v26 }
 0x391   :  { %6206 = vmatpush3.xpose.msra.mxu1 %v7626_v43  ;;  %6245 = vmatpush3.xpose.msra.mxu0 %v7683_v11 }
 0x392   :  { %6207 = vmatprep.subr.mxu1 %v9990_v26  ;;  %6246 = vmatprep.subr.mxu0 %v9990_v26 }
 0x395   :  { %6208 = vmatpush3.xpose.msra.mxu1 %v7657_v44  ;;  %6247 = vmatpush3.xpose.msra.mxu0 %v7717_v8 }
 0x396   :  { %6209 = vmatprep.subr.mxu1 %v9990_v26  ;;  %6248 = vmatprep.subr.mxu0 %v9990_v26 }
 0x399   :  { %6210 = vmatpush3.xpose.msra.mxu1 %v7696_v10  ;;  %6249 = vmatpush3.xpose.msra.mxu0 %v7738_v46 }
 0x39a   :  { %6211 = vmatprep.subr.mxu1 %v9990_v26  ;;  %6250 = vmatprep.subr.mxu0 %v9990_v26 }
 0x39d   :  { %6212 = vmatpush3.xpose.msra.mxu1 %v7730_v2  ;;  %6251 = vmatpush3.xpose.msra.mxu0 %v7767_v34 }
 0x39e   :  { %6213 = vmatprep.subr.mxu1 %v9990_v26  ;;  %6252 = vmatprep.subr.mxu0 %v9990_v26 }
 0x3a1   :  { %6214 = vmatpush3.xpose.msra.mxu1 %v7753_v55  ;;  %6253 = vmatpush3.xpose.msra.mxu0 %v7793_v53 }
 0x3a2   :  { %6215 = vmatprep.subr.mxu1 %v9990_v26  ;;  %6254 = vmatprep.subr.mxu0 %v9990_v26 }
 0x3a5   :  { %6216 = vmatpush3.xpose.msra.mxu1 %v7780_v63  ;;  %6255 = vmatpush3.xpose.msra.mxu0 %v7822_v38 }
 0x3a6   :  { %6217 = vmatprep.subr.mxu1 %v9990_v26  ;;  %6256 = vmatprep.subr.mxu0 %v9990_v26 }
 0x3a9   :  { %6218 = vmatpush3.xpose.msra.mxu1 %v7807_v5  ;;  %6257 = vmatpush3.xpose.msra.mxu0 %v7853_v9 }
 0x3aa   :  { %6219 = vmatprep.subr.mxu1 %v9990_v26  ;;  %6258 = vmatprep.subr.mxu0 %v9990_v26 }
 0x3ad   :  { %6220 = vmatpush3.xpose.msra.mxu1 %v7834_v20  ;;  %6259 = vmatpush3.xpose.msra.mxu0 %v7878_v13 }
 0x3ae   :  { %6221 = vmatprep.subr.mxu1 %v9990_v26  ;;  %6260 = vmatprep.subr.mxu0 %v9990_v26 }
 0x3b1   :  { %6222 = vmatpush3.xpose.msra.mxu1 %v7866_v29  ;;  %6261 = vmatpush3.xpose.msra.mxu0 %v7900_v60 }
 0x3b2   :  { %6223 = vmatprep.subr.mxu1 %v9990_v26  ;;  %6262 = vmatprep.subr.mxu0 %v9990_v26 }
 0x3b5   :  { %6224 = vmatpush3.xpose.msra.mxu1 %v7888_v14  ;;  %6263 = vmatpush3.xpose.msra.mxu0 %v7920_v49 }
 0x3b6   :  { %6225 = vmatprep.subr.mxu1 %v9990_v26  ;;  %6302 = vmatprep.subr.mxu0 %v9990_v26 }
 0x3b8   :  { %6265 = vmatmul.mubr.f32.vlgmr.msra.gmra.mxu0 %v1304_v15  ;;  %v10061_v15 = vld [vmem:[#allocation21_spill] sm:$0xff] }
 0x3b9   :  { %6226 = vmatpush3.xpose.msra.mxu1 %v7909_v17  ;;  %6303 = vmatpush3.xpose.msra.mxu0 %v7538_v48 }
 0x3ba   :  { %6227 = vmatprep.subr.mxu1 %v9990_v26  ;;  %6304 = vmatprep.subr.mxu0 %v9990_v26 }
 0x3bb   :  { %6334 = vmatprep.mubr.msk.f32.mxu0 %vm7402_vm0, %v9990_v26 }
 0x3bd   :  { %6228 = vmatpush3.xpose.msra.mxu1 %v7929_v19  ;;  %6305 = vmatpush3.xpose.msra.mxu0 %v7548_v61 }
 0x3be   :  { %6267 = vmatprep.subr.mxu1 %v9990_v26  ;;  %6306 = vmatprep.subr.mxu0 %v9990_v26 }
 0x3c0   :  { %6230 = vmatmul.mubr.f32.vlgmr.msra.gmra.mxu1 %v8206_v62  ;;  %v10060_v62 = vld [vmem:[#allocation18_spill] sm:$0xff] }
 0x3c1   :  { %6268 = vmatpush3.xpose.msra.mxu1 %v7561_v22  ;;  %6307 = vmatpush3.xpose.msra.mxu0 %v7569_v50 }
 0x3c2   :  { %6269 = vmatprep.subr.mxu1 %v9990_v26  ;;  %6308 = vmatprep.subr.mxu0 %v9990_v26 }
 0x3c3   :  { %6299 = vmatprep.mubr.msk.f32.mxu1 %vm7402_vm0, %v9990_v26 }
 0x3c5   :  { %6270 = vmatpush3.xpose.msra.mxu1 %v7578_v12  ;;  %6309 = vmatpush3.xpose.msra.mxu0 %v7583_v35 }
 0x3c6   :  { %6271 = vmatprep.subr.mxu1 %v9990_v26  ;;  %6310 = vmatprep.subr.mxu0 %v9990_v26 }
 0x3c9   :  { %6272 = vmatpush3.xpose.msra.mxu1 %v7598_v57  ;;  %6311 = vmatpush3.xpose.msra.mxu0 %v7613_v16 }
 0x3ca   :  { %6273 = vmatprep.subr.mxu1 %v9990_v26  ;;  %6312 = vmatprep.subr.mxu0 %v9990_v26 }
 0x3cd   :  { %6274 = vmatpush3.xpose.msra.mxu1 %v7618_v18  ;;  %6313 = vmatpush3.xpose.msra.mxu0 %v7643_v41 }
 0x3ce   :  { %6275 = vmatprep.subr.mxu1 %v9990_v26  ;;  %6314 = vmatprep.subr.mxu0 %v9990_v26 }
 0x3d1   :  { %6276 = vmatpush3.xpose.msra.mxu1 %v7638_v59  ;;  %6315 = vmatpush3.xpose.msra.mxu0 %v7683_v11 }
 0x3d2   :  { %6277 = vmatprep.subr.mxu1 %v9990_v26  ;;  %6316 = vmatprep.subr.mxu0 %v9990_v26 }
 0x3d5   :  { %6278 = vmatpush3.xpose.msra.mxu1 %v10015_v21  ;;  %6317 = vmatpush3.xpose.msra.mxu0 %v7717_v8 }
 0x3d6   :  { %6279 = vmatprep.subr.mxu1 %v9990_v26  ;;  %6318 = vmatprep.subr.mxu0 %v9990_v26 }
 0x3d9   :  { %6280 = vmatpush3.xpose.msra.mxu1 %v10016_v1  ;;  %6319 = vmatpush3.xpose.msra.mxu0 %v7738_v46 }
 0x3da   :  { %6281 = vmatprep.subr.mxu1 %v9990_v26  ;;  %6320 = vmatprep.subr.mxu0 %v9990_v26 }
 0x3dd   :  { %6282 = vmatpush3.xpose.msra.mxu1 %v10046_v45  ;;  %6321 = vmatpush3.xpose.msra.mxu0 %v7767_v34 }
 0x3de   :  { %6283 = vmatprep.subr.mxu1 %v9990_v26  ;;  %6322 = vmatprep.subr.mxu0 %v9990_v26 }
 0x3e1   :  { %6284 = vmatpush3.xpose.msra.mxu1 %v10047_v47  ;;  %6323 = vmatpush3.xpose.msra.mxu0 %v7793_v53 }
 0x3e2   :  { %6285 = vmatprep.subr.mxu1 %v9990_v26  ;;  %6324 = vmatprep.subr.mxu0 %v9990_v26 }
 0x3e5   :  { %6286 = vmatpush3.xpose.msra.mxu1 %v10048_v30  ;;  %6325 = vmatpush3.xpose.msra.mxu0 %v7822_v38 }
 0x3e6   :  { %6287 = vmatprep.subr.mxu1 %v9990_v26  ;;  %6326 = vmatprep.subr.mxu0 %v9990_v26 }
 0x3e9   :  { %6288 = vmatpush3.xpose.msra.mxu1 %v10049_v36  ;;  %6327 = vmatpush3.xpose.msra.mxu0 %v7853_v9 }
 0x3ea   :  { %6289 = vmatprep.subr.mxu1 %v9990_v26  ;;  %6328 = vmatprep.subr.mxu0 %v9990_v26 }
 0x3ed   :  { %6290 = vmatpush3.xpose.msra.mxu1 %v10050_v32  ;;  %6329 = vmatpush3.xpose.msra.mxu0 %v7878_v13 }
 0x3ee   :  { %6291 = vmatprep.subr.mxu1 %v9990_v26  ;;  %6330 = vmatprep.subr.mxu0 %v9990_v26 }
 0x3f1   :  { %6292 = vmatpush3.xpose.msra.mxu1 %v10051_v39  ;;  %6331 = vmatpush3.xpose.msra.mxu0 %v7900_v60 }
 0x3f2   :  { %6293 = vmatprep.subr.mxu1 %v9990_v26  ;;  %6332 = vmatprep.subr.mxu0 %v9990_v26 }
 0x3f5   :  { %6294 = vmatpush3.xpose.msra.mxu1 %v10052_v6  ;;  %6333 = vmatpush3.xpose.msra.mxu0 %v7920_v49 }
 0x3f6   :  { %6295 = vmatprep.subr.mxu1 %v9990_v26  ;;  %6372 = vmatprep.subr.mxu0 %v9990_v26 }
 0x3f8   :  { %6335 = vmatmul.mubr.f32.vlgmr.msra.gmra.mxu0 %v8203_v23 }
 0x3f9   :  { %6296 = vmatpush3.xpose.msra.mxu1 %v10053_v37  ;;  %6373 = vmatpush3.xpose.msra.mxu0 %v7538_v48 }
 0x3fa   :  { %6297 = vmatprep.subr.mxu1 %v9990_v26  ;;  %6374 = vmatprep.subr.mxu0 %v9990_v26 }
 0x3fb   :  { %6404 = vmatprep.mubr.msk.f32.mxu0 %vm7402_vm0, %v9990_v26 }
 0x3fd   :  { %6298 = vmatpush3.xpose.msra.mxu1 %v10054_v42  ;;  %6375 = vmatpush3.xpose.msra.mxu0 %v7548_v61 }
 0x3fe   :  { %6337 = vmatprep.subr.mxu1 %v9990_v26  ;;  %6376 = vmatprep.subr.mxu0 %v9990_v26 }
 0x400   :  { %6300 = vmatmul.mubr.f32.vlgmr.msra.gmra.mxu1 %v8203_v23  ;;  %v10058_v23 = vld [vmem:[#allocation13_spill] sm:$0xff] }
 0x401   :  { %6338 = vmatpush3.msra.mxu1 %v10055_v25  ;;  %6369 = vmatprep.mubr.msk.f32.mxu1 %vm7402_vm0, %v9990_v26  ;;  %v10064_v25 = vld [vmem:[#allocation29_spill] sm:$0xff] }
 0x402   :  { %6339 = vmatprep.subr.mxu1 %v9990_v26  ;;  %6377 = vmatpush3.xpose.msra.mxu0 %v7569_v50 }
 0x403   :  { %6340 = vmatpush3.msra.mxu1 %v10056_v27  ;;  %6378 = vmatprep.subr.mxu0 %v9990_v26  ;;  %v10065_v27 = vld [vmem:[#allocation32_spill] sm:$0xff] }
 0x404   :  { %6341 = vmatprep.subr.mxu1 %v9990_v26 }
 0x405   :  { %6342 = vmatpush3.msra.mxu1 %v10057_v0  ;;  %v10066_v0 = vld [vmem:[#allocation35_spill] sm:$0xff] }
 0x406   :  { %6343 = vmatprep.subr.mxu1 %v9990_v26  ;;  %6379 = vmatpush3.xpose.msra.mxu0 %v7583_v35 }
 0x407   :  { %6344 = vmatpush3.msra.mxu1 %v10058_v23  ;;  %6380 = vmatprep.subr.mxu0 %v9990_v26  ;;  %v10067_v23 = vld [vmem:[#allocation39_spill] sm:$0xff] }
 0x408   :  { %6345 = vmatprep.subr.mxu1 %v9990_v26 }
 0x409   :  { %6346 = vmatpush3.msra.mxu1 %v10059_v52  ;;  %v10068_v52 = vld [vmem:[#allocation42_spill] sm:$0xff] }
 0x40a   :  { %6347 = vmatprep.subr.mxu1 %v9990_v26  ;;  %6381 = vmatpush3.xpose.msra.mxu0 %v7613_v16 }
 0x40b   :  { %6348 = vmatpush3.msra.mxu1 %v10060_v62  ;;  %6382 = vmatprep.subr.mxu0 %v9990_v26  ;;  %v10069_v62 = vld [vmem:[#allocation44_spill] sm:$0xff] }
 0x40c   :  { %6349 = vmatprep.subr.mxu1 %v9990_v26 }
 0x40d   :  { %6350 = vmatpush3.msra.mxu1 %v10061_v15  ;;  %v10070_v15 = vld [vmem:[#allocation47_spill] sm:$0xff] }
 0x40e   :  { %6351 = vmatprep.subr.mxu1 %v9990_v26  ;;  %6383 = vmatpush3.xpose.msra.mxu0 %v7643_v41 }
 0x40f   :  { %6352 = vmatpush3.msra.mxu1 %v10062_v40  ;;  %6384 = vmatprep.subr.mxu0 %v9990_v26 }
 0x410   :  { %6353 = vmatprep.subr.mxu1 %v9990_v26 }
 0x411   :  { %6354 = vmatpush3.msra.mxu1 %v10063_v56 }
 0x412   :  { %6355 = vmatprep.subr.mxu1 %v9990_v26  ;;  %6385 = vmatpush3.xpose.msra.mxu0 %v7683_v11 }
 0x413   :  { %6356 = vmatpush3.msra.mxu1 %v10064_v25  ;;  %6386 = vmatprep.subr.mxu0 %v9990_v26 }
 0x414   :  { %6357 = vmatprep.subr.mxu1 %v9990_v26 }
 0x415   :  { %6358 = vmatpush3.msra.mxu1 %v10065_v27 }
 0x416   :  { %6359 = vmatprep.subr.mxu1 %v9990_v26  ;;  %6387 = vmatpush3.xpose.msra.mxu0 %v7717_v8 }
 0x417   :  { %6360 = vmatpush3.msra.mxu1 %v10066_v0  ;;  %6388 = vmatprep.subr.mxu0 %v9990_v26 }
 0x418   :  { %6361 = vmatprep.subr.mxu1 %v9990_v26 }
 0x419   :  { %6362 = vmatpush3.msra.mxu1 %v10067_v23 }
 0x41a   :  { %6363 = vmatprep.subr.mxu1 %v9990_v26  ;;  %6389 = vmatpush3.xpose.msra.mxu0 %v7738_v46 }
 0x41b   :  { %6364 = vmatpush3.msra.mxu1 %v10068_v52  ;;  %6390 = vmatprep.subr.mxu0 %v9990_v26 }
 0x41c   :  { %6365 = vmatprep.subr.mxu1 %v9990_v26 }
 0x41d   :  { %6366 = vmatpush3.msra.mxu1 %v10069_v62 }
 0x41e   :  { %6367 = vmatprep.subr.mxu1 %v9990_v26  ;;  %6391 = vmatpush3.xpose.msra.mxu0 %v7767_v34 }
 0x41f   :  { %6368 = vmatpush3.msra.mxu1 %v10070_v15  ;;  %6392 = vmatprep.subr.mxu0 %v9990_v26 }
 0x420   :  { %6407 = vmatprep.subr.mxu1 %v9990_v26 }
 0x422   :  { %6393 = vmatpush3.xpose.msra.mxu0 %v7793_v53 }
 0x423   :  { %6394 = vmatprep.subr.mxu0 %v9990_v26 }
 0x426   :  { %6395 = vmatpush3.xpose.msra.mxu0 %v7822_v38 }
 0x427   :  { %6396 = vmatprep.subr.mxu0 %v9990_v26 }
 0x42a   :  { %6397 = vmatpush3.xpose.msra.mxu0 %v7853_v9 }
 0x42b   :  { %6398 = vmatprep.subr.mxu0 %v9990_v26 }
 0x42e   :  { %6399 = vmatpush3.xpose.msra.mxu0 %v7878_v13 }
 0x42f   :  { %6400 = vmatprep.subr.mxu0 %v9990_v26 }
 0x432   :  { %6401 = vmatpush3.xpose.msra.mxu0 %v7900_v60 }
 0x433   :  { %6402 = vmatprep.subr.mxu0 %v9990_v26 }
 0x436   :  { %6403 = vmatpush3.xpose.msra.mxu0 %v7920_v49 }
 0x437   :  { %6442 = vmatprep.subr.mxu0 %v9990_v26 }
 0x438   :  { %v1459_v40 = vpop.f32.mrf.mxu0 }
 0x43a   :  { %v6196_v56 = vpop.f32.mrf.mxu0 }
 0x440   :  { %v1308_v25 = vpop.f32.mrf.mxu1 }
 0x441   :  { %v1460_v27 = vadd.f32 %v1459_v40, %v1308_v25 }
 0x442   :  { %v6161_v0 = vpop.f32.mrf.mxu1 }
 0x478   :  { %v1652_v23 = vpop.f32.mrf.mxu0 }
 0x47a   :  { %v6266_v52 = vpop.f32.mrf.mxu0 }
 0x47b   :  { %v10079_v52 = vld [vmem:[#allocation41_spill] sm:$0xff] }
 0x480   :  { %v1563_v62 = vpop.f32.mrf.mxu1 }
 0x481   :  { %v1564_v15 = vadd.f32 %v1563_v62, %v1460_v27  ;;  %v10080_v62 = vld [vmem:[#allocation45_spill] sm:$0xff] }
 0x482   :  { %v6231_v42 = vpop.f32.mrf.mxu1 }
 0x483   :  { %v1653_v37 = vadd.f32 %v1652_v23, %v1564_v15  ;;  %v10081_v15 = vld [vmem:[#allocation48_spill] sm:$0xff] }
 0x4b8   :  { %v1858_v6 = vpop.f32.mrf.mxu0 }
 0x4ba   :  { %v6336_v39 = vpop.f32.mrf.mxu0 }
 0x4c0   :  { %v1771_v32 = vpop.f32.mrf.mxu1 }
 0x4c1   :  { %v1772_v36 = vadd.f32 %v1771_v32, %v1653_v37  ;;  %v10078_v37 = vld [vmem:[#allocation38_spill] sm:$0xff] }
 0x4c2   :  { %v6301_v30 = vpop.f32.mrf.mxu1 }
 0x4c3   :  { %v1859_v47 = vadd.f32 %v1858_v6, %v1772_v36 }
 0x4c5   :  { %v1862_v45 = vmul.f32 %v8158_v33, %v1859_v47  ;;  %v10077_v47 = vld [vmem:[#allocation36_spill] sm:$0xff] }
 0x4c7   :  { %v1863_v1 = vadd.f32 %v1862_v45, %v8160_v28  ;;  %v10071_v28 = vld [vmem:[#allocation19_spill] sm:$0xff]  ;;  %v10074_v45 = vld [vmem:[#allocation26_spill] sm:$0xff] }
 0x4c9   :  { %v1864_v56 = vmul.f32 %v1863_v1, %v1863_v1 }
 0x4cb   :  { %1865 = vadd.xlane.f32.xlu0 %v1864_v56  ;;  %v10082_v56 = vld [vmem:[#allocation50_spill] sm:$0xff] }
 0x554   :  { %v1866_v40 = vpop.xlane.xlu0 %1865 }
 0x555   :  { %7298 = vrsqrt.f32 %v1866_v40  ;;  %v1874_v25 = vadd.f32 1.0, %v1866_v40  ;;  %vm1869_vm6 = vcmp.eq.f32.partialorder %v1866_v40, inf  ;;  %v1872_v23 = vand.u32 2147483648, %v1866_v40 }
 0x556   :  { %vm1871_vm7 = vcmp.eq.f32.partialorder %v1866_v40, 0.0 }
 0x557   :  { %v1875_v0 = vadd.f32 1e-20, %v1874_v25 }
 0x559   :  { %7300 = vrcp.f32 %v1875_v0 }
 0x562   :  { %v7299_v27 = vpop.eup %7298 }
 0x563   :  { %v1868_v42 = vmul.f32 %v7299_v27, %v1866_v40 }
 0x565   :  { %v1870_v39 = vsel %vm1869_vm6, %v1866_v40, %v1868_v42  ;;  %v10083_v40 = vld [vmem:[#allocation52_spill] sm:$0xff] }
 0x566   :  { %v7301_v32 = vpop.eup %7300  ;;  %v1873_v30 = vsel %vm1871_vm7, %v1872_v23, %v1870_v39 }
 0x567   :  { %v1877_v36 = vmul.f32 %v7301_v32, %v1873_v30 }
 0x569   :  { %v1878_v6 = vmul.f32 %v1877_v36, %v1863_v1  ;;  %v10072_v1 = vld [vmem:[#allocation22_spill] sm:$0xff] }
 0x56b   :  { %6370 = vmatmul.mubr.f32.vlgmr.msra.gmra.mxu1 %v1878_v6 }
 0x56c   :  { %6408 = vmatpush3.xpose.msra.mxu1 %v10036_v54  ;;  %6439 = vmatprep.mubr.msk.f32.mxu1 %vm7402_vm0, %v9990_v26  ;;  %v10073_v54 = vld [vmem:[#allocation23_spill] sm:$0xff] }
 0x56d   :  { %6409 = vmatprep.subr.mxu1 %v9990_v26 }
 0x570   :  { %6410 = vmatpush3.xpose.msra.mxu1 %v10037_v7  ;;  %v10075_v7 = vld [vmem:[#allocation30_spill] sm:$0xff] }
 0x571   :  { %6411 = vmatprep.subr.mxu1 %v9990_v26 }
 0x574   :  { %6412 = vmatpush3.xpose.msra.mxu1 %v10038_v4  ;;  %v10076_v4 = vld [vmem:[#allocation33_spill] sm:$0xff] }
 0x575   :  { %6413 = vmatprep.subr.mxu1 %v9990_v26 }
 0x578   :  { %6414 = vmatpush3.xpose.msra.mxu1 %v10071_v28 }
 0x579   :  { %6415 = vmatprep.subr.mxu1 %v9990_v26 }
 0x57c   :  { %6416 = vmatpush3.xpose.msra.mxu1 %v10072_v1 }
 0x57d   :  { %6417 = vmatprep.subr.mxu1 %v9990_v26 }
 0x580   :  { %6418 = vmatpush3.xpose.msra.mxu1 %v10073_v54 }
 0x581   :  { %6419 = vmatprep.subr.mxu1 %v9990_v26 }
 0x584   :  { %6420 = vmatpush3.xpose.msra.mxu1 %v10074_v45 }
 0x585   :  { %6421 = vmatprep.subr.mxu1 %v9990_v26 }
 0x588   :  { %6422 = vmatpush3.xpose.msra.mxu1 %v10075_v7 }
 0x589   :  { %6423 = vmatprep.subr.mxu1 %v9990_v26 }
 0x58c   :  { %6424 = vmatpush3.xpose.msra.mxu1 %v10076_v4 }
 0x58d   :  { %6425 = vmatprep.subr.mxu1 %v9990_v26 }
 0x590   :  { %6426 = vmatpush3.xpose.msra.mxu1 %v10077_v47 }
 0x591   :  { %6427 = vmatprep.subr.mxu1 %v9990_v26 }
 0x594   :  { %6428 = vmatpush3.xpose.msra.mxu1 %v10078_v37 }
 0x595   :  { %6429 = vmatprep.subr.mxu1 %v9990_v26 }
 0x598   :  { %6430 = vmatpush3.xpose.msra.mxu1 %v10079_v52 }
 0x599   :  { %6431 = vmatprep.subr.mxu1 %v9990_v26 }
 0x59c   :  { %6432 = vmatpush3.xpose.msra.mxu1 %v10080_v62 }
 0x59d   :  { %6433 = vmatprep.subr.mxu1 %v9990_v26 }
 0x5a0   :  { %6434 = vmatpush3.xpose.msra.mxu1 %v10081_v15 }
 0x5a1   :  { %6435 = vmatprep.subr.mxu1 %v9990_v26 }
 0x5a4   :  { %6436 = vmatpush3.xpose.msra.mxu1 %v10082_v56 }
 0x5a5   :  { %6437 = vmatprep.subr.mxu1 %v9990_v26 }
 0x5a8   :  { %6438 = vmatpush3.xpose.msra.mxu1 %v10083_v40 }
 0x5a9   :  { %6477 = vmatprep.subr.mxu1 %v9990_v26 }
 0x62b   :  { %v1945_v25 = vpop.f32.mrf.mxu1 }
 0x62c   :  { %v1949_v0 = vadd.f32 %v1945_v25, %v8198_v3 }
 0x62d   :  { %v6371_v27 = vpop.f32.mrf.mxu1 }
 0x62e   :  { %v1950_v42 = vrot.slane %v1949_v0, 4  ;;  %v2646_v27 = vld [vmem:[#allocation4 + $0x60] sm:$0xff] }
 0x630   :  { %v1951_v23 = vmax.f32 %v1949_v0, %v1950_v42  ;;  %v2698_v42 = vld [vmem:[#allocation4 + $0xe0] sm:$0xff] }
 0x632   :  { %v1952_v39 = vrot.slane %v1951_v23, 2 }
 0x634   :  { %v1953_v32 = vmax.f32 %v1951_v23, %v1952_v39 }
 0x636   :  { %v1954_v30 = vrot.slane %v1953_v32, 1 }
 0x638   :  { %v1955_v36 = vmax.f32 %v1953_v32, %v1954_v30 }
 0x63a   :  { %v1956_v6 = vsub.f32 %v1949_v0, %v1955_v36  ;;  %v2699_v0 = vld [vmem:[#allocation4 + $0xe8] sm:$0xff]  ;;  %v2805_v36 = vld [vmem:[#allocation4 + $0x1f8] sm:$0xff] }
 0x63c   :  { %v1957_v28 = vmul.f32 1.442695, %v1956_v6 }
 0x63e   :  { %7302 = vpow2.f32 %v1957_v28 }
 0x64b   :  { %v7303_v1 = vpop.eup %7302 }
 0x64c   :  { %v1959_v54 = vrot.slane %v7303_v1, 4 }
 0x64e   :  { %v1960_v45 = vadd.f32 %v7303_v1, %v1959_v54 }
 0x650   :  { %v1961_v7 = vrot.slane %v1960_v45, 2 }
 0x652   :  { %v1962_v4 = vadd.f32 %v1961_v7, %v1960_v45  ;;  %v2751_v7 = vld [vmem:[#allocation4 + $0x168] sm:$0xff] }
 0x654   :  { %v1963_v47 = vrot.slane %v1962_v4, 1 }
 0x656   :  { %v1964_v37 = vadd.f32 %v1963_v47, %v1962_v4  ;;  %v2750_v4 = vld [vmem:[#allocation4 + $0x160] sm:$0xff] }
 0x658   :  { %7304 = vrcp.f32 %v1964_v37 }
 0x665   :  { %v7305_v52 = vpop.eup %7304 }
 0x666   :  { %v1966_v3 = vmul.f32 %v7305_v52, %v7303_v1 }
 0x668   :  { %v8455_v62 = vand.u32 4294901760, %v1966_v3 }
 0x66a   :  { %v8458_v15 = vsub.f32 %v1966_v3, %v8455_v62  ;;  %6440 = vmatmul.mubr.f32.vlgmr.msra.gmra.mxu1 %v8455_v62 }
 0x66b   :  { %6478 = vmatpush3.xpose.msra.mxu1 %v7538_v48  ;;  %6509 = vmatprep.mubr.msk.f32.mxu1 %vm7402_vm0, %v9990_v26 }
 0x66c   :  { %6479 = vmatprep.subr.mxu1 %v9990_v26  ;;  %v2050_v56 = vand.u32 4294901760, %v8458_v15 }
 0x66e   :  { %v2051_v40 = vsub.f32 %v8458_v15, %v2050_v56 }
 0x66f   :  { %6480 = vmatpush3.xpose.msra.mxu1 %v7548_v61 }
 0x670   :  { %6481 = vmatprep.subr.mxu1 %v9990_v26  ;;  %v2052_v25 = vand.u32 4294901760, %v2051_v40 }
 0x672   :  { %6405 = vmatmul.mubr.f32.vlgmr.msra.gmra.mxu0 %v2052_v25 }
 0x673   :  { %6443 = vmatpush3.xpose.msra.mxu0 %v7552_v58  ;;  %6482 = vmatpush3.xpose.msra.mxu1 %v7569_v50  ;;  %v8525_v58 = vld [vmem:[#allocation2 + $0x8] sm:$0xff] }
 0x674   :  { %6444 = vmatprep.subr.mxu0 %v9990_v26  ;;  %6483 = vmatprep.subr.mxu1 %v9990_v26 }
 0x675   :  { %6474 = vmatprep.mubr.msk.f32.mxu0 %vm7402_vm0, %v9990_v26 }
 0x677   :  { %6445 = vmatpush3.xpose.msra.mxu0 %v7565_v24  ;;  %6484 = vmatpush3.xpose.msra.mxu1 %v7583_v35  ;;  %v10084_v24 = vld [vmem:[#allocation9_spill] sm:$0xff] }
 0x678   :  { %6446 = vmatprep.subr.mxu0 %v9990_v26  ;;  %6485 = vmatprep.subr.mxu1 %v9990_v26  ;;  %v10088_v32 = vsub.s32 3, %v10084_v24  ;;  %v10089_v52 = vsub.s32 4, %v10084_v24 }
 0x67a   :  { %v8562_v30 = vrot.slane %v8525_v58, %v10088_v32  ;;  %v8579_v3 = vrot.slane %v8525_v58, %v10089_v52  ;;  %v2855_v32 = vld [vmem:[#allocation4 + $0x268] sm:$0xff] }
 0x67b   :  { %6447 = vmatpush3.xpose.msra.mxu0 %v7587_v31  ;;  %6486 = vmatpush3.xpose.msra.mxu1 %v7613_v16  ;;  %v10085_v31 = vsub.s32 0, %v10084_v24 }
 0x67c   :  { %6448 = vmatprep.subr.mxu0 %v9990_v26  ;;  %6487 = vmatprep.subr.mxu1 %v9990_v26  ;;  %v2825_v37 = vmul.f32 %v8562_v30, %v2805_v36  ;;  %v2854_v36 = vld [vmem:[#allocation4 + $0x260] sm:$0xff] }
 0x67f   :  { %6449 = vmatpush3.xpose.msra.mxu0 %v7602_v51  ;;  %6488 = vmatpush3.xpose.msra.mxu1 %v7643_v41  ;;  %v8532_v51 = vrot.slane %v8525_v58, %v10085_v31 }
 0x680   :  { %6450 = vmatprep.subr.mxu0 %v9990_v26  ;;  %6489 = vmatprep.subr.mxu1 %v9990_v26 }
 0x681   :  { %v2666_v54 = vmul.f32 %v8532_v51, %v2646_v27  ;;  %v2856_v27 = vld [vmem:[#allocation4 + $0x270] sm:$0xff] }
 0x683   :  { %6451 = vmatpush3.xpose.msra.mxu0 %v7626_v43  ;;  %6490 = vmatpush3.xpose.msra.mxu1 %v7683_v11  ;;  %v10086_v43 = vsub.s32 1, %v10084_v24 }
 0x684   :  { %6452 = vmatprep.subr.mxu0 %v9990_v26  ;;  %6491 = vmatprep.subr.mxu1 %v9990_v26 }
 0x687   :  { %6453 = vmatpush3.xpose.msra.mxu0 %v7657_v44  ;;  %6492 = vmatpush3.xpose.msra.mxu1 %v7717_v8  ;;  %v8537_v44 = vrot.slane %v8525_v58, %v10086_v43 }
 0x688   :  { %6454 = vmatprep.subr.mxu0 %v9990_v26  ;;  %6493 = vmatprep.subr.mxu1 %v9990_v26 }
 0x689   :  { %v2719_v1 = vmul.f32 %v8537_v44, %v2699_v0  ;;  %v2718_v45 = vmul.f32 %v8537_v44, %v2698_v42 }
 0x68b   :  { %6455 = vmatpush3.xpose.msra.mxu0 %v7696_v10  ;;  %6494 = vmatpush3.xpose.msra.mxu1 %v7738_v46  ;;  %v2649_v10 = vld [vmem:[#allocation4 + $0x78] sm:$0xff]  ;;  %v2734_v31 = vadd.f32 %v2718_v45, %v2666_v54 }
 0x68c   :  { %6456 = vmatprep.subr.mxu0 %v9990_v26  ;;  %6495 = vmatprep.subr.mxu1 %v9990_v26  ;;  %v2749_v45 = vld [vmem:[#allocation4 + $0x158] sm:$0xff] }
 0x68f   :  { %6457 = vmatpush3.xpose.msra.mxu0 %v7730_v2  ;;  %6496 = vmatpush3.xpose.msra.mxu1 %v7767_v34  ;;  %v2701_v2 = vld [vmem:[#allocation4 + $0xf8] sm:$0xff] }
 0x690   :  { %6458 = vmatprep.subr.mxu0 %v9990_v26  ;;  %6497 = vmatprep.subr.mxu1 %v9990_v26 }
 0x693   :  { %6459 = vmatpush3.xpose.msra.mxu0 %v7753_v55  ;;  %6498 = vmatpush3.xpose.msra.mxu1 %v7793_v53  ;;  %v2669_v55 = vmul.f32 %v8532_v51, %v2649_v10  ;;  %v2803_v10 = vld [vmem:[#allocation4 + $0x1e8] sm:$0xff] }
 0x694   :  { %6460 = vmatprep.subr.mxu0 %v9990_v26  ;;  %6499 = vmatprep.subr.mxu1 %v9990_v26  ;;  %v2823_v42 = vmul.f32 %v8562_v30, %v2803_v10 }
 0x697   :  { %6461 = vmatpush3.xpose.msra.mxu0 %v7780_v63  ;;  %6500 = vmatpush3.xpose.msra.mxu1 %v7822_v38  ;;  %v2721_v63 = vmul.f32 %v8537_v44, %v2701_v2  ;;  %v2802_v2 = vld [vmem:[#allocation4 + $0x1e0] sm:$0xff] }
 0x698   :  { %6462 = vmatprep.subr.mxu0 %v9990_v26  ;;  %6501 = vmatprep.subr.mxu1 %v9990_v26 }
 0x699   :  { %v2737_v23 = vadd.f32 %v2721_v63, %v2669_v55 }
 0x69b   :  { %6463 = vmatpush3.xpose.msra.mxu0 %v7807_v5  ;;  %6502 = vmatpush3.xpose.msra.mxu1 %v7853_v9  ;;  %v10087_v5 = vsub.s32 2, %v10084_v24 }
 0x69c   :  { %6464 = vmatprep.subr.mxu0 %v9990_v26  ;;  %6503 = vmatprep.subr.mxu1 %v9990_v26 }
 0x69f   :  { %6465 = vmatpush3.xpose.msra.mxu0 %v7834_v20  ;;  %6504 = vmatpush3.xpose.msra.mxu1 %v7878_v13  ;;  %v8550_v20 = vrot.slane %v8525_v58, %v10087_v5  ;;  %v10090_v5 = vsub.s32 5, %v10084_v24 }
 0x6a0   :  { %6466 = vmatprep.subr.mxu0 %v9990_v26  ;;  %6505 = vmatprep.subr.mxu1 %v9990_v26 }
 0x6a1   :  { %v2771_v25 = vmul.f32 %v8550_v20, %v2751_v7  ;;  %v2770_v43 = vmul.f32 %v8550_v20, %v2750_v4  ;;  %v2644_v7 = vld [vmem:[#allocation4 + $0x50] sm:$0xff] }
 0x6a2   :  { %v2696_v4 = vld [vmem:[#allocation4 + $0xd0] sm:$0xff] }
 0x6a3   :  { %6467 = vmatpush3.xpose.msra.mxu0 %v7866_v29  ;;  %6506 = vmatpush3.xpose.msra.mxu1 %v7900_v60  ;;  %v2753_v29 = vld [vmem:[#allocation4 + $0x178] sm:$0xff]  ;;  %v2716_v10 = vmul.f32 %v8537_v44, %v2696_v4  ;;  %v2695_v4 = vld [vmem:[#allocation4 + $0xc8] sm:$0xff] }
 0x6a4   :  { %6468 = vmatprep.subr.mxu0 %v9990_v26  ;;  %6507 = vmatprep.subr.mxu1 %v9990_v26  ;;  %v2773_v39 = vmul.f32 %v8550_v20, %v2753_v29  ;;  %v8594_v29 = vrot.slane %v8525_v58, %v10090_v5  ;;  %v2748_v5 = vld [vmem:[#allocation4 + $0x150] sm:$0xff] }
 0x6a6   :  { %v2789_v47 = vadd.f32 %v2773_v39, %v2737_v23  ;;  %v2786_v23 = vadd.f32 %v2770_v43, %v2734_v31  ;;  %v2822_v39 = vmul.f32 %v8562_v30, %v2802_v2  ;;  %v2769_v31 = vmul.f32 %v8550_v20, %v2749_v45 }
 0x6a7   :  { %6469 = vmatpush3.xpose.msra.mxu0 %v7888_v14  ;;  %6508 = vmatpush3.xpose.msra.mxu1 %v7920_v49  ;;  %v2648_v14 = vld [vmem:[#allocation4 + $0x70] sm:$0xff]  ;;  %v2664_v43 = vmul.f32 %v8532_v51, %v2644_v7  ;;  %v2643_v7 = vld [vmem:[#allocation4 + $0x48] sm:$0xff] }
 0x6a8   :  { %6470 = vmatprep.subr.mxu0 %v9990_v26  ;;  %6547 = vmatprep.subr.mxu1 %v9990_v26  ;;  %v2668_v6 = vmul.f32 %v8532_v51, %v2648_v14  ;;  %v2841_v55 = vadd.f32 %v2825_v37, %v2789_v47  ;;  %v2645_v14 = vld [vmem:[#allocation4 + $0x58] sm:$0xff] }
 0x6a9   :  { %v2961_v47 = vld [vmem:[#allocation4 + $0x378] sm:$0xff] }
 0x6aa   :  { %6510 = vmatmul.mubr.f32.vlgmr.msra.gmra.mxu1 %v2050_v56  ;;  %v2857_v56 = vld [vmem:[#allocation4 + $0x278] sm:$0xff] }
 0x6ab   :  { %6471 = vmatpush3.xpose.msra.mxu0 %v7909_v17  ;;  %6548 = vmatpush3.xpose.msra.mxu1 %v7538_v48  ;;  %v2700_v17 = vld [vmem:[#allocation4 + $0xf0] sm:$0xff]  ;;  %v2647_v48 = vld [vmem:[#allocation4 + $0x68] sm:$0xff]  ;;  %v2877_v63 = vmul.f32 %v8579_v3, %v2857_v56  ;;  %v2875_v56 = vmul.f32 %v8579_v3, %v2855_v32 }
 0x6ac   :  { %6472 = vmatprep.subr.mxu0 %v9990_v26  ;;  %6549 = vmatprep.subr.mxu1 %v9990_v26  ;;  %v2720_v28 = vmul.f32 %v8537_v44, %v2700_v17  ;;  %v2697_v17 = vld [vmem:[#allocation4 + $0xd8] sm:$0xff] }
 0x6ad   :  { %6579 = vmatprep.mubr.msk.f32.mxu1 %vm7402_vm0, %v9990_v26 }
 0x6af   :  { %6473 = vmatpush3.xpose.msra.mxu0 %v7929_v19  ;;  %6550 = vmatpush3.xpose.msra.mxu1 %v7548_v61  ;;  %v2752_v19 = vld [vmem:[#allocation4 + $0x170] sm:$0xff]  ;;  %v2667_v61 = vmul.f32 %v8532_v51, %v2647_v48  ;;  %v2909_v48 = vld [vmem:[#allocation4 + $0x2f8] sm:$0xff] }
 0x6b0   :  { %6512 = vmatprep.subr.mxu0 %v9990_v26  ;;  %6551 = vmatprep.subr.mxu1 %v9990_v26  ;;  %v2772_v40 = vmul.f32 %v8550_v20, %v2752_v19  ;;  %v2893_v19 = vadd.f32 %v2877_v63, %v2841_v55  ;;  %v2801_v63 = vld [vmem:[#allocation4 + $0x1d8] sm:$0xff] }
 0x6b2   :  { %6475 = vmatmul.mubr.f32.vlgmr.msra.gmra.mxu0 %v8458_v15  ;;  %v2736_v15 = vadd.f32 %v2720_v28, %v2668_v6  ;;  %v2665_v6 = vmul.f32 %v8532_v51, %v2645_v14  ;;  %v2717_v28 = vmul.f32 %v8537_v44, %v2697_v17  ;;  %v10092_v14 = vsub.s32 7, %v10084_v24 }
 0x6b3   :  { %6513 = vmatpush3.xpose.msra.mxu0 %v7561_v22  ;;  %6552 = vmatpush3.xpose.msra.mxu1 %v7569_v50  ;;  %v2804_v22 = vld [vmem:[#allocation4 + $0x1f0] sm:$0xff]  ;;  %v2735_v50 = vadd.f32 %v2719_v1, %v2667_v61  ;;  %v2929_v61 = vmul.f32 %v8594_v29, %v2909_v48  ;;  %v10091_v1 = vsub.s32 6, %v10084_v24  ;;  %v2732_v24 = vadd.f32 %v2716_v10, %v2664_v43 }
 0x6b4   :  { %6514 = vmatprep.subr.mxu0 %v9990_v26  ;;  %6553 = vmatprep.subr.mxu1 %v9990_v26  ;;  %v2788_v0 = vadd.f32 %v2772_v40, %v2736_v15  ;;  %v2838_v15 = vadd.f32 %v2822_v39, %v2786_v23  ;;  %v2874_v40 = vmul.f32 %v8579_v3, %v2854_v36  ;;  %v2959_v23 = vld [vmem:[#allocation4 + $0x368] sm:$0xff]  ;;  %v2958_v39 = vld [vmem:[#allocation4 + $0x360] sm:$0xff] }
 0x6b5   :  { %6544 = vmatprep.mubr.msk.f32.mxu0 %vm7402_vm0, %v9990_v26  ;;  %v8609_v54 = vrot.slane %v8525_v58, %v10091_v1  ;;  %v2945_v2 = vadd.f32 %v2929_v61, %v2893_v19  ;;  %v8627_v17 = vrot.slane %v8525_v58, %v10092_v14  ;;  %v2821_v36 = vmul.f32 %v8562_v30, %v2801_v63  ;;  %v2800_v19 = vld [vmem:[#allocation4 + $0x1d0] sm:$0xff]  ;;  %v2747_v63 = vld [vmem:[#allocation4 + $0x148] sm:$0xff] }
 0x6b6   :  { %v2768_v58 = vmul.f32 %v8550_v20, %v2748_v5  ;;  %v2715_v43 = vmul.f32 %v8537_v44, %v2695_v4  ;;  %v10098_v4 = vld [vmem:[#allocation28_spill] sm:$0xff] }
 0x6b7   :  { %6515 = vmatpush3.xpose.msra.mxu0 %v7578_v12  ;;  %6554 = vmatpush3.xpose.msra.mxu1 %v7583_v35  ;;  %v2824_v12 = vmul.f32 %v8562_v30, %v2804_v22  ;;  %v2787_v35 = vadd.f32 %v2771_v25, %v2735_v50  ;;  %v2907_v22 = vld [vmem:[#allocation4 + $0x2e8] sm:$0xff]  ;;  %v2906_v50 = vld [vmem:[#allocation4 + $0x2e0] sm:$0xff]  ;;  %v2733_v25 = vadd.f32 %v2717_v28, %v2665_v6  ;;  %v2853_v28 = vld [vmem:[#allocation4 + $0x258] sm:$0xff] }
 0x6b8   :  { %6516 = vmatprep.subr.mxu0 %v9990_v26  ;;  %6555 = vmatprep.subr.mxu1 %v9990_v26  ;;  %v2981_v55 = vmul.f32 %v8609_v54, %v2961_v47  ;;  %v3012_v47 = vld [vmem:[#allocation4 + $0x3f0] sm:$0xff] }
 0x6b9   :  { %v2840_v37 = vadd.f32 %v2824_v12, %v2788_v0  ;;  %v2839_v52 = vadd.f32 %v2823_v42, %v2787_v35  ;;  %v2960_v12 = vld [vmem:[#allocation4 + $0x370] sm:$0xff]  ;;  %v2890_v35 = vadd.f32 %v2874_v40, %v2838_v15  ;;  %v2926_v42 = vmul.f32 %v8594_v29, %v2906_v50  ;;  %v2905_v50 = vld [vmem:[#allocation4 + $0x2d8] sm:$0xff] }
 0x6ba   :  { %v2785_v32 = vadd.f32 %v2769_v31, %v2733_v25  ;;  %v2997_v6 = vadd.f32 %v2981_v55, %v2945_v2  ;;  %v2980_v45 = vmul.f32 %v8609_v54, %v2960_v12  ;;  %v2873_v15 = vmul.f32 %v8579_v3, %v2853_v28  ;;  %v2852_v25 = vld [vmem:[#allocation4 + $0x250] sm:$0xff] }
 0x6bb   :  { %6517 = vmatpush3.xpose.msra.mxu0 %v7598_v57  ;;  %6556 = vmatpush3.xpose.msra.mxu1 %v7613_v16  ;;  %v2876_v57 = vmul.f32 %v8579_v3, %v2856_v27  ;;  %v2908_v16 = vld [vmem:[#allocation4 + $0x2f0] sm:$0xff]  ;;  %v2927_v27 = vmul.f32 %v8594_v29, %v2907_v22  ;;  %v2784_v40 = vadd.f32 %v2768_v58, %v2732_v24  ;;  %v2694_v24 = vld [vmem:[#allocation4 + $0xc0] sm:$0xff] }
 0x6bc   :  { %6518 = vmatprep.subr.mxu0 %v9990_v26  ;;  %6557 = vmatprep.subr.mxu1 %v9990_v26  ;;  %v2928_v0 = vmul.f32 %v8594_v29, %v2908_v16  ;;  %v3011_v16 = vld [vmem:[#allocation4 + $0x3e8] sm:$0xff]  ;;  %v2820_v22 = vmul.f32 %v8562_v30, %v2800_v19  ;;  %v2663_v31 = vmul.f32 %v8532_v51, %v2643_v7 }
 0x6bd   :  { %v2892_v48 = vadd.f32 %v2876_v57, %v2840_v37  ;;  %v2942_v57 = vadd.f32 %v2926_v42, %v2890_v35  ;;  %v3032_v55 = vmul.f32 %v8627_v17, %v3012_v47  ;;  %v2904_v35 = vld [vmem:[#allocation4 + $0x2d0] sm:$0xff] }
 0x6be   :  { %v2836_v12 = vadd.f32 %v2820_v22, %v2784_v40  ;;  %v2731_v42 = vadd.f32 %v2715_v43, %v2663_v31  ;;  %v2956_v47 = vld [vmem:[#allocation4 + $0x350] sm:$0xff]  ;;  %v2641_v22 = vld [vmem:[#allocation4 + $0x38] sm:$0xff] }
 0x6bf   :  { %6519 = vmatpush3.xpose.msra.mxu0 %v7618_v18  ;;  %6558 = vmatpush3.xpose.msra.mxu1 %v7643_v41  ;;  %v3013_v18 = vld [vmem:[#allocation4 + $0x3f8] sm:$0xff]  ;;  %v2891_v41 = vadd.f32 %v2875_v56, %v2839_v52  ;;  %v2944_v1 = vadd.f32 %v2928_v0, %v2892_v48  ;;  %v3010_v52 = vld [vmem:[#allocation4 + $0x3e0] sm:$0xff]  ;;  %v2837_v56 = vadd.f32 %v2821_v36, %v2785_v32 }
 0x6c0   :  { %6520 = vmatprep.subr.mxu0 %v9990_v26  ;;  %6559 = vmatprep.subr.mxu1 %v9990_v26  ;;  %v3033_v61 = vmul.f32 %v8627_v17, %v3013_v18  ;;  %v3030_v14 = vmul.f32 %v8627_v17, %v3010_v52  ;;  %v2925_v0 = vmul.f32 %v8594_v29, %v2905_v50  ;;  %v2957_v18 = vld [vmem:[#allocation4 + $0x358] sm:$0xff]  ;;  %v2642_v36 = vld [vmem:[#allocation4 + $0x40] sm:$0xff] }
 0x6c1   :  { %v2943_v37 = vadd.f32 %v2927_v27, %v2891_v41  ;;  %v2996_v2 = vadd.f32 %v2980_v45, %v2944_v1  ;;  %v2889_v48 = vadd.f32 %v2873_v15, %v2837_v56  ;;  %v2872_v41 = vmul.f32 %v8579_v3, %v2852_v25  ;;  %v10094_v27 = vld [vmem:[#allocation24_spill] sm:$0xff]  ;;  %v2693_v50 = vld [vmem:[#allocation4 + $0xb8] sm:$0xff] }
 0x6c2   :  { %v8650_v10 = vadd.f32 %v3033_v61, %v2997_v6  ;;  %v3009_v61 = vld [vmem:[#allocation4 + $0x3d8] sm:$0xff]  ;;  %v2924_v45 = vmul.f32 %v8594_v29, %v2904_v35  ;;  %v2746_v52 = vld [vmem:[#allocation4 + $0x140] sm:$0xff]  ;;  %v2976_v43 = vmul.f32 %v8609_v54, %v2956_v47 }
 0x6c3   :  { %6521 = vmatpush3.xpose.msra.mxu0 %v7638_v59  ;;  %6560 = vmatpush3.xpose.msra.mxu1 %v7683_v11  ;;  %v2979_v59 = vmul.f32 %v8609_v54, %v2959_v23  ;;  %v2978_v11 = vmul.f32 %v8609_v54, %v2958_v39  ;;  %v2767_v23 = vmul.f32 %v8550_v20, %v2747_v63  ;;  %v2799_v39 = vld [vmem:[#allocation4 + $0x1c8] sm:$0xff]  ;;  %v10099_v63 = vld [vmem:[#allocation31_spill] sm:$0xff] }
 0x6c4   :  { %6522 = vmatprep.subr.mxu0 %v9990_v26  ;;  %6561 = vmatprep.subr.mxu1 %v9990_v26  ;;  %10093 = vst [vmem:[#allocation14_spill] sm:$0xff] %v8650_v10  ;;  %v8663_v32 = vand.u32 4294901760, %v8650_v10  ;;  %v8665_v58 = vadd.f32 %v3032_v55, %v2996_v2  ;;  %v2941_v19 = vadd.f32 %v2925_v0, %v2889_v48  ;;  %v3008_v2 = vld [vmem:[#allocation4 + $0x3d0] sm:$0xff]  ;;  %v2798_v48 = vld [vmem:[#allocation4 + $0x1c0] sm:$0xff] }
 0x6c5   :  { %v2995_v5 = vadd.f32 %v2979_v59, %v2943_v37  ;;  %v2888_v1 = vadd.f32 %v2872_v41, %v2836_v12  ;;  %v2819_v7 = vmul.f32 %v8562_v30, %v2799_v39  ;;  %v2783_v37 = vadd.f32 %v2767_v23, %v2731_v42  ;;  %v2851_v59 = vld [vmem:[#allocation4 + $0x248] sm:$0xff]  ;;  %v2745_v41 = vld [vmem:[#allocation4 + $0x138] sm:$0xff]  ;;  %v2640_v23 = vld [vmem:[#allocation4 + $0x30] sm:$0xff] }
 0x6c6   :  { %10095 = vst [vmem:[#allocation16_spill] sm:$0xff] %v8665_v58  ;;  %v8685_v56 = vand.u32 4294901760, %v8665_v58  ;;  %v3029_v40 = vmul.f32 %v8627_v17, %v3009_v61  ;;  %v2871_v55 = vmul.f32 %v8579_v3, %v2851_v59  ;;  %v2713_v12 = vmul.f32 %v8537_v44, %v2693_v50  ;;  %v2692_v39 = vld [vmem:[#allocation4 + $0xb0] sm:$0xff]  ;;  %v2797_v59 = vld [vmem:[#allocation4 + $0x1b8] sm:$0xff] }
 0x6c7   :  { %6523 = vmatpush3.xpose.msra.mxu0 %v10015_v21  ;;  %6562 = vmatpush3.xpose.msra.mxu1 %v7717_v8  ;;  %v3031_v21 = vmul.f32 %v8627_v17, %v3011_v16  ;;  %v2994_v8 = vadd.f32 %v2978_v11, %v2942_v57  ;;  %v2662_v57 = vmul.f32 %v8532_v51, %v2642_v36  ;;  %v10102_v61 = vld [vmem:[#allocation34_spill] sm:$0xff] }
 0x6c8   :  { %6524 = vmatprep.subr.mxu0 %v9990_v26  ;;  %6563 = vmatprep.subr.mxu1 %v9990_v26  ;;  %v2714_v11 = vmul.f32 %v8537_v44, %v2694_v24  ;;  %v8682_v16 = vsub.f32 %v8650_v10, %v8663_v32  ;;  %v2940_v31 = vadd.f32 %v2924_v45, %v2888_v1  ;;  %v2955_v45 = vld [vmem:[#allocation4 + $0x348] sm:$0xff]  ;;  %v2744_v50 = vld [vmem:[#allocation4 + $0x130] sm:$0xff] }
 0x6c9   :  { %v8667_v6 = vadd.f32 %v3031_v21, %v2995_v5  ;;  %v8669_v28 = vadd.f32 %v3030_v14, %v2994_v8  ;;  %v2835_v5 = vadd.f32 %v2819_v7, %v2783_v37  ;;  %v2903_v21 = vld [vmem:[#allocation4 + $0x2c8] sm:$0xff]  ;;  %v2766_v14 = vmul.f32 %v8550_v20, %v2746_v52 }
 0x6ca   :  { %v2730_v8 = vadd.f32 %v2714_v11, %v2662_v57  ;;  %v8702_v0 = vand.u32 4294901760, %v8682_v16  ;;  %v3028_v42 = vmul.f32 %v8627_v17, %v3008_v2  ;;  %v2992_v24 = vadd.f32 %v2976_v43, %v2940_v31 }
 0x6cb   :  { %6525 = vmatpush3.xpose.msra.mxu0 %v10094_v27  ;;  %6564 = vmatpush3.xpose.msra.mxu1 %v7738_v46  ;;  %10096 = vst [vmem:[#allocation17_spill] sm:$0xff] %v8667_v6  ;;  %10097 = vst [vmem:[#allocation10_spill] sm:$0xff] %v8669_v28  ;;  %v2977_v46 = vmul.f32 %v8609_v54, %v2957_v18  ;;  %v8691_v15 = vand.u32 4294901760, %v8669_v28  ;;  %v2661_v18 = vmul.f32 %v8532_v51, %v2641_v22 }
 0x6cc   :  { %6526 = vmatprep.subr.mxu0 %v9990_v26  ;;  %6565 = vmatprep.subr.mxu1 %v9990_v26  ;;  %10100 = vst [vmem:[#allocation11_spill] sm:$0xff] %v8702_v0  ;;  %v2887_v1 = vadd.f32 %v2871_v55, %v2835_v5  ;;  %v2782_v7 = vadd.f32 %v2766_v14, %v2730_v8  ;;  %v2639_v55 = vld [vmem:[#allocation4 + $0x28] sm:$0xff] }
 0x6cd   :  { %v2993_v25 = vadd.f32 %v2977_v46, %v2941_v19  ;;  %v8716_v35 = vsub.f32 %v8669_v28, %v8691_v15  ;;  %v2923_v46 = vmul.f32 %v8594_v29, %v2903_v21  ;;  %v2818_v19 = vmul.f32 %v8562_v30, %v2798_v48  ;;  %v10107_v5 = vld [vmem:[#allocation37_spill] sm:$0xff]  ;;  %v2902_v48 = vld [vmem:[#allocation4 + $0x2c0] sm:$0xff] }
 0x6ce   :  { %v2765_v47 = vmul.f32 %v8550_v20, %v2745_v41  ;;  %v2729_v37 = vadd.f32 %v2713_v12, %v2661_v18  ;;  %v2660_v57 = vmul.f32 %v8532_v51, %v2640_v23  ;;  %v2712_v11 = vmul.f32 %v8537_v44, %v2692_v39  ;;  %v3007_v8 = vld [vmem:[#allocation4 + $0x3c8] sm:$0xff]  ;;  %v2849_v41 = vld [vmem:[#allocation4 + $0x238] sm:$0xff] }
 0x6cf   :  { %6527 = vmatpush3.xpose.msra.mxu0 %v10098_v4  ;;  %6566 = vmatpush3.xpose.msra.mxu1 %v7767_v34  ;;  %v8688_v34 = vand.u32 4294901760, %v8667_v6  ;;  %v8719_v36 = vadd.f32 %v3029_v40, %v2993_v25  ;;  %v2850_v4 = vld [vmem:[#allocation4 + $0x240] sm:$0xff]  ;;  %v3140_v52 = vsub.f32 %v8682_v16, %v8702_v0  ;;  %v8739_v22 = vand.u32 4294901760, %v8716_v35 }
 0x6d0   :  { %6528 = vmatprep.subr.mxu0 %v9990_v26  ;;  %6567 = vmatprep.subr.mxu1 %v9990_v26  ;;  %v8744_v31 = vadd.f32 %v3028_v42, %v2992_v24  ;;  %v2975_v43 = vmul.f32 %v8609_v54, %v2955_v45  ;;  %v2870_v2 = vmul.f32 %v8579_v3, %v2850_v4  ;;  %v2796_v24 = vld [vmem:[#allocation4 + $0x1b0] sm:$0xff]  ;;  %v2743_v4 = vld [vmem:[#allocation4 + $0x128] sm:$0xff] }
 0x6d1   :  { %v8712_v27 = vsub.f32 %v8667_v6, %v8688_v34  ;;  %10101 = vst [vmem:[#allocation12_spill] sm:$0xff] %v8719_v36  ;;  %10105 = vst [vmem:[#allocation18_spill] sm:$0xff] %v8739_v22  ;;  %v8742_v25 = vand.u32 4294901760, %v8719_v36  ;;  %v2939_v21 = vadd.f32 %v2923_v46, %v2887_v1  ;;  %v2834_v14 = vadd.f32 %v2818_v19, %v2782_v7  ;;  %v2847_v6 = vld [vmem:[#allocation4 + $0x228] sm:$0xff] }
 0x6d2   :  { %10106 = vst [vmem:[#allocation21_spill] sm:$0xff] %v8744_v31  ;;  %v2817_v18 = vmul.f32 %v8562_v30, %v2797_v59  ;;  %v2781_v12 = vadd.f32 %v2765_v47, %v2729_v37  ;;  %v2728_v42 = vadd.f32 %v2712_v11, %v2660_v57  ;;  %v2764_v23 = vmul.f32 %v8550_v20, %v2744_v50  ;;  %v2638_v47 = vld [vmem:[#allocation4 + $0x20] sm:$0xff] }
 0x6d3   :  { %6529 = vmatpush3.xpose.msra.mxu0 %v10099_v63  ;;  %6568 = vmatpush3.xpose.msra.mxu1 %v7793_v53  ;;  %v8708_v53 = vsub.f32 %v8665_v58, %v8685_v56  ;;  %v8736_v40 = vand.u32 4294901760, %v8712_v27  ;;  %v2691_v63 = vld [vmem:[#allocation4 + $0xa8] sm:$0xff]  ;;  %v2659_v46 = vmul.f32 %v8532_v51, %v2639_v55  ;;  %v8764_v1 = vsub.f32 %v8719_v36, %v8742_v25  ;;  %v2690_v37 = vld [vmem:[#allocation4 + $0xa0] sm:$0xff] }
 0x6d4   :  { %6530 = vmatprep.subr.mxu0 %v9990_v26  ;;  %6569 = vmatprep.subr.mxu1 %v9990_v26  ;;  %v2711_v19 = vmul.f32 %v8537_v44, %v2691_v63  ;;  %v3027_v45 = vmul.f32 %v8627_v17, %v3007_v8  ;;  %v2922_v7 = vmul.f32 %v8594_v29, %v2902_v48  ;;  %v10108_v59 = vld [vmem:[#allocation40_spill] sm:$0xff]  ;;  %v8771_v57 = vand.u32 4294901760, %v8744_v31 }
 0x6d5   :  { %10104 = vst [vmem:[#allocation15_spill] sm:$0xff] %v8736_v40  ;;  %v2991_v11 = vadd.f32 %v2975_v43, %v2939_v21  ;;  %v2886_v50 = vadd.f32 %v2870_v2, %v2834_v14  ;;  %v2954_v55 = vld [vmem:[#allocation4 + $0x340] sm:$0xff]  ;;  %v2833_v8 = vadd.f32 %v2817_v18, %v2781_v12  ;;  %v2780_v48 = vadd.f32 %v2764_v23, %v2728_v42  ;;  %v2795_v12 = vld [vmem:[#allocation4 + $0x1a8] sm:$0xff]  ;;  %v10110_v23 = vld [vmem:[#allocation43_spill] sm:$0xff] }
 0x6d6   :  { %v3006_v63 = vld [vmem:[#allocation4 + $0x3c0] sm:$0xff]  ;;  %v2763_v39 = vmul.f32 %v8550_v20, %v2743_v4  ;;  %v2658_v43 = vmul.f32 %v8532_v51, %v2638_v47  ;;  %v2710_v2 = vmul.f32 %v8537_v44, %v2690_v37  ;;  %v8781_v21 = vand.u32 4294901760, %v8764_v1  ;;  %v2953_v4 = vld [vmem:[#allocation4 + $0x338] sm:$0xff] }
 0x6d7   :  { %6531 = vmatpush3.xpose.msra.mxu0 %v10102_v61  ;;  %6570 = vmatpush3.xpose.msra.mxu1 %v7822_v38  ;;  %v8733_v38 = vand.u32 4294901760, %v8708_v53  ;;  %v2901_v61 = vld [vmem:[#allocation4 + $0x2b8] sm:$0xff]  ;;  %v2974_v14 = vmul.f32 %v8609_v54, %v2954_v55  ;;  %v2742_v42 = vld [vmem:[#allocation4 + $0x120] sm:$0xff]  ;;  %v2973_v28 = vmul.f32 %v8609_v54, %v2953_v4 }
 0x6d8   :  { %6532 = vmatprep.subr.mxu0 %v9990_v26  ;;  %6571 = vmatprep.subr.mxu1 %v9990_v26  ;;  %10109 = vst [vmem:[#allocation25_spill] sm:$0xff] %v8781_v21  ;;  %v2921_v18 = vmul.f32 %v8594_v29, %v2901_v61  ;;  %v2637_v47 = vld [vmem:[#allocation4 + $0x18] sm:$0xff]  ;;  %v8799_v61 = vand.u32 4294901760, %v3140_v52  ;;  %v2794_v52 = vld [vmem:[#allocation4 + $0x1a0] sm:$0xff] }
 0x6d9   :  { %10103 = vst [vmem:[#allocation13_spill] sm:$0xff] %v8733_v38  ;;  %v2689_v37 = vld [vmem:[#allocation4 + $0x98] sm:$0xff] }
 0x6da   :  { %10112 = vst [vmem:[#allocation29_spill] sm:$0xff] %v8799_v61  ;;  %v3005_v55 = vld [vmem:[#allocation4 + $0x3b8] sm:$0xff] }
 0x6db   :  { %6533 = vmatpush3.xpose.msra.mxu0 %v10107_v5  ;;  %6572 = vmatpush3.xpose.msra.mxu1 %v7853_v9  ;;  %v2869_v5 = vmul.f32 %v8579_v3, %v2849_v41  ;;  %v2848_v9 = vld [vmem:[#allocation4 + $0x230] sm:$0xff]  ;;  %v3026_v41 = vmul.f32 %v8627_v17, %v3006_v63 }
 0x6dc   :  { %6534 = vmatprep.subr.mxu0 %v9990_v26  ;;  %6573 = vmatprep.subr.mxu1 %v9990_v26 }
 0x6df   :  { %6535 = vmatpush3.xpose.msra.mxu0 %v10108_v59  ;;  %6574 = vmatpush3.xpose.msra.mxu1 %v7878_v13  ;;  %v2816_v59 = vmul.f32 %v8562_v30, %v2796_v24  ;;  %v2727_v13 = vadd.f32 %v2711_v19, %v2659_v46  ;;  %v8790_v24 = vsub.f32 %v8744_v31, %v8771_v57 }
 0x6e0   :  { %6536 = vmatprep.subr.mxu0 %v9990_v26  ;;  %6575 = vmatprep.subr.mxu1 %v9990_v26  ;;  %v8792_v46 = vadd.f32 %v3027_v45, %v2991_v11  ;;  %v2938_v19 = vadd.f32 %v2922_v7, %v2886_v50  ;;  %v2900_v45 = vld [vmem:[#allocation4 + $0x2b0] sm:$0xff]  ;;  %v2815_v7 = vmul.f32 %v8562_v30, %v2795_v12 }
 0x6e1   :  { %v2832_v63 = vadd.f32 %v2816_v59, %v2780_v48  ;;  %v2779_v11 = vadd.f32 %v2763_v39, %v2727_v13  ;;  %v2726_v50 = vadd.f32 %v2710_v2, %v2658_v43  ;;  %v2762_v31 = vmul.f32 %v8550_v20, %v2742_v42  ;;  %v10113_v48 = vld [vmem:[#allocation46_spill] sm:$0xff]  ;;  %v2741_v43 = vld [vmem:[#allocation4 + $0x118] sm:$0xff] }
 0x6e2   :  { %10111 = vst [vmem:[#allocation27_spill] sm:$0xff] %v8792_v46  ;;  %v8812_v39 = vand.u32 4294901760, %v8790_v24  ;;  %v2990_v59 = vadd.f32 %v2974_v14, %v2938_v19  ;;  %v3025_v13 = vmul.f32 %v8627_v17, %v3005_v55  ;;  %v2636_v2 = vld [vmem:[#allocation4 + $0x10] sm:$0xff]  ;;  %v2814_v14 = vmul.f32 %v8562_v30, %v2794_v52  ;;  %v2899_v19 = vld [vmem:[#allocation4 + $0x2a8] sm:$0xff]  ;;  %v2846_v55 = vld [vmem:[#allocation4 + $0x220] sm:$0xff] }
 0x6e3   :  { %6537 = vmatpush3.xpose.msra.mxu0 %v10110_v23  ;;  %6576 = vmatpush3.xpose.msra.mxu1 %v7900_v60  ;;  %v2885_v60 = vadd.f32 %v2869_v5, %v2833_v8  ;;  %v2868_v23 = vmul.f32 %v8579_v3, %v2848_v9  ;;  %v2657_v5 = vmul.f32 %v8532_v51, %v2637_v47  ;;  %v8815_v9 = vand.u32 4294901760, %v8792_v46  ;;  %v2688_v12 = vld [vmem:[#allocation4 + $0x90] sm:$0xff] }
 0x6e4   :  { %6538 = vmatprep.subr.mxu0 %v9990_v26  ;;  %6577 = vmatprep.subr.mxu1 %v9990_v26  ;;  %v2709_v8 = vmul.f32 %v8537_v44, %v2689_v37  ;;  %10114 = vst [vmem:[#allocation32_spill] sm:$0xff] %v8812_v39  ;;  %v2952_v47 = vld [vmem:[#allocation4 + $0x330] sm:$0xff]  ;;  %v2831_v37 = vadd.f32 %v2815_v7, %v2779_v11  ;;  %v2793_v11 = vld [vmem:[#allocation4 + $0x198] sm:$0xff] }
 0x6e5   :  { %v2937_v42 = vadd.f32 %v2921_v18, %v2885_v60  ;;  %v2884_v4 = vadd.f32 %v2868_v23, %v2832_v63  ;;  %v2778_v36 = vadd.f32 %v2762_v31, %v2726_v50  ;;  %v2761_v58 = vmul.f32 %v8550_v20, %v2741_v43  ;;  %v10115_v60 = vld [vmem:[#allocation49_spill] sm:$0xff]  ;;  %v2740_v7 = vld [vmem:[#allocation4 + $0x110] sm:$0xff] }
 0x6e6   :  { %v2725_v33 = vadd.f32 %v2709_v8, %v2657_v5  ;;  %v2656_v10 = vmul.f32 %v8532_v51, %v2636_v2  ;;  %v2708_v18 = vmul.f32 %v8537_v44, %v2688_v12  ;;  %v8838_v23 = vsub.f32 %v8792_v46, %v8815_v9  ;;  %v3004_v2 = vld [vmem:[#allocation4 + $0x3b0] sm:$0xff]  ;;  %v2635_v12 = vld [vmem:[#allocation4 + $0x8] sm:$0xff]  ;;  %v2898_v46 = vld [vmem:[#allocation4 + $0x2a0] sm:$0xff] }
 0x6e7   :  { %6539 = vmatpush3.xpose.msra.mxu0 %v10113_v48  ;;  %6578 = vmatpush3.xpose.msra.mxu1 %v7920_v49  ;;  %v2920_v49 = vmul.f32 %v8594_v29, %v2900_v45  ;;  %v2867_v48 = vmul.f32 %v8579_v3, %v2847_v6  ;;  %v10116_v6 = vsub.f32 %v8708_v53, %v8733_v38  ;;  %v2897_v38 = vld [vmem:[#allocation4 + $0x298] sm:$0xff] }
 0x6e8   :  { %6540 = vmatprep.subr.mxu0 %v9990_v26  ;;  %6617 = vmatprep.subr.mxu1 %v9990_v26  ;;  %v8840_v45 = vadd.f32 %v3026_v41, %v2990_v59  ;;  %v10119_v50 = vsub.f32 %v8712_v27, %v8736_v40  ;;  %v2989_v5 = vadd.f32 %v2973_v28, %v2937_v42  ;;  %v2845_v42 = vld [vmem:[#allocation4 + $0x218] sm:$0xff] }
 0x6e9   :  { %v8832_v31 = vand.u32 4294901760, %v10116_v6  ;;  %v2936_v8 = vadd.f32 %v2920_v49, %v2884_v4  ;;  %v2972_v43 = vmul.f32 %v8609_v54, %v2952_v47  ;;  %v2883_v41 = vadd.f32 %v2867_v48, %v2831_v37  ;;  %v2951_v6 = vld [vmem:[#allocation4 + $0x328] sm:$0xff]  ;;  %v10120_v47 = vld [vmem:[#allocation51_spill] sm:$0xff] }
 0x6ea   :  { %6580 = vmatmul.mubr.f32.vlgmr.msra.gmra.mxu1 %v8455_v62  ;;  %10118 = vst [vmem:[#allocation39_spill] sm:$0xff] %v8840_v45  ;;  %v8847_v52 = vand.u32 4294901760, %v10119_v50  ;;  %v2919_v59 = vmul.f32 %v8594_v29, %v2899_v19  ;;  %v2830_v63 = vadd.f32 %v2814_v14, %v2778_v36  ;;  %v2777_v50 = vadd.f32 %v2761_v58, %v2725_v33  ;;  %v2792_v14 = vld [vmem:[#allocation4 + $0x190] sm:$0xff]  ;;  %v2739_v19 = vld [vmem:[#allocation4 + $0x108] sm:$0xff] }
 0x6eb   :  { %6541 = vmatpush3.xpose.msra.mxu0 %v10115_v60  ;;  %6618 = vmatpush3.xpose.msra.mxu1 %v8799_v61  ;;  %10117 = vst [vmem:[#allocation35_spill] sm:$0xff] %v8832_v31  ;;  %v2687_v60 = vld [vmem:[#allocation4 + $0x88] sm:$0xff]  ;;  %v2866_v61 = vmul.f32 %v8579_v3, %v2846_v55  ;;  %v2813_v28 = vmul.f32 %v8562_v30, %v2793_v11 }
 0x6ec   :  { %6542 = vmatprep.subr.mxu0 %v9990_v26  ;;  %6619 = vmatprep.subr.mxu1 %v9990_v26  ;;  %v2724_v4 = vadd.f32 %v2708_v18, %v2656_v10  ;;  %v2760_v49 = vmul.f32 %v8550_v20, %v2740_v7  ;;  %v10121_v36 = vsub.f32 %v8716_v35, %v8739_v22  ;;  %v8869_v10 = vand.u32 4294901760, %v8840_v45  ;;  %v2634_v7 = vld [vmem:[#allocation4] sm:$0xff] }
 0x6ed   :  { %6649 = vmatprep.mubr.msk.f32.mxu1 %vm7402_vm0, %v9990_v26  ;;  %v3024_v48 = vmul.f32 %v8627_v17, %v3004_v2  ;;  %v2655_v33 = vmul.f32 %v8532_v51, %v2635_v12  ;;  %v2707_v58 = vmul.f32 %v8537_v44, %v2687_v60  ;;  %v8871_v55 = vadd.f32 %v3025_v13, %v2989_v5  ;;  %v2686_v2 = vld [vmem:[#allocation4 + $0x80] sm:$0xff] }
 0x6ee   :  { %v8861_v37 = vand.u32 4294901760, %v10121_v36  ;;  %v2988_v18 = vadd.f32 %v2972_v43, %v2936_v8  ;;  %v2971_v11 = vmul.f32 %v8609_v54, %v2951_v6  ;;  %v3003_v36 = vld [vmem:[#allocation4 + $0x3a8] sm:$0xff]  ;;  %v2882_v12 = vadd.f32 %v2866_v61, %v2830_v63  ;;  %v2950_v22 = vld [vmem:[#allocation4 + $0x320] sm:$0xff] }
 0x6ef   :  { %6543 = vmatpush3.xpose.msra.mxu0 %v10120_v47  ;;  %6620 = vmatpush3.xpose.msra.mxu1 %v8832_v31  ;;  %10123 = vst [vmem:[#allocation44_spill] sm:$0xff] %v8871_v55  ;;  %v2935_v47 = vadd.f32 %v2919_v59, %v2883_v41  ;;  %v2918_v60 = vmul.f32 %v8594_v29, %v2898_v46  ;;  %v8882_v61 = vand.u32 4294901760, %v8838_v23  ;;  %v2844_v46 = vld [vmem:[#allocation4 + $0x210] sm:$0xff]  ;;  %v2791_v8 = vld [vmem:[#allocation4 + $0x188] sm:$0xff]  ;;  %v8893_v59 = vand.u32 4294901760, %v8871_v55 }
 0x6f0   :  { %10122 = vst [vmem:[#allocation42_spill] sm:$0xff] %v8861_v37  ;;  %6582 = vmatprep.subr.mxu0 %v9990_v26  ;;  %6621 = vmatprep.subr.mxu1 %v9990_v26  ;;  %v2865_v31 = vmul.f32 %v8579_v3, %v2845_v42  ;;  %v2829_v40 = vadd.f32 %v2813_v28, %v2777_v50  ;;  %v2738_v28 = vld [vmem:[#allocation4 + $0x100] sm:$0xff] }
 0x6f1   :  { %v2776_v0 = vadd.f32 %v2760_v49, %v2724_v4  ;;  %v2812_v13 = vmul.f32 %v8562_v30, %v2792_v14  ;;  %v2759_v5 = vmul.f32 %v8550_v20, %v2739_v19  ;;  %10124 = vst [vmem:[#allocation47_spill] sm:$0xff] %v8882_v61  ;;  %v2723_v63 = vadd.f32 %v2707_v58, %v2655_v33  ;;  %v3002_v49 = vld [vmem:[#allocation4 + $0x3a0] sm:$0xff]  ;;  %v2949_v33 = vld [vmem:[#allocation4 + $0x318] sm:$0xff] }
 0x6f2   :  { %6545 = vmatmul.mubr.f32.vlgmr.msra.gmra.mxu0 %v8455_v62  ;;  %v2654_v62 = vmul.f32 %v8532_v51, %v2634_v7  ;;  %v2706_v43 = vmul.f32 %v8537_v44, %v2686_v2  ;;  %v8890_v41 = vsub.f32 %v8840_v45, %v8869_v10  ;;  %v8895_v6 = vadd.f32 %v3024_v48, %v2988_v18  ;;  %v2843_v7 = vld [vmem:[#allocation4 + $0x208] sm:$0xff] }
 0x6f3   :  { %6583 = vmatpush3.xpose.msra.mxu0 %v8663_v32  ;;  %6622 = vmatpush3.xpose.msra.mxu1 %v8847_v52  ;;  %v3023_v50 = vmul.f32 %v8627_v17, %v3003_v36  ;;  %v2987_v42 = vadd.f32 %v2971_v11, %v2935_v47  ;;  %v2934_v51 = vadd.f32 %v2918_v60, %v2882_v12  ;;  %v2790_v12 = vld [vmem:[#allocation4 + $0x180] sm:$0xff] }
 0x6f4   :  { %6584 = vmatprep.subr.mxu0 %v9990_v26  ;;  %6623 = vmatprep.subr.mxu1 %v9990_v26  ;;  %10125 = vst [vmem:[#allocation19_spill] sm:$0xff] %v8895_v6  ;;  %v2970_v44 = vmul.f32 %v8609_v54, %v2950_v22  ;;  %v2917_v4 = vmul.f32 %v8594_v29, %v2897_v38  ;;  %v2896_v38 = vld [vmem:[#allocation4 + $0x290] sm:$0xff]  ;;  %v8924_v36 = vand.u32 4294901760, %v8895_v6 }
 0x6f5   :  { %6614 = vmatprep.mubr.msk.f32.mxu0 %vm7402_vm0, %v9990_v26  ;;  %v2881_v14 = vadd.f32 %v2865_v31, %v2829_v40  ;;  %v2828_v58 = vadd.f32 %v2812_v13, %v2776_v0  ;;  %v2864_v19 = vmul.f32 %v8579_v3, %v2844_v46  ;;  %v2811_v48 = vmul.f32 %v8562_v30, %v2791_v8 }
 0x6f6   :  { %v10126_v22 = vsub.f32 %v8764_v1, %v8781_v21  ;;  %v2775_v11 = vadd.f32 %v2759_v5, %v2723_v63  ;;  %v2722_v2 = vadd.f32 %v2706_v43, %v2654_v62  ;;  %v2758_v40 = vmul.f32 %v8550_v20, %v2738_v28  ;;  %v3001_v63 = vld [vmem:[#allocation4 + $0x398] sm:$0xff]  ;;  %v2948_v43 = vld [vmem:[#allocation4 + $0x310] sm:$0xff] }
 0x6f7   :  { %6585 = vmatpush3.xpose.msra.mxu0 %v8685_v56  ;;  %6624 = vmatpush3.xpose.msra.mxu1 %v8861_v37  ;;  %v3182_v0 = vsub.f32 %v8838_v23, %v8882_v61  ;;  %v8917_v31 = vand.u32 4294901760, %v8890_v41  ;;  %v8921_v47 = vsub.f32 %v8871_v55, %v8893_v59  ;;  %v8926_v60 = vadd.f32 %v3023_v50, %v2987_v42 }
 0x6f8   :  { %v8909_v18 = vand.u32 4294901760, %v10126_v22  ;;  %6586 = vmatprep.subr.mxu0 %v9990_v26  ;;  %6625 = vmatprep.subr.mxu1 %v9990_v26  ;;  %v2986_v20 = vadd.f32 %v2970_v44, %v2934_v51  ;;  %v3022_v13 = vmul.f32 %v8627_v17, %v3002_v49  ;;  %v2969_v5 = vmul.f32 %v8609_v54, %v2949_v33  ;;  %v2895_v44 = vld [vmem:[#allocation4 + $0x288] sm:$0xff] }
 0x6f9   :  { %10128 = vst [vmem:[#allocation23_spill] sm:$0xff] %v8917_v31  ;;  %10129 = vst [vmem:[#allocation26_spill] sm:$0xff] %v8926_v60  ;;  %v2933_v46 = vadd.f32 %v2917_v4, %v2881_v14  ;;  %v2880_v8 = vadd.f32 %v2864_v19, %v2828_v58  ;;  %v2916_v62 = vmul.f32 %v8594_v29, %v2896_v38  ;;  %v8945_v33 = vand.u32 4294901760, %v8921_v47  ;;  %v2842_v58 = vld [vmem:[#allocation4 + $0x200] sm:$0xff] }
 0x6fa   :  { %10127 = vst [vmem:[#allocation22_spill] sm:$0xff] %v8909_v18  ;;  %v2863_v28 = vmul.f32 %v8579_v3, %v2843_v7  ;;  %v10130_v50 = vsub.f32 %v8790_v24, %v8812_v39  ;;  %v2827_v51 = vadd.f32 %v2811_v48, %v2775_v11  ;;  %v2774_v49 = vadd.f32 %v2758_v40, %v2722_v2  ;;  %v3000_v2 = vld [vmem:[#allocation4 + $0x390] sm:$0xff] }
 0x6fb   :  { %6587 = vmatpush3.xpose.msra.mxu0 %v8688_v34  ;;  %6626 = vmatpush3.xpose.msra.mxu1 %v8909_v18  ;;  %v2810_v4 = vmul.f32 %v8562_v30, %v2790_v12  ;;  %v3189_v14 = vsub.f32 %v8890_v41, %v8917_v31  ;;  %10132 = vst [vmem:[#allocation33_spill] sm:$0xff] %v8945_v33  ;;  %v8952_v48 = vand.u32 4294901760, %v8926_v60  ;;  %v8961_v12 = vand.u32 4294901760, %v3182_v0  ;;  %v2947_v18 = vld [vmem:[#allocation4 + $0x308] sm:$0xff] }
 0x6fc   :  { %v8937_v42 = vand.u32 4294901760, %v10130_v50  ;;  %6588 = vmatprep.subr.mxu0 %v9990_v26  ;;  %6627 = vmatprep.subr.mxu1 %v9990_v26  ;;  %v8949_v19 = vsub.f32 %v8895_v6, %v8924_v36  ;;  %v3021_v30 = vmul.f32 %v8627_v17, %v3001_v63  ;;  %v2968_v22 = vmul.f32 %v8609_v54, %v2948_v43 }
 0x6fd   :  { %v8956_v38 = vadd.f32 %v3022_v13, %v2986_v20  ;;  %v2985_v11 = vadd.f32 %v2969_v5, %v2933_v46  ;;  %v2932_v7 = vadd.f32 %v2916_v62, %v2880_v8  ;;  %v2915_v40 = vmul.f32 %v8594_v29, %v2895_v44  ;;  %10134 = vst [vmem:[#allocation38_spill] sm:$0xff] %v8961_v12  ;;  %v2894_v20 = vld [vmem:[#allocation4 + $0x280] sm:$0xff]  ;;  %v2999_v44 = vld [vmem:[#allocation4 + $0x388] sm:$0xff] }
 0x6fe   :  { %10131 = vst [vmem:[#allocation30_spill] sm:$0xff] %v8937_v42  ;;  %v2879_v50 = vadd.f32 %v2863_v28, %v2827_v51  ;;  %v2826_v37 = vadd.f32 %v2810_v4, %v2774_v49  ;;  %v2862_v63 = vmul.f32 %v8579_v3, %v2842_v58  ;;  %v3196_v13 = vsub.f32 %v8921_v47, %v8945_v33  ;;  %v2946_v58 = vld [vmem:[#allocation4 + $0x300] sm:$0xff] }
 0x6ff   :  { %10133 = vst [vmem:[#allocation36_spill] sm:$0xff] %v8956_v38  ;;  %6589 = vmatpush3.xpose.msra.mxu0 %v8691_v15  ;;  %6628 = vmatpush3.xpose.msra.mxu1 %v8937_v42  ;;  %v8969_v5 = vand.u32 4294901760, %v8949_v19  ;;  %v8973_v0 = vsub.f32 %v8926_v60, %v8952_v48  ;;  %v3020_v46 = vmul.f32 %v8627_v17, %v3000_v2  ;;  %v8977_v8 = vand.u32 4294901760, %v8956_v38 }
 0x700   :  { %6590 = vmatprep.subr.mxu0 %v9990_v26  ;;  %6629 = vmatprep.subr.mxu1 %v9990_v26  ;;  %v8979_v3 = vadd.f32 %v3021_v30, %v2985_v11  ;;  %v2984_v62 = vadd.f32 %v2968_v22, %v2932_v7  ;;  %v2967_v43 = vmul.f32 %v8609_v54, %v2947_v18  ;;  %v8984_v28 = vand.u32 4294901760, %v3189_v14 }
 0x701   :  { %10135 = vst [vmem:[#allocation41_spill] sm:$0xff] %v8969_v5  ;;  %v2931_v51 = vadd.f32 %v2915_v40, %v2879_v50  ;;  %v2878_v49 = vadd.f32 %v2862_v63, %v2826_v37  ;;  %v2914_v4 = vmul.f32 %v8594_v29, %v2894_v20  ;;  %v3203_v30 = vsub.f32 %v8949_v19, %v8969_v5  ;;  %v2998_v50 = vld [vmem:[#allocation4 + $0x380] sm:$0xff] }
 0x702   :  { %10136 = vst [vmem:[#allocation45_spill] sm:$0xff] %v8979_v3  ;;  %10137 = vst [vmem:[#allocation48_spill] sm:$0xff] %v8984_v28  ;;  %v8992_v18 = vand.u32 4294901760, %v8973_v0  ;;  %v8996_v14 = vsub.f32 %v8956_v38, %v8977_v8  ;;  %v8999_v22 = vand.u32 4294901760, %v8979_v3  ;;  %v9001_v37 = vadd.f32 %v3020_v46, %v2984_v62 }
 0x703   :  { %6591 = vmatpush3.xpose.msra.mxu0 %v8742_v25  ;;  %6630 = vmatpush3.xpose.msra.mxu1 %v8961_v12  ;;  %v3019_v29 = vmul.f32 %v8627_v17, %v2999_v44  ;;  %v9006_v11 = vand.u32 4294901760, %v3196_v13  ;;  %v2983_v7 = vadd.f32 %v2967_v43, %v2931_v51  ;;  %v2930_v2 = vadd.f32 %v2914_v4, %v2878_v49 }
 0x704   :  { %6592 = vmatprep.subr.mxu0 %v9990_v26  ;;  %6631 = vmatprep.subr.mxu1 %v9990_v26  ;;  %10138 = vst [vmem:[#allocation50_spill] sm:$0xff] %v8992_v18  ;;  %10139 = vst [vmem:[#allocation52_spill] sm:$0xff] %v9001_v37  ;;  %v2966_v40 = vmul.f32 %v8609_v54, %v2946_v58  ;;  %v9011_v63 = vand.u32 4294901760, %v3203_v30  ;;  %v3210_v20 = vsub.f32 %v8973_v0, %v8992_v18 }
 0x705   :  { %10140 = vst [vmem:[#allocation9_spill] sm:$0xff] %v9006_v11  ;;  %v9016_v46 = vand.u32 4294901760, %v8996_v14  ;;  %v9020_v13 = vsub.f32 %v8979_v3, %v8999_v22  ;;  %v9025_v54 = vand.u32 4294901760, %v9001_v37  ;;  %v9027_v62 = vadd.f32 %v3019_v29, %v2983_v7 }
 0x706   :  { %10141 = vst [vmem:[#allocation24_spill] sm:$0xff] %v9011_v63  ;;  %v2982_v43 = vadd.f32 %v2966_v40, %v2930_v2  ;;  %v3018_v51 = vmul.f32 %v8627_v17, %v2998_v50  ;;  %v9032_v44 = vand.u32 4294901760, %v3210_v20 }
 0x707   :  { %6593 = vmatpush3.xpose.msra.mxu0 %v8771_v57  ;;  %6632 = vmatpush3.xpose.msra.mxu1 %v8984_v28  ;;  %10142 = vst [vmem:[#allocation28_spill] sm:$0xff] %v9016_v46  ;;  %10143 = vst [vmem:[#allocation31_spill] sm:$0xff] %v9020_v13  ;;  %v3217_v49 = vsub.f32 %v8996_v14, %v9016_v46  ;;  %v9039_v4 = vand.u32 4294901760, %v9020_v13  ;;  %v9043_v58 = vsub.f32 %v9001_v37, %v9025_v54 }
 0x708   :  { %6594 = vmatprep.subr.mxu0 %v9990_v26  ;;  %6633 = vmatprep.subr.mxu1 %v9990_v26  ;;  %10144 = vst [vmem:[#allocation34_spill] sm:$0xff] %v9027_v62  ;;  %10145 = vst [vmem:[#allocation37_spill] sm:$0xff] %v9032_v44  ;;  %v9046_v17 = vand.u32 4294901760, %v9027_v62  ;;  %v9048_v30 = vadd.f32 %v3018_v51, %v2982_v43 }
 0x709   :  { %10146 = vst [vmem:[#allocation40_spill] sm:$0xff] %v9039_v4  ;;  %10147 = vst [vmem:[#allocation43_spill] sm:$0xff] %v9043_v58  ;;  %v9052_v29 = vand.u32 4294901760, %v3217_v49  ;;  %v3224_v7 = vsub.f32 %v9020_v13, %v9039_v4  ;;  %v9059_v2 = vand.u32 4294901760, %v9043_v58 }
 0x70a   :  { %10148 = vst [vmem:[#allocation46_spill] sm:$0xff] %v9048_v30  ;;  %v9063_v40 = vsub.f32 %v9027_v62, %v9046_v17  ;;  %v9066_v50 = vand.u32 4294901760, %v9048_v30 }
 0x70b   :  { %6595 = vmatpush3.xpose.msra.mxu0 %v8815_v9  ;;  %6634 = vmatpush3.xpose.msra.mxu1 %v9006_v11  ;;  %10149 = vst [vmem:[#allocation49_spill] sm:$0xff] %v9052_v29  ;;  %10150 = vst [vmem:[#allocation51_spill] sm:$0xff] %v9059_v2  ;;  %v9072_v20 = vand.u32 4294901760, %v3224_v7  ;;  %v3231_v43 = vsub.f32 %v9043_v58, %v9059_v2 }
 0x70c   :  { %6596 = vmatprep.subr.mxu0 %v9990_v26  ;;  %6635 = vmatprep.subr.mxu1 %v9990_v26  ;;  %10151 = vst [vmem:[#allocation53_spill] sm:$0xff] %v9063_v40  ;;  %v9077_v51 = vand.u32 4294901760, %v9063_v40  ;;  %v9081_v49 = vsub.f32 %v9048_v30, %v9066_v50 }
 0x70d   :  { %10152 = vst [vmem:[#allocation54_spill] sm:$0xff] %v9072_v20  ;;  %v9087_v7 = vand.u32 4294901760, %v3231_v43 }
 0x70e   :  { %10153 = vst [vmem:[#allocation55_spill] sm:$0xff] %v9077_v51  ;;  %10154 = vst [vmem:[#allocation56_spill] sm:$0xff] %v9081_v49 }
 0x70f   :  { %6597 = vmatpush3.xpose.msra.mxu0 %v8869_v10  ;;  %6636 = vmatpush3.xpose.msra.mxu1 %v9011_v63  ;;  %10155 = vst [vmem:[#allocation57_spill] sm:$0xff] %v9087_v7 }
 0x710   :  { %6598 = vmatprep.subr.mxu0 %v9990_v26  ;;  %6637 = vmatprep.subr.mxu1 %v9990_v26 }
 0x713   :  { %6599 = vmatpush3.xpose.msra.mxu0 %v8893_v59  ;;  %6638 = vmatpush3.xpose.msra.mxu1 %v9032_v44  ;;  %v9092_v44 = vand.u32 4294901760, %v9081_v49 }
 0x714   :  { %6600 = vmatprep.subr.mxu0 %v9990_v26  ;;  %6639 = vmatprep.subr.mxu1 %v9990_v26 }
 0x715   :  { %10156 = vst [vmem:[#allocation58_spill] sm:$0xff] %v9092_v44  ;;  %v3245_v43 = vsub.f32 %v9081_v49, %v9092_v44 }
 0x717   :  { %6601 = vmatpush3.xpose.msra.mxu0 %v8924_v36  ;;  %6640 = vmatpush3.xpose.msra.mxu1 %v9052_v29  ;;  %v3238_v29 = vsub.f32 %v9063_v40, %v9077_v51 }
 0x718   :  { %6602 = vmatprep.subr.mxu0 %v9990_v26  ;;  %6641 = vmatprep.subr.mxu1 %v9990_v26 }
 0x719   :  { %v9098_v63 = vand.u32 4294901760, %v3238_v29 }
 0x71b   :  { %6603 = vmatpush3.xpose.msra.mxu0 %v8952_v48  ;;  %6642 = vmatpush3.xpose.msra.mxu1 %v9072_v20  ;;  %10157 = vst [vmem:[#allocation59_spill] sm:$0xff] %v9098_v63  ;;  %v9106_v20 = vand.u32 4294901760, %v3245_v43 }
 0x71c   :  { %6604 = vmatprep.subr.mxu0 %v9990_v26  ;;  %6643 = vmatprep.subr.mxu1 %v9990_v26 }
 0x71d   :  { %10158 = vst [vmem:[#allocation60_spill] sm:$0xff] %v9106_v20 }
 0x71f   :  { %6605 = vmatpush3.xpose.msra.mxu0 %v8977_v8  ;;  %6644 = vmatpush3.xpose.msra.mxu1 %v9087_v7  ;;  %v10159_v7 = vmov 0.125  }
 0x720   :  { %6606 = vmatprep.subr.mxu0 %v9990_v26  ;;  %6645 = vmatprep.subr.mxu1 %v9990_v26 }
 0x723   :  { %6607 = vmatpush3.xpose.msra.mxu0 %v8999_v22  ;;  %6646 = vmatpush3.xpose.msra.mxu1 %v9098_v63 }
 0x724   :  { %6608 = vmatprep.subr.mxu0 %v9990_v26  ;;  %6647 = vmatprep.subr.mxu1 %v9990_v26 }
 0x727   :  { %6609 = vmatpush3.xpose.msra.mxu0 %v9025_v54  ;;  %6648 = vmatpush3.xpose.msra.mxu1 %v9106_v20 }
 0x728   :  { %6610 = vmatprep.subr.mxu0 %v9990_v26  ;;  %6687 = vmatprep.subr.mxu1 %v9990_v26 }
 0x72a   :  { %v2205_v29 = vpop.f32.mrf.mxu1  ;;  %6650 = vmatmul.mubr.f32.vlgmr.msra.gmra.mxu1 %v10159_v7 }
 0x72b   :  { %6611 = vmatpush3.xpose.msra.mxu0 %v9046_v17  ;;  %6688 = vmatpush3.xpose.msra.mxu1 %v8663_v32 }
 0x72c   :  { %v6441_v43 = vpop.f32.mrf.mxu1  ;;  %6612 = vmatprep.subr.mxu0 %v9990_v26  ;;  %6689 = vmatprep.subr.mxu1 %v9990_v26 }
 0x72d   :  { %6719 = vmatprep.mubr.msk.f32.mxu1 %vm7402_vm0, %v9990_v26 }
 0x72f   :  { %6613 = vmatpush3.xpose.msra.mxu0 %v9066_v50  ;;  %6690 = vmatpush3.xpose.msra.mxu1 %v8685_v56 }
 0x730   :  { %6652 = vmatprep.subr.mxu0 %v9990_v26  ;;  %6691 = vmatprep.subr.mxu1 %v9990_v26 }
 0x732   :  { %6615 = vmatmul.mubr.f32.vlgmr.msra.gmra.mxu0 %v9990_v26  ;;  %v2054_v20 = vpop.f32.mrf.mxu0 }
 0x733   :  { %v9126_v63 = vadd.f32 %v2205_v29, %v2054_v20  ;;  %6653 = vmatpush3.xpose.msra.mxu0 %v8682_v16  ;;  %6692 = vmatpush3.xpose.msra.mxu1 %v8688_v34 }
 0x734   :  { %v6406_v43 = vpop.f32.mrf.mxu0  ;;  %6654 = vmatprep.subr.mxu0 %v9990_v26  ;;  %6693 = vmatprep.subr.mxu1 %v9990_v26 }
 0x735   :  { %6684 = vmatprep.mubr.msk.f32.mxu0 %vm7402_vm0, %v9990_v26 }
 0x737   :  { %6655 = vmatpush3.xpose.msra.mxu0 %v8708_v53  ;;  %6694 = vmatpush3.xpose.msra.mxu1 %v8691_v15 }
 0x738   :  { %6656 = vmatprep.subr.mxu0 %v9990_v26  ;;  %6695 = vmatprep.subr.mxu1 %v9990_v26 }
 0x73b   :  { %6657 = vmatpush3.xpose.msra.mxu0 %v8712_v27  ;;  %6696 = vmatpush3.xpose.msra.mxu1 %v8742_v25 }
 0x73c   :  { %6658 = vmatprep.subr.mxu0 %v9990_v26  ;;  %6697 = vmatprep.subr.mxu1 %v9990_v26 }
 0x73f   :  { %6659 = vmatpush3.xpose.msra.mxu0 %v8716_v35  ;;  %6698 = vmatpush3.xpose.msra.mxu1 %v8771_v57 }
 0x740   :  { %6660 = vmatprep.subr.mxu0 %v9990_v26  ;;  %6699 = vmatprep.subr.mxu1 %v9990_v26 }
 0x743   :  { %6661 = vmatpush3.xpose.msra.mxu0 %v8764_v1  ;;  %6700 = vmatpush3.xpose.msra.mxu1 %v8815_v9 }
 0x744   :  { %6662 = vmatprep.subr.mxu0 %v9990_v26  ;;  %6701 = vmatprep.subr.mxu1 %v9990_v26 }
 0x747   :  { %6663 = vmatpush3.xpose.msra.mxu0 %v8790_v24  ;;  %6702 = vmatpush3.xpose.msra.mxu1 %v8869_v10 }
 0x748   :  { %6664 = vmatprep.subr.mxu0 %v9990_v26  ;;  %6703 = vmatprep.subr.mxu1 %v9990_v26 }
 0x74b   :  { %6665 = vmatpush3.xpose.msra.mxu0 %v8838_v23  ;;  %6704 = vmatpush3.xpose.msra.mxu1 %v8893_v59 }
 0x74c   :  { %6666 = vmatprep.subr.mxu0 %v9990_v26  ;;  %6705 = vmatprep.subr.mxu1 %v9990_v26 }
 0x74f   :  { %6667 = vmatpush3.xpose.msra.mxu0 %v8890_v41  ;;  %6706 = vmatpush3.xpose.msra.mxu1 %v8924_v36 }
 0x750   :  { %6668 = vmatprep.subr.mxu0 %v9990_v26  ;;  %6707 = vmatprep.subr.mxu1 %v9990_v26 }
 0x753   :  { %6669 = vmatpush3.xpose.msra.mxu0 %v8921_v47  ;;  %6708 = vmatpush3.xpose.msra.mxu1 %v8952_v48 }
 0x754   :  { %6670 = vmatprep.subr.mxu0 %v9990_v26  ;;  %6709 = vmatprep.subr.mxu1 %v9990_v26 }
 0x757   :  { %6671 = vmatpush3.xpose.msra.mxu0 %v8949_v19  ;;  %6710 = vmatpush3.xpose.msra.mxu1 %v8977_v8 }
 0x758   :  { %6672 = vmatprep.subr.mxu0 %v9990_v26  ;;  %6711 = vmatprep.subr.mxu1 %v9990_v26 }
 0x75b   :  { %6673 = vmatpush3.xpose.msra.mxu0 %v8973_v0  ;;  %6712 = vmatpush3.xpose.msra.mxu1 %v8999_v22 }
 0x75c   :  { %6674 = vmatprep.subr.mxu0 %v9990_v26  ;;  %6713 = vmatprep.subr.mxu1 %v9990_v26 }
 0x75f   :  { %6675 = vmatpush3.xpose.msra.mxu0 %v8996_v14  ;;  %6714 = vmatpush3.xpose.msra.mxu1 %v9025_v54 }
 0x760   :  { %6676 = vmatprep.subr.mxu0 %v9990_v26  ;;  %6715 = vmatprep.subr.mxu1 %v9990_v26 }
 0x763   :  { %6677 = vmatpush3.xpose.msra.mxu0 %v9020_v13  ;;  %6716 = vmatpush3.xpose.msra.mxu1 %v9046_v17  ;;  %v10161_v13 = vld [vmem:[#allocation13_spill] sm:$0xff] }
 0x764   :  { %6678 = vmatprep.subr.mxu0 %v9990_v26  ;;  %6717 = vmatprep.subr.mxu1 %v9990_v26 }
 0x767   :  { %6679 = vmatpush3.xpose.msra.mxu0 %v9043_v58  ;;  %6718 = vmatpush3.xpose.msra.mxu1 %v9066_v50 }
 0x768   :  { %6680 = vmatprep.subr.mxu0 %v9990_v26  ;;  %6757 = vmatprep.subr.mxu1 %v9990_v26 }
 0x76a   :  { %v2398_v20 = vpop.f32.mrf.mxu1  ;;  %6720 = vmatmul.mubr.f32.vlgmr.msra.gmra.mxu1 %v9990_v26 }
 0x76b   :  { %6681 = vmatpush3.xpose.msra.mxu0 %v9063_v40  ;;  %6758 = vmatpush3.xpose.msra.mxu1 %v8663_v32  ;;  %v10160_v40 = vld [vmem:[#allocation11_spill] sm:$0xff] }
 0x76c   :  { %v6511_v29 = vpop.f32.mrf.mxu1  ;;  %6682 = vmatprep.subr.mxu0 %v9990_v26  ;;  %6759 = vmatprep.subr.mxu1 %v9990_v26 }
 0x76d   :  { %6789 = vmatprep.mubr.msk.f32.mxu1 %vm7402_vm0, %v9990_v26 }
 0x76f   :  { %6683 = vmatpush3.xpose.msra.mxu0 %v9081_v49  ;;  %6760 = vmatpush3.xpose.msra.mxu1 %v8685_v56 }
 0x770   :  { %6722 = vmatprep.subr.mxu0 %v9990_v26  ;;  %6761 = vmatprep.subr.mxu1 %v9990_v26 }
 0x772   :  { %v2309_v43 = vpop.f32.mrf.mxu0  ;;  %6685 = vmatmul.mubr.f32.vlgmr.msra.gmra.mxu0 %v9990_v26 }
 0x773   :  { %v2310_v29 = vadd.f32 %v2309_v43, %v9126_v63  ;;  %6723 = vmatpush3.xpose.msra.mxu0 %v10160_v40  ;;  %6762 = vmatpush3.xpose.msra.mxu1 %v8688_v34  ;;  %v10162_v63 = vld [vmem:[#allocation15_spill] sm:$0xff] }
 0x774   :  { %v6476_v58 = vpop.f32.mrf.mxu0  ;;  %6724 = vmatprep.subr.mxu0 %v9990_v26  ;;  %6763 = vmatprep.subr.mxu1 %v9990_v26 }
 0x775   :  { %6754 = vmatprep.mubr.msk.f32.mxu0 %vm7402_vm0, %v9990_v26  ;;  %v9205_v49 = vadd.f32 %v2398_v20, %v2310_v29  ;;  %v10163_v58 = vld [vmem:[#allocation18_spill] sm:$0xff] }
 0x777   :  { %6725 = vmatpush3.xpose.msra.mxu0 %v10161_v13  ;;  %6764 = vmatpush3.xpose.msra.mxu1 %v8691_v15 }
 0x778   :  { %6726 = vmatprep.subr.mxu0 %v9990_v26  ;;  %6765 = vmatprep.subr.mxu1 %v9990_v26 }
 0x77b   :  { %6727 = vmatpush3.xpose.msra.mxu0 %v10162_v63  ;;  %6766 = vmatpush3.xpose.msra.mxu1 %v8742_v25 }
 0x77c   :  { %6728 = vmatprep.subr.mxu0 %v9990_v26  ;;  %6767 = vmatprep.subr.mxu1 %v9990_v26 }
 0x77f   :  { %6729 = vmatpush3.xpose.msra.mxu0 %v10163_v58  ;;  %6768 = vmatpush3.xpose.msra.mxu1 %v8771_v57 }
 0x780   :  { %6730 = vmatprep.subr.mxu0 %v9990_v26  ;;  %6769 = vmatprep.subr.mxu1 %v9990_v26 }
 0x783   :  { %6731 = vmatpush3.xpose.msra.mxu0 %v8781_v21  ;;  %6770 = vmatpush3.xpose.msra.mxu1 %v8815_v9 }
 0x784   :  { %6732 = vmatprep.subr.mxu0 %v9990_v26  ;;  %6771 = vmatprep.subr.mxu1 %v9990_v26 }
 0x787   :  { %6733 = vmatpush3.xpose.msra.mxu0 %v8812_v39  ;;  %6772 = vmatpush3.xpose.msra.mxu1 %v8869_v10 }
 0x788   :  { %6734 = vmatprep.subr.mxu0 %v9990_v26  ;;  %6773 = vmatprep.subr.mxu1 %v9990_v26 }
 0x78b   :  { %6735 = vmatpush3.xpose.msra.mxu0 %v8882_v61  ;;  %6774 = vmatpush3.xpose.msra.mxu1 %v8893_v59 }
 0x78c   :  { %6736 = vmatprep.subr.mxu0 %v9990_v26  ;;  %6775 = vmatprep.subr.mxu1 %v9990_v26 }
 0x78f   :  { %6737 = vmatpush3.xpose.msra.mxu0 %v8917_v31  ;;  %6776 = vmatpush3.xpose.msra.mxu1 %v8924_v36 }
 0x790   :  { %6738 = vmatprep.subr.mxu0 %v9990_v26  ;;  %6777 = vmatprep.subr.mxu1 %v9990_v26 }
 0x793   :  { %6739 = vmatpush3.xpose.msra.mxu0 %v8945_v33  ;;  %6778 = vmatpush3.xpose.msra.mxu1 %v8952_v48 }
 0x794   :  { %6740 = vmatprep.subr.mxu0 %v9990_v26  ;;  %6779 = vmatprep.subr.mxu1 %v9990_v26 }
 0x797   :  { %6741 = vmatpush3.xpose.msra.mxu0 %v8969_v5  ;;  %6780 = vmatpush3.xpose.msra.mxu1 %v8977_v8 }
 0x798   :  { %6742 = vmatprep.subr.mxu0 %v9990_v26  ;;  %6781 = vmatprep.subr.mxu1 %v9990_v26 }
 0x79b   :  { %6743 = vmatpush3.xpose.msra.mxu0 %v8992_v18  ;;  %6782 = vmatpush3.xpose.msra.mxu1 %v8999_v22 }
 0x79c   :  { %6744 = vmatprep.subr.mxu0 %v9990_v26  ;;  %6783 = vmatprep.subr.mxu1 %v9990_v26 }
 0x79f   :  { %6745 = vmatpush3.xpose.msra.mxu0 %v9016_v46  ;;  %6784 = vmatpush3.xpose.msra.mxu1 %v9025_v54 }
 0x7a0   :  { %6746 = vmatprep.subr.mxu0 %v9990_v26  ;;  %6785 = vmatprep.subr.mxu1 %v9990_v26 }
 0x7a3   :  { %6747 = vmatpush3.xpose.msra.mxu0 %v9039_v4  ;;  %6786 = vmatpush3.xpose.msra.mxu1 %v9046_v17  ;;  %v10165_v4 = vld [vmem:[#allocation16_spill] sm:$0xff] }
 0x7a4   :  { %6748 = vmatprep.subr.mxu0 %v9990_v26  ;;  %6787 = vmatprep.subr.mxu1 %v9990_v26 }
 0x7a7   :  { %6749 = vmatpush3.xpose.msra.mxu0 %v9059_v2  ;;  %6788 = vmatpush3.xpose.msra.mxu1 %v9066_v50 }
 0x7a8   :  { %6750 = vmatprep.subr.mxu0 %v9990_v26  ;;  %6827 = vmatprep.subr.mxu1 %v9990_v26 }
 0x7aa   :  { %v2604_v20 = vpop.f32.mrf.mxu1  ;;  %6790 = vmatmul.mubr.f32.vlgmr.msra.gmra.mxu1 %v10159_v7 }
 0x7ab   :  { %6751 = vmatpush3.xpose.msra.mxu0 %v9077_v51  ;;  %6828 = vmatpush3.xpose.msra.mxu1 %v8663_v32  ;;  %v10164_v51 = vld [vmem:[#allocation14_spill] sm:$0xff] }
 0x7ac   :  { %v6581_v43 = vpop.f32.mrf.mxu1  ;;  %6752 = vmatprep.subr.mxu0 %v9990_v26  ;;  %6829 = vmatprep.subr.mxu1 %v9990_v26 }
 0x7ad   :  { %6859 = vmatprep.mubr.msk.f32.mxu1 %vm7402_vm0, %v9990_v26 }
 0x7af   :  { %6753 = vmatpush3.xpose.msra.mxu0 %v9092_v44  ;;  %6830 = vmatpush3.xpose.msra.mxu1 %v8685_v56 }
 0x7b0   :  { %6792 = vmatprep.subr.mxu0 %v9990_v26  ;;  %6831 = vmatprep.subr.mxu1 %v9990_v26 }
 0x7b2   :  { %v2517_v29 = vpop.f32.mrf.mxu0  ;;  %6755 = vmatmul.mubr.f32.vlgmr.msra.gmra.mxu0 %v10159_v7  ;;  %v10166_v7 = vld [vmem:[#allocation20_spill] sm:$0xff] }
 0x7b3   :  { %v2518_v43 = vadd.f32 %v2517_v29, %v9205_v49  ;;  %6793 = vmatpush3.msra.mxu0 %v10164_v51  ;;  %6824 = vmatprep.mubr.msk.f32.mxu0 %vm7402_vm0, %v9990_v26  ;;  %v10167_v49 = vld [vmem:[#allocation17_spill] sm:$0xff] }
 0x7b4   :  { %v6546_v2 = vpop.f32.mrf.mxu0  ;;  %6794 = vmatprep.subr.mxu0 %v9990_v26  ;;  %6832 = vmatpush3.xpose.msra.mxu1 %v8688_v34 }
 0x7b5   :  { %v2605_v44 = vadd.f32 %v2604_v20, %v2518_v43  ;;  %6795 = vmatpush3.msra.mxu0 %v10165_v4  ;;  %6833 = vmatprep.subr.mxu1 %v9990_v26  ;;  %v9284_v2 = vld [vmem:[#allocation6] sm:$0xff]  ;;  %v10168_v20 = vld [vmem:[#allocation10_spill] sm:$0xff] }
 0x7b6   :  { %6796 = vmatprep.subr.mxu0 %v9990_v26  ;;  %v10169_v43 = vld [vmem:[#allocation12_spill] sm:$0xff] }
 0x7b7   :  { %v2608_v46 = vmul.f32 %v10166_v7, %v2605_v44  ;;  %6797 = vmatpush3.msra.mxu0 %v10167_v49  ;;  %v10170_v49 = vld [vmem:[#allocation21_spill] sm:$0xff] }
 0x7b8   :  { %6798 = vmatprep.subr.mxu0 %v9990_v26  ;;  %6834 = vmatpush3.xpose.msra.mxu1 %v8691_v15 }
 0x7b9   :  { %v9287_v29 = vadd.f32 %v9284_v2, %v2608_v46  ;;  %6799 = vmatpush3.msra.mxu0 %v10168_v20  ;;  %6835 = vmatprep.subr.mxu1 %v9990_v26  ;;  %v10171_v46 = vld [vmem:[#allocation27_spill] sm:$0xff] }
 0x7ba   :  { %6800 = vmatprep.subr.mxu0 %v9990_v26 }
 0x7bb   :  { %v2610_v44 = vmul.f32 %v9287_v29, %v9287_v29  ;;  %6801 = vmatpush3.msra.mxu0 %v10169_v43 }
 0x7bc   :  { %6802 = vmatprep.subr.mxu0 %v9990_v26  ;;  %6836 = vmatpush3.xpose.msra.mxu1 %v8742_v25 }
 0x7bd   :  { %2611 = vadd.xlane.f32.xlu0 %v2610_v44  ;;  %6803 = vmatpush3.msra.mxu0 %v10170_v49 }
 0x7be   :  { %6804 = vmatprep.subr.mxu0 %v9990_v26  ;;  %6837 = vmatprep.subr.mxu1 %v9990_v26 }
 0x7bf   :  { %6805 = vmatpush3.msra.mxu0 %v10171_v46 }
 0x7c0   :  { %6806 = vmatprep.subr.mxu0 %v9990_v26  ;;  %6838 = vmatpush3.xpose.msra.mxu1 %v8771_v57 }
 0x7c1   :  { %6807 = vmatpush3.msra.mxu0 %v8840_v45  ;;  %6839 = vmatprep.subr.mxu1 %v9990_v26 }
 0x7c2   :  { %6808 = vmatprep.subr.mxu0 %v9990_v26 }
 0x7c3   :  { %6809 = vmatpush3.msra.mxu0 %v8871_v55 }
 0x7c4   :  { %6810 = vmatprep.subr.mxu0 %v9990_v26  ;;  %6840 = vmatpush3.xpose.msra.mxu1 %v8815_v9 }
 0x7c5   :  { %6811 = vmatpush3.msra.mxu0 %v8895_v6  ;;  %6841 = vmatprep.subr.mxu1 %v9990_v26 }
 0x7c6   :  { %6812 = vmatprep.subr.mxu0 %v9990_v26 }
 0x7c7   :  { %6813 = vmatpush3.msra.mxu0 %v8926_v60 }
 0x7c8   :  { %6814 = vmatprep.subr.mxu0 %v9990_v26  ;;  %6842 = vmatpush3.xpose.msra.mxu1 %v8869_v10 }
 0x7c9   :  { %6815 = vmatpush3.msra.mxu0 %v8956_v38  ;;  %6843 = vmatprep.subr.mxu1 %v9990_v26 }
 0x7ca   :  { %6816 = vmatprep.subr.mxu0 %v9990_v26 }
 0x7cb   :  { %6817 = vmatpush3.msra.mxu0 %v8979_v3 }
 0x7cc   :  { %6818 = vmatprep.subr.mxu0 %v9990_v26  ;;  %6844 = vmatpush3.xpose.msra.mxu1 %v8893_v59 }
 0x7cd   :  { %6819 = vmatpush3.msra.mxu0 %v9001_v37  ;;  %6845 = vmatprep.subr.mxu1 %v9990_v26 }
 0x7ce   :  { %6820 = vmatprep.subr.mxu0 %v9990_v26 }
 0x7cf   :  { %6821 = vmatpush3.msra.mxu0 %v9027_v62 }
 0x7d0   :  { %6822 = vmatprep.subr.mxu0 %v9990_v26  ;;  %6846 = vmatpush3.xpose.msra.mxu1 %v8924_v36 }
 0x7d1   :  { %6823 = vmatpush3.msra.mxu0 %v9048_v30  ;;  %6847 = vmatprep.subr.mxu1 %v9990_v26 }
 0x7d2   :  { %6862 = vmatprep.subr.mxu0 %v9990_v26 }
 0x7d4   :  { %6848 = vmatpush3.xpose.msra.mxu1 %v8952_v48 }
 0x7d5   :  { %6849 = vmatprep.subr.mxu1 %v9990_v26 }
 0x7d8   :  { %6850 = vmatpush3.xpose.msra.mxu1 %v8977_v8 }
 0x7d9   :  { %6851 = vmatprep.subr.mxu1 %v9990_v26 }
 0x7dc   :  { %6852 = vmatpush3.xpose.msra.mxu1 %v8999_v22 }
 0x7dd   :  { %6853 = vmatprep.subr.mxu1 %v9990_v26 }
 0x7e0   :  { %6854 = vmatpush3.xpose.msra.mxu1 %v9025_v54 }
 0x7e1   :  { %6855 = vmatprep.subr.mxu1 %v9990_v26 }
 0x7e4   :  { %6856 = vmatpush3.xpose.msra.mxu1 %v9046_v17 }
 0x7e5   :  { %6857 = vmatprep.subr.mxu1 %v9990_v26 }
 0x7e8   :  { %6858 = vmatpush3.xpose.msra.mxu1 %v9066_v50 }
 0x7e9   :  { %6897 = vmatprep.subr.mxu1 %v9990_v26 }
 0x7ea   :  { %v3282_v44 = vpop.f32.mrf.mxu1 }
 0x7ec   :  { %v6651_v30 = vpop.f32.mrf.mxu1 }
 0x7f2   :  { %v3132_v62 = vpop.f32.mrf.mxu0 }
 0x7f3   :  { %v3283_v37 = vadd.f32 %v3282_v44, %v3132_v62 }
 0x7f4   :  { %v6616_v3 = vpop.f32.mrf.mxu0 }
 0x82a   :  { %v3470_v38 = vpop.f32.mrf.mxu1 }
 0x82c   :  { %v6721_v60 = vpop.f32.mrf.mxu1 }
 0x832   :  { %v3384_v6 = vpop.f32.mrf.mxu0 }
 0x833   :  { %v3385_v55 = vadd.f32 %v3384_v6, %v3283_v37 }
 0x834   :  { %v6686_v45 = vpop.f32.mrf.mxu0 }
 0x835   :  { %v3471_v46 = vadd.f32 %v3470_v38, %v3385_v55 }
 0x846   :  { %v2612_v49 = vpop.xlane.xlu0 %2611 }
 0x847   :  { %7306 = vrsqrt.f32 %v2612_v49  ;;  %v2620_v43 = vadd.f32 1.0, %v2612_v49  ;;  %vm2615_vm8 = vcmp.eq.f32.partialorder %v2612_v49, inf  ;;  %v2618_v18 = vand.u32 2147483648, %v2612_v49 }
 0x848   :  { %vm2617_vm9 = vcmp.eq.f32.partialorder %v2612_v49, 0.0 }
 0x849   :  { %v2621_v20 = vadd.f32 1e-20, %v2620_v43 }
 0x84b   :  { %7308 = vrcp.f32 %v2621_v20 }
 0x854   :  { %v7307_v4 = vpop.eup %7306 }
 0x855   :  { %v2614_v51 = vmul.f32 %v7307_v4, %v2612_v49 }
 0x857   :  { %v2616_v5 = vsel %vm2615_vm8, %v2612_v49, %v2614_v51 }
 0x858   :  { %v2619_v30 = vsel %vm2617_vm9, %v2618_v18, %v2616_v5  ;;  %v7309_v62 = vpop.eup %7308 }
 0x859   :  { %v2623_v3 = vmul.f32 %v7309_v62, %v2619_v30 }
 0x85b   :  { %v2624_v60 = vmul.f32 %v2623_v3, %v9287_v29 }
 0x85d   :  { %v2625_v44 = vrot.slane %v2624_v60, 4 }
 0x85f   :  { %v2626_v6 = vadd.f32 %v2625_v44, %v2624_v60 }
 0x861   :  { %v2627_v45 = vrot.slane %v2626_v6, 2 }
 0x863   :  { %v2628_v55 = vadd.f32 %v2627_v45, %v2626_v6 }
 0x865   :  { %v2629_v38 = vrot.slane %v2628_v55, 1 }
 0x867   :  { %v2630_v37 = vadd.f32 %v2629_v38, %v2628_v55 }
 0x869   :  { %2631 = vst [vmem:[%s9791_s3] sm:$0x1] %v2630_v37 }
 0x86a   :  { %v3674_v4 = vpop.f32.mrf.mxu1 }
 0x86c   :  { %v6791_v20 = vpop.f32.mrf.mxu1 }
 0x86d   :  { %v10172_v20 = vld [vmem:[#allocation29_spill] sm:$0xff] }
 0x872   :  { %v3588_v43 = vpop.f32.mrf.mxu0 }
 0x873   :  { %v3589_v51 = vadd.f32 %v3588_v43, %v3471_v46  ;;  %v10173_v43 = vld [vmem:[#allocation35_spill] sm:$0xff] }
 0x874   :  { %v6756_v49 = vpop.f32.mrf.mxu0 }
 0x875   :  { %v3675_v5 = vadd.f32 %v3674_v4, %v3589_v51  ;;  %v10174_v51 = vld [vmem:[#allocation42_spill] sm:$0xff] }
 0x876   :  { %v10175_v49 = vld [vmem:[#allocation22_spill] sm:$0xff] }
 0x877   :  { %v3678_v18 = vmul.f32 %v10166_v7, %v3675_v5  ;;  %v10176_v5 = vld [vmem:[#allocation24_spill] sm:$0xff] }
 0x879   :  { %v3679_v29 = vadd.f32 %v9284_v2, %v3678_v18  ;;  %v10177_v18 = vld [vmem:[#allocation37_spill] sm:$0xff] }
 0x87b   :  { %v3680_v30 = vmul.f32 %v3679_v29, %v3679_v29 }
 0x87d   :  { %3681 = vadd.xlane.f32.xlu1 %v3680_v30  ;;  %v10179_v30 = vld [vmem:[#allocation54_spill] sm:$0xff] }
 0x906   :  { %v3682_v62 = vpop.xlane.xlu1 %3681 }
 0x907   :  { %7310 = vrsqrt.f32 %v3682_v62  ;;  %v3690_v3 = vadd.f32 1.0, %v3682_v62  ;;  %vm3685_vm10 = vcmp.eq.f32.partialorder %v3682_v62, inf  ;;  %v3688_v45 = vand.u32 2147483648, %v3682_v62 }
 0x908   :  { %vm3687_vm11 = vcmp.eq.f32.partialorder %v3682_v62, 0.0 }
 0x909   :  { %v3691_v60 = vadd.f32 1e-20, %v3690_v3  ;;  %v10181_v3 = vld [vmem:[#allocation59_spill] sm:$0xff] }
 0x90b   :  { %7312 = vrcp.f32 %v3691_v60  ;;  %v10182_v60 = vld [vmem:[#allocation60_spill] sm:$0xff] }
 0x914   :  { %v7311_v44 = vpop.eup %7310 }
 0x915   :  { %v3684_v6 = vmul.f32 %v7311_v44, %v3682_v62 }
 0x917   :  { %v3686_v55 = vsel %vm3685_vm10, %v3682_v62, %v3684_v6  ;;  %v10180_v62 = vld [vmem:[#allocation57_spill] sm:$0xff] }
 0x918   :  { %v7313_v46 = vpop.eup %7312  ;;  %v3689_v38 = vsel %vm3687_vm11, %v3688_v45, %v3686_v55 }
 0x919   :  { %v3693_v37 = vmul.f32 %v7313_v46, %v3689_v38 }
 0x91b   :  { %v3694_v4 = vmul.f32 %v3693_v37, %v3679_v29  ;;  %v10178_v29 = vld [vmem:[#allocation49_spill] sm:$0xff] }
 0x91d   :  { %6825 = vmatmul.mubr.f32.vlgmr.msra.gmra.mxu0 %v3694_v4 }
 0x91e   :  { %6863 = vmatpush3.xpose.msra.mxu0 %v10172_v20  ;;  %6894 = vmatprep.mubr.msk.f32.mxu0 %vm7402_vm0, %v9990_v26 }
 0x91f   :  { %6864 = vmatprep.subr.mxu0 %v9990_v26 }
 0x922   :  { %6865 = vmatpush3.xpose.msra.mxu0 %v10173_v43 }
 0x923   :  { %6866 = vmatprep.subr.mxu0 %v9990_v26 }
 0x926   :  { %6867 = vmatpush3.xpose.msra.mxu0 %v8847_v52 }
 0x927   :  { %6868 = vmatprep.subr.mxu0 %v9990_v26 }
 0x92a   :  { %6869 = vmatpush3.xpose.msra.mxu0 %v10174_v51 }
 0x92b   :  { %6870 = vmatprep.subr.mxu0 %v9990_v26 }
 0x92e   :  { %6871 = vmatpush3.xpose.msra.mxu0 %v10175_v49 }
 0x92f   :  { %6872 = vmatprep.subr.mxu0 %v9990_v26 }
 0x932   :  { %6873 = vmatpush3.xpose.msra.mxu0 %v8937_v42 }
 0x933   :  { %6874 = vmatprep.subr.mxu0 %v9990_v26 }
 0x936   :  { %6875 = vmatpush3.xpose.msra.mxu0 %v8961_v12 }
 0x937   :  { %6876 = vmatprep.subr.mxu0 %v9990_v26 }
 0x93a   :  { %6877 = vmatpush3.xpose.msra.mxu0 %v8984_v28 }
 0x93b   :  { %6878 = vmatprep.subr.mxu0 %v9990_v26 }
 0x93e   :  { %6879 = vmatpush3.xpose.msra.mxu0 %v9006_v11 }
 0x93f   :  { %6880 = vmatprep.subr.mxu0 %v9990_v26 }
 0x942   :  { %6881 = vmatpush3.xpose.msra.mxu0 %v10176_v5 }
 0x943   :  { %6882 = vmatprep.subr.mxu0 %v9990_v26 }
 0x946   :  { %6883 = vmatpush3.xpose.msra.mxu0 %v10177_v18 }
 0x947   :  { %6884 = vmatprep.subr.mxu0 %v9990_v26 }
 0x94a   :  { %6885 = vmatpush3.xpose.msra.mxu0 %v10178_v29 }
 0x94b   :  { %6886 = vmatprep.subr.mxu0 %v9990_v26 }
 0x94e   :  { %6887 = vmatpush3.xpose.msra.mxu0 %v10179_v30 }
 0x94f   :  { %6888 = vmatprep.subr.mxu0 %v9990_v26 }
 0x952   :  { %6889 = vmatpush3.xpose.msra.mxu0 %v10180_v62 }
 0x953   :  { %6890 = vmatprep.subr.mxu0 %v9990_v26 }
 0x956   :  { %6891 = vmatpush3.xpose.msra.mxu0 %v10181_v3 }
 0x957   :  { %6892 = vmatprep.subr.mxu0 %v9990_v26 }
 0x95a   :  { %6893 = vmatpush3.xpose.msra.mxu0 %v10182_v60 }
 0x95b   :  { %6932 = vmatprep.subr.mxu0 %v9990_v26 }
 0x9dd   :  { %v9382_v44 = vpop.f32.mrf.mxu0 }
 0x9de   :  { %v3765_v6 = vrot.slane %v9382_v44, 4 }
 0x9df   :  { %v6826_v45 = vpop.f32.mrf.mxu0 }
 0x9e0   :  { %v3766_v55 = vmax.f32 %v9382_v44, %v3765_v6 }
 0x9e2   :  { %v3767_v46 = vrot.slane %v3766_v55, 2 }
 0x9e4   :  { %v3768_v38 = vmax.f32 %v3766_v55, %v3767_v46  ;;  %v10190_v55 = vld [vmem:[#allocation40_spill] sm:$0xff]  ;;  %v10191_v46 = vld [vmem:[#allocation51_spill] sm:$0xff] }
 0x9e6   :  { %v3769_v37 = vrot.slane %v3768_v38, 1 }
 0x9e8   :  { %v3770_v4 = vmax.f32 %v3768_v38, %v3769_v37  ;;  %v10192_v38 = vld [vmem:[#allocation55_spill] sm:$0xff]  ;;  %v10193_v37 = vld [vmem:[#allocation58_spill] sm:$0xff] }
 0x9ea   :  { %v3771_v62 = vsub.f32 %v9382_v44, %v3770_v4  ;;  %v10194_v4 = vld [vmem:[#allocation14_spill] sm:$0xff] }
 0x9ec   :  { %v3772_v3 = vmul.f32 1.442695, %v3771_v62  ;;  %v10187_v62 = vld [vmem:[#allocation41_spill] sm:$0xff] }
 0x9ee   :  { %7314 = vpow2.f32 %v3772_v3  ;;  %v10188_v3 = vld [vmem:[#allocation50_spill] sm:$0xff] }
 0x9fb   :  { %v7315_v30 = vpop.eup %7314 }
 0x9fc   :  { %v3774_v29 = vrot.slane %v7315_v30, 4 }
 0x9fe   :  { %v3775_v60 = vadd.f32 %v7315_v30, %v3774_v29  ;;  %v10185_v29 = vld [vmem:[#allocation53_spill] sm:$0xff] }
 0xa00   :  { %v3776_v18 = vrot.slane %v3775_v60, 2 }
 0xa02   :  { %v3777_v5 = vadd.f32 %v3776_v18, %v3775_v60  ;;  %v10189_v60 = vld [vmem:[#allocation28_spill] sm:$0xff] }
 0xa04   :  { %v3778_v11 = vrot.slane %v3777_v5, 1 }
 0xa06   :  { %v3779_v28 = vadd.f32 %v3778_v11, %v3777_v5  ;;  %v10183_v11 = vld [vmem:[#allocation31_spill] sm:$0xff] }
 0xa07   :  { %v10184_v5 = vld [vmem:[#allocation43_spill] sm:$0xff] }
 0xa08   :  { %7316 = vrcp.f32 %v3779_v28 }
 0xa15   :  { %v7317_v12 = vpop.eup %7316 }
 0xa16   :  { %v3781_v45 = vmul.f32 %v7317_v12, %v7315_v30  ;;  %v10186_v30 = vld [vmem:[#allocation56_spill] sm:$0xff] }
 0xa18   :  { %v9387_v42 = vand.u32 4294901760, %v3781_v45 }
 0xa1a   :  { %v9390_v6 = vsub.f32 %v3781_v45, %v9387_v42  ;;  %6895 = vmatmul.mubr.f32.vlgmr.msra.gmra.mxu0 %v9387_v42  ;;  %v10195_v45 = vld [vmem:[#allocation16_spill] sm:$0xff] }
 0xa1b   :  { %6933 = vmatpush3.xpose.msra.mxu0 %v8663_v32  ;;  %6964 = vmatprep.mubr.msk.f32.mxu0 %vm7402_vm0, %v9990_v26 }
 0xa1c   :  { %6934 = vmatprep.subr.mxu0 %v9990_v26  ;;  %v3865_v18 = vand.u32 4294901760, %v9390_v6 }
 0xa1e   :  { %v3866_v28 = vsub.f32 %v9390_v6, %v3865_v18 }
 0xa1f   :  { %6935 = vmatpush3.xpose.msra.mxu0 %v8685_v56 }
 0xa20   :  { %6936 = vmatprep.subr.mxu0 %v9990_v26  ;;  %v3867_v12 = vand.u32 4294901760, %v3866_v28  ;;  %v10199_v28 = vld [vmem:[#allocation21_spill] sm:$0xff] }
 0xa22   :  { %6860 = vmatmul.mubr.f32.vlgmr.msra.gmra.mxu1 %v3867_v12  ;;  %v10200_v12 = vld [vmem:[#allocation27_spill] sm:$0xff] }
 0xa23   :  { %6898 = vmatpush3.xpose.msra.mxu1 %v8682_v16  ;;  %6937 = vmatpush3.xpose.msra.mxu0 %v8688_v34 }
 0xa24   :  { %6899 = vmatprep.subr.mxu1 %v9990_v26  ;;  %6938 = vmatprep.subr.mxu0 %v9990_v26 }
 0xa25   :  { %6929 = vmatprep.mubr.msk.f32.mxu1 %vm7402_vm0, %v9990_v26 }
 0xa27   :  { %6900 = vmatpush3.xpose.msra.mxu1 %v8708_v53  ;;  %6939 = vmatpush3.xpose.msra.mxu0 %v8691_v15 }
 0xa28   :  { %6901 = vmatprep.subr.mxu1 %v9990_v26  ;;  %6940 = vmatprep.subr.mxu0 %v9990_v26 }
 0xa2b   :  { %6902 = vmatpush3.xpose.msra.mxu1 %v8712_v27  ;;  %6941 = vmatpush3.xpose.msra.mxu0 %v8742_v25 }
 0xa2c   :  { %6903 = vmatprep.subr.mxu1 %v9990_v26  ;;  %6942 = vmatprep.subr.mxu0 %v9990_v26 }
 0xa2f   :  { %6904 = vmatpush3.xpose.msra.mxu1 %v8716_v35  ;;  %6943 = vmatpush3.xpose.msra.mxu0 %v8771_v57 }
 0xa30   :  { %6905 = vmatprep.subr.mxu1 %v9990_v26  ;;  %6944 = vmatprep.subr.mxu0 %v9990_v26 }
 0xa33   :  { %6906 = vmatpush3.xpose.msra.mxu1 %v8764_v1  ;;  %6945 = vmatpush3.xpose.msra.mxu0 %v8815_v9 }
 0xa34   :  { %6907 = vmatprep.subr.mxu1 %v9990_v26  ;;  %6946 = vmatprep.subr.mxu0 %v9990_v26 }
 0xa37   :  { %6908 = vmatpush3.xpose.msra.mxu1 %v8790_v24  ;;  %6947 = vmatpush3.xpose.msra.mxu0 %v8869_v10 }
 0xa38   :  { %6909 = vmatprep.subr.mxu1 %v9990_v26  ;;  %6948 = vmatprep.subr.mxu0 %v9990_v26 }
 0xa3b   :  { %6910 = vmatpush3.xpose.msra.mxu1 %v8838_v23  ;;  %6949 = vmatpush3.xpose.msra.mxu0 %v8893_v59 }
 0xa3c   :  { %6911 = vmatprep.subr.mxu1 %v9990_v26  ;;  %6950 = vmatprep.subr.mxu0 %v9990_v26 }
 0xa3f   :  { %6912 = vmatpush3.xpose.msra.mxu1 %v8890_v41  ;;  %6951 = vmatpush3.xpose.msra.mxu0 %v8924_v36 }
 0xa40   :  { %6913 = vmatprep.subr.mxu1 %v9990_v26  ;;  %6952 = vmatprep.subr.mxu0 %v9990_v26 }
 0xa43   :  { %6914 = vmatpush3.xpose.msra.mxu1 %v8921_v47  ;;  %6953 = vmatpush3.xpose.msra.mxu0 %v8952_v48 }
 0xa44   :  { %6915 = vmatprep.subr.mxu1 %v9990_v26  ;;  %6954 = vmatprep.subr.mxu0 %v9990_v26 }
 0xa47   :  { %6916 = vmatpush3.xpose.msra.mxu1 %v8949_v19  ;;  %6955 = vmatpush3.xpose.msra.mxu0 %v8977_v8 }
 0xa48   :  { %6917 = vmatprep.subr.mxu1 %v9990_v26  ;;  %6956 = vmatprep.subr.mxu0 %v9990_v26 }
 0xa4b   :  { %6918 = vmatpush3.xpose.msra.mxu1 %v8973_v0  ;;  %6957 = vmatpush3.xpose.msra.mxu0 %v8999_v22 }
 0xa4c   :  { %6919 = vmatprep.subr.mxu1 %v9990_v26  ;;  %6958 = vmatprep.subr.mxu0 %v9990_v26 }
 0xa4f   :  { %6920 = vmatpush3.xpose.msra.mxu1 %v8996_v14  ;;  %6959 = vmatpush3.xpose.msra.mxu0 %v9025_v54 }
 0xa50   :  { %6921 = vmatprep.subr.mxu1 %v9990_v26  ;;  %6960 = vmatprep.subr.mxu0 %v9990_v26 }
 0xa53   :  { %6922 = vmatpush3.xpose.msra.mxu1 %v10183_v11  ;;  %6961 = vmatpush3.xpose.msra.mxu0 %v9046_v17 }
 0xa54   :  { %6923 = vmatprep.subr.mxu1 %v9990_v26  ;;  %6962 = vmatprep.subr.mxu0 %v9990_v26 }
 0xa57   :  { %6924 = vmatpush3.xpose.msra.mxu1 %v10184_v5  ;;  %6963 = vmatpush3.xpose.msra.mxu0 %v9066_v50 }
 0xa58   :  { %6925 = vmatprep.subr.mxu1 %v9990_v26  ;;  %7002 = vmatprep.subr.mxu0 %v9990_v26 }
 0xa5a   :  { %6965 = vmatmul.mubr.f32.vlgmr.msra.gmra.mxu0 %v3865_v18  ;;  %v10198_v18 = vld [vmem:[#allocation12_spill] sm:$0xff] }
 0xa5b   :  { %6926 = vmatpush3.xpose.msra.mxu1 %v10185_v29  ;;  %7003 = vmatpush3.xpose.msra.mxu0 %v8663_v32 }
 0xa5c   :  { %6927 = vmatprep.subr.mxu1 %v9990_v26  ;;  %7004 = vmatprep.subr.mxu0 %v9990_v26 }
 0xa5d   :  { %7034 = vmatprep.mubr.msk.f32.mxu0 %vm7402_vm0, %v9990_v26 }
 0xa5f   :  { %6928 = vmatpush3.xpose.msra.mxu1 %v10186_v30  ;;  %7005 = vmatpush3.xpose.msra.mxu0 %v8685_v56 }
 0xa60   :  { %6967 = vmatprep.subr.mxu1 %v9990_v26  ;;  %7006 = vmatprep.subr.mxu0 %v9990_v26 }
 0xa62   :  { %6930 = vmatmul.mubr.f32.vlgmr.msra.gmra.mxu1 %v9390_v6  ;;  %v10196_v6 = vld [vmem:[#allocation17_spill] sm:$0xff] }
 0xa63   :  { %6968 = vmatpush3.xpose.msra.mxu1 %v10160_v40  ;;  %7007 = vmatpush3.xpose.msra.mxu0 %v8688_v34 }
 0xa64   :  { %6969 = vmatprep.subr.mxu1 %v9990_v26  ;;  %7008 = vmatprep.subr.mxu0 %v9990_v26 }
 0xa65   :  { %6999 = vmatprep.mubr.msk.f32.mxu1 %vm7402_vm0, %v9990_v26 }
 0xa67   :  { %6970 = vmatpush3.xpose.msra.mxu1 %v10161_v13  ;;  %7009 = vmatpush3.xpose.msra.mxu0 %v8691_v15 }
 0xa68   :  { %6971 = vmatprep.subr.mxu1 %v9990_v26  ;;  %7010 = vmatprep.subr.mxu0 %v9990_v26 }
 0xa6b   :  { %6972 = vmatpush3.xpose.msra.mxu1 %v10162_v63  ;;  %7011 = vmatpush3.xpose.msra.mxu0 %v8742_v25 }
 0xa6c   :  { %6973 = vmatprep.subr.mxu1 %v9990_v26  ;;  %7012 = vmatprep.subr.mxu0 %v9990_v26 }
 0xa6f   :  { %6974 = vmatpush3.xpose.msra.mxu1 %v10163_v58  ;;  %7013 = vmatpush3.xpose.msra.mxu0 %v8771_v57 }
 0xa70   :  { %6975 = vmatprep.subr.mxu1 %v9990_v26  ;;  %7014 = vmatprep.subr.mxu0 %v9990_v26 }
 0xa73   :  { %6976 = vmatpush3.xpose.msra.mxu1 %v8781_v21  ;;  %7015 = vmatpush3.xpose.msra.mxu0 %v8815_v9 }
 0xa74   :  { %6977 = vmatprep.subr.mxu1 %v9990_v26  ;;  %7016 = vmatprep.subr.mxu0 %v9990_v26 }
 0xa77   :  { %6978 = vmatpush3.xpose.msra.mxu1 %v8812_v39  ;;  %7017 = vmatpush3.xpose.msra.mxu0 %v8869_v10 }
 0xa78   :  { %6979 = vmatprep.subr.mxu1 %v9990_v26  ;;  %7018 = vmatprep.subr.mxu0 %v9990_v26 }
 0xa7b   :  { %6980 = vmatpush3.xpose.msra.mxu1 %v8882_v61  ;;  %7019 = vmatpush3.xpose.msra.mxu0 %v8893_v59 }
 0xa7c   :  { %6981 = vmatprep.subr.mxu1 %v9990_v26  ;;  %7020 = vmatprep.subr.mxu0 %v9990_v26 }
 0xa7f   :  { %6982 = vmatpush3.xpose.msra.mxu1 %v8917_v31  ;;  %7021 = vmatpush3.xpose.msra.mxu0 %v8924_v36 }
 0xa80   :  { %6983 = vmatprep.subr.mxu1 %v9990_v26  ;;  %7022 = vmatprep.subr.mxu0 %v9990_v26 }
 0xa83   :  { %6984 = vmatpush3.xpose.msra.mxu1 %v8945_v33  ;;  %7023 = vmatpush3.xpose.msra.mxu0 %v8952_v48 }
 0xa84   :  { %6985 = vmatprep.subr.mxu1 %v9990_v26  ;;  %7024 = vmatprep.subr.mxu0 %v9990_v26 }
 0xa87   :  { %6986 = vmatpush3.xpose.msra.mxu1 %v10187_v62  ;;  %7025 = vmatpush3.xpose.msra.mxu0 %v8977_v8 }
 0xa88   :  { %6987 = vmatprep.subr.mxu1 %v9990_v26  ;;  %7026 = vmatprep.subr.mxu0 %v9990_v26 }
 0xa8b   :  { %6988 = vmatpush3.xpose.msra.mxu1 %v10188_v3  ;;  %7027 = vmatpush3.xpose.msra.mxu0 %v8999_v22 }
 0xa8c   :  { %6989 = vmatprep.subr.mxu1 %v9990_v26  ;;  %7028 = vmatprep.subr.mxu0 %v9990_v26 }
 0xa8f   :  { %6990 = vmatpush3.xpose.msra.mxu1 %v10189_v60  ;;  %7029 = vmatpush3.xpose.msra.mxu0 %v9025_v54 }
 0xa90   :  { %6991 = vmatprep.subr.mxu1 %v9990_v26  ;;  %7030 = vmatprep.subr.mxu0 %v9990_v26 }
 0xa93   :  { %6992 = vmatpush3.xpose.msra.mxu1 %v10190_v55  ;;  %7031 = vmatpush3.xpose.msra.mxu0 %v9046_v17 }
 0xa94   :  { %6993 = vmatprep.subr.mxu1 %v9990_v26  ;;  %7032 = vmatprep.subr.mxu0 %v9990_v26 }
 0xa97   :  { %6994 = vmatpush3.xpose.msra.mxu1 %v10191_v46  ;;  %7033 = vmatpush3.xpose.msra.mxu0 %v9066_v50 }
 0xa98   :  { %6995 = vmatprep.subr.mxu1 %v9990_v26  ;;  %7072 = vmatprep.subr.mxu0 %v9990_v26 }
 0xa9a   :  { %7035 = vmatmul.mubr.f32.vlgmr.msra.gmra.mxu0 %v9387_v42 }
 0xa9b   :  { %6996 = vmatpush3.xpose.msra.mxu1 %v10192_v38  ;;  %7073 = vmatpush3.xpose.msra.mxu0 %v8663_v32 }
 0xa9c   :  { %6997 = vmatprep.subr.mxu1 %v9990_v26  ;;  %7074 = vmatprep.subr.mxu0 %v9990_v26 }
 0xa9d   :  { %7104 = vmatprep.mubr.msk.f32.mxu0 %vm7402_vm0, %v9990_v26 }
 0xa9f   :  { %6998 = vmatpush3.xpose.msra.mxu1 %v10193_v37  ;;  %7075 = vmatpush3.xpose.msra.mxu0 %v8685_v56 }
 0xaa0   :  { %7037 = vmatprep.subr.mxu1 %v9990_v26  ;;  %7076 = vmatprep.subr.mxu0 %v9990_v26 }
 0xaa2   :  { %7000 = vmatmul.mubr.f32.vlgmr.msra.gmra.mxu1 %v9387_v42  ;;  %v10197_v42 = vld [vmem:[#allocation10_spill] sm:$0xff] }
 0xaa3   :  { %7038 = vmatpush3.msra.mxu1 %v10194_v4  ;;  %7069 = vmatprep.mubr.msk.f32.mxu1 %vm7402_vm0, %v9990_v26  ;;  %v10201_v4 = vld [vmem:[#allocation39_spill] sm:$0xff] }
 0xaa4   :  { %7039 = vmatprep.subr.mxu1 %v9990_v26  ;;  %7077 = vmatpush3.xpose.msra.mxu0 %v8688_v34 }
 0xaa5   :  { %7040 = vmatpush3.msra.mxu1 %v10195_v45  ;;  %7078 = vmatprep.subr.mxu0 %v9990_v26  ;;  %v10202_v45 = vld [vmem:[#allocation44_spill] sm:$0xff] }
 0xaa6   :  { %7041 = vmatprep.subr.mxu1 %v9990_v26 }
 0xaa7   :  { %7042 = vmatpush3.msra.mxu1 %v10196_v6  ;;  %v10203_v6 = vld [vmem:[#allocation19_spill] sm:$0xff] }
 0xaa8   :  { %7043 = vmatprep.subr.mxu1 %v9990_v26  ;;  %7079 = vmatpush3.xpose.msra.mxu0 %v8691_v15 }
 0xaa9   :  { %7044 = vmatpush3.msra.mxu1 %v10197_v42  ;;  %7080 = vmatprep.subr.mxu0 %v9990_v26  ;;  %v10204_v42 = vld [vmem:[#allocation26_spill] sm:$0xff] }
 0xaaa   :  { %7045 = vmatprep.subr.mxu1 %v9990_v26 }
 0xaab   :  { %7046 = vmatpush3.msra.mxu1 %v10198_v18  ;;  %v10205_v18 = vld [vmem:[#allocation36_spill] sm:$0xff] }
 0xaac   :  { %7047 = vmatprep.subr.mxu1 %v9990_v26  ;;  %7081 = vmatpush3.xpose.msra.mxu0 %v8742_v25 }
 0xaad   :  { %7048 = vmatpush3.msra.mxu1 %v10199_v28  ;;  %7082 = vmatprep.subr.mxu0 %v9990_v26  ;;  %v10206_v28 = vld [vmem:[#allocation45_spill] sm:$0xff] }
 0xaae   :  { %7049 = vmatprep.subr.mxu1 %v9990_v26 }
 0xaaf   :  { %7050 = vmatpush3.msra.mxu1 %v10200_v12  ;;  %v10207_v12 = vld [vmem:[#allocation52_spill] sm:$0xff] }
 0xab0   :  { %7051 = vmatprep.subr.mxu1 %v9990_v26  ;;  %7083 = vmatpush3.xpose.msra.mxu0 %v8771_v57 }
 0xab1   :  { %7052 = vmatpush3.msra.mxu1 %v10201_v4  ;;  %7084 = vmatprep.subr.mxu0 %v9990_v26  ;;  %v10208_v4 = vld [vmem:[#allocation34_spill] sm:$0xff] }
 0xab2   :  { %7053 = vmatprep.subr.mxu1 %v9990_v26 }
 0xab3   :  { %7054 = vmatpush3.msra.mxu1 %v10202_v45  ;;  %v10209_v45 = vld [vmem:[#allocation46_spill] sm:$0xff] }
 0xab4   :  { %7055 = vmatprep.subr.mxu1 %v9990_v26  ;;  %7085 = vmatpush3.xpose.msra.mxu0 %v8815_v9 }
 0xab5   :  { %7056 = vmatpush3.msra.mxu1 %v10203_v6  ;;  %7086 = vmatprep.subr.mxu0 %v9990_v26 }
 0xab6   :  { %7057 = vmatprep.subr.mxu1 %v9990_v26 }
 0xab7   :  { %7058 = vmatpush3.msra.mxu1 %v10204_v42 }
 0xab8   :  { %7059 = vmatprep.subr.mxu1 %v9990_v26  ;;  %7087 = vmatpush3.xpose.msra.mxu0 %v8869_v10 }
 0xab9   :  { %7060 = vmatpush3.msra.mxu1 %v10205_v18  ;;  %7088 = vmatprep.subr.mxu0 %v9990_v26 }
 0xaba   :  { %7061 = vmatprep.subr.mxu1 %v9990_v26 }
 0xabb   :  { %7062 = vmatpush3.msra.mxu1 %v10206_v28 }
 0xabc   :  { %7063 = vmatprep.subr.mxu1 %v9990_v26  ;;  %7089 = vmatpush3.xpose.msra.mxu0 %v8893_v59 }
 0xabd   :  { %7064 = vmatpush3.msra.mxu1 %v10207_v12  ;;  %7090 = vmatprep.subr.mxu0 %v9990_v26 }
 0xabe   :  { %7065 = vmatprep.subr.mxu1 %v9990_v26 }
 0xabf   :  { %7066 = vmatpush3.msra.mxu1 %v10208_v4 }
 0xac0   :  { %7067 = vmatprep.subr.mxu1 %v9990_v26  ;;  %7091 = vmatpush3.xpose.msra.mxu0 %v8924_v36 }
 0xac1   :  { %7068 = vmatpush3.msra.mxu1 %v10209_v45  ;;  %7092 = vmatprep.subr.mxu0 %v9990_v26 }
 0xac2   :  { %7107 = vmatprep.subr.mxu1 %v9990_v26 }
 0xac4   :  { %7093 = vmatpush3.xpose.msra.mxu0 %v8952_v48 }
 0xac5   :  { %7094 = vmatprep.subr.mxu0 %v9990_v26 }
 0xac8   :  { %7095 = vmatpush3.xpose.msra.mxu0 %v8977_v8 }
 0xac9   :  { %7096 = vmatprep.subr.mxu0 %v9990_v26 }
 0xacc   :  { %7097 = vmatpush3.xpose.msra.mxu0 %v8999_v22 }
 0xacd   :  { %7098 = vmatprep.subr.mxu0 %v9990_v26 }
 0xad0   :  { %7099 = vmatpush3.xpose.msra.mxu0 %v9025_v54 }
 0xad1   :  { %7100 = vmatprep.subr.mxu0 %v9990_v26 }
 0xad4   :  { %7101 = vmatpush3.xpose.msra.mxu0 %v9046_v17 }
 0xad5   :  { %7102 = vmatprep.subr.mxu0 %v9990_v26 }
 0xad8   :  { %7103 = vmatpush3.xpose.msra.mxu0 %v9066_v50 }
 0xad9   :  { %7142 = vmatprep.subr.mxu0 %v9990_v26 }
 0xada   :  { %v4020_v6 = vpop.f32.mrf.mxu0 }
 0xadc   :  { %v6896_v42 = vpop.f32.mrf.mxu0 }
 0xae2   :  { %v3869_v18 = vpop.f32.mrf.mxu1 }
 0xae3   :  { %v4021_v28 = vadd.f32 %v4020_v6, %v3869_v18 }
 0xae4   :  { %v6861_v12 = vpop.f32.mrf.mxu1 }
 0xb1a   :  { %v4213_v4 = vpop.f32.mrf.mxu0 }
 0xb1c   :  { %v6966_v45 = vpop.f32.mrf.mxu0 }
 0xb22   :  { %v4124_v37 = vpop.f32.mrf.mxu1 }
 0xb23   :  { %v4125_v38 = vadd.f32 %v4124_v37, %v4021_v28  ;;  %v10220_v28 = vld [vmem:[#allocation60_spill] sm:$0xff] }
 0xb24   :  { %v6931_v46 = vpop.f32.mrf.mxu1 }
 0xb25   :  { %v4214_v55 = vadd.f32 %v4213_v4, %v4125_v38 }
 0xb5a   :  { %v4419_v60 = vpop.f32.mrf.mxu0 }
 0xb5c   :  { %v7036_v3 = vpop.f32.mrf.mxu0 }
 0xb62   :  { %v4332_v62 = vpop.f32.mrf.mxu1 }
 0xb63   :  { %v4333_v33 = vadd.f32 %v4332_v62, %v4214_v55  ;;  %v10219_v55 = vld [vmem:[#allocation59_spill] sm:$0xff] }
 0xb64   :  { %v7001_v31 = vpop.f32.mrf.mxu1 }
 0xb65   :  { %v4420_v61 = vadd.f32 %v4419_v60, %v4333_v33 }
 0xb67   :  { %v4423_v39 = vmul.f32 %v10166_v7, %v4420_v61  ;;  %v10212_v61 = vld [vmem:[#allocation48_spill] sm:$0xff] }
 0xb69   :  { %v4424_v21 = vadd.f32 %v9284_v2, %v4423_v39  ;;  %v10211_v39 = vld [vmem:[#allocation38_spill] sm:$0xff]  ;;  %v10214_v2 = vld [vmem:[#allocation24_spill] sm:$0xff] }
 0xb6b   :  { %v4425_v42 = vmul.f32 %v4424_v21, %v4424_v21 }
 0xb6d   :  { %4426 = vadd.xlane.f32.xlu1 %v4425_v42 }
 0xbf6   :  { %v4427_v6 = vpop.xlane.xlu1 %4426 }
 0xbf7   :  { %7318 = vrsqrt.f32 %v4427_v6  ;;  %v4435_v18 = vadd.f32 1.0, %v4427_v6  ;;  %vm4430_vm12 = vcmp.eq.f32.partialorder %v4427_v6, inf  ;;  %v4433_v38 = vand.u32 2147483648, %v4427_v6 }
 0xbf8   :  { %vm4432_vm13 = vcmp.eq.f32.partialorder %v4427_v6, 0.0 }
 0xbf9   :  { %v4436_v12 = vadd.f32 1e-20, %v4435_v18 }
 0xbfb   :  { %7320 = vrcp.f32 %v4436_v12 }
 0xc04   :  { %v7319_v37 = vpop.eup %7318 }
 0xc05   :  { %v4429_v46 = vmul.f32 %v7319_v37, %v4427_v6 }
 0xc07   :  { %v4431_v3 = vsel %vm4430_vm12, %v4427_v6, %v4429_v46 }
 0xc08   :  { %v7321_v62 = vpop.eup %7320  ;;  %v4434_v31 = vsel %vm4432_vm13, %v4433_v38, %v4431_v3 }
 0xc09   :  { %v4438_v33 = vmul.f32 %v7321_v62, %v4434_v31 }
 0xc0b   :  { %v4439_v60 = vmul.f32 %v4438_v33, %v4424_v21  ;;  %v10210_v21 = vld [vmem:[#allocation30_spill] sm:$0xff] }
 0xc0d   :  { %7070 = vmatmul.mubr.f32.vlgmr.msra.gmra.mxu1 %v4439_v60 }
 0xc0e   :  { %7108 = vmatpush3.xpose.msra.mxu1 %v10172_v20  ;;  %7139 = vmatprep.mubr.msk.f32.mxu1 %vm7402_vm0, %v9990_v26  ;;  %v10215_v20 = vld [vmem:[#allocation37_spill] sm:$0xff] }
 0xc0f   :  { %7109 = vmatprep.subr.mxu1 %v9990_v26 }
 0xc12   :  { %7110 = vmatpush3.xpose.msra.mxu1 %v10173_v43  ;;  %v10216_v43 = vld [vmem:[#allocation49_spill] sm:$0xff] }
 0xc13   :  { %7111 = vmatprep.subr.mxu1 %v9990_v26 }
 0xc16   :  { %7112 = vmatpush3.xpose.msra.mxu1 %v8847_v52  ;;  %v10213_v52 = vld [vmem:[#allocation9_spill] sm:$0xff] }
 0xc17   :  { %7113 = vmatprep.subr.mxu1 %v9990_v26 }
 0xc1a   :  { %7114 = vmatpush3.xpose.msra.mxu1 %v10174_v51  ;;  %v10217_v51 = vld [vmem:[#allocation54_spill] sm:$0xff] }
 0xc1b   :  { %7115 = vmatprep.subr.mxu1 %v9990_v26 }
 0xc1e   :  { %7116 = vmatpush3.xpose.msra.mxu1 %v10175_v49  ;;  %v10218_v49 = vld [vmem:[#allocation57_spill] sm:$0xff] }
 0xc1f   :  { %7117 = vmatprep.subr.mxu1 %v9990_v26 }
 0xc22   :  { %7118 = vmatpush3.xpose.msra.mxu1 %v10210_v21 }
 0xc23   :  { %7119 = vmatprep.subr.mxu1 %v9990_v26 }
 0xc26   :  { %7120 = vmatpush3.xpose.msra.mxu1 %v10211_v39 }
 0xc27   :  { %7121 = vmatprep.subr.mxu1 %v9990_v26 }
 0xc2a   :  { %7122 = vmatpush3.xpose.msra.mxu1 %v10212_v61 }
 0xc2b   :  { %7123 = vmatprep.subr.mxu1 %v9990_v26 }
 0xc2e   :  { %7124 = vmatpush3.xpose.msra.mxu1 %v10213_v52 }
 0xc2f   :  { %7125 = vmatprep.subr.mxu1 %v9990_v26 }
 0xc32   :  { %7126 = vmatpush3.xpose.msra.mxu1 %v10214_v2 }
 0xc33   :  { %7127 = vmatprep.subr.mxu1 %v9990_v26 }
 0xc36   :  { %7128 = vmatpush3.xpose.msra.mxu1 %v10215_v20 }
 0xc37   :  { %7129 = vmatprep.subr.mxu1 %v9990_v26 }
 0xc3a   :  { %7130 = vmatpush3.xpose.msra.mxu1 %v10216_v43 }
 0xc3b   :  { %7131 = vmatprep.subr.mxu1 %v9990_v26 }
 0xc3e   :  { %7132 = vmatpush3.xpose.msra.mxu1 %v10217_v51 }
 0xc3f   :  { %7133 = vmatprep.subr.mxu1 %v9990_v26 }
 0xc42   :  { %7134 = vmatpush3.xpose.msra.mxu1 %v10218_v49 }
 0xc43   :  { %7135 = vmatprep.subr.mxu1 %v9990_v26 }
 0xc46   :  { %7136 = vmatpush3.xpose.msra.mxu1 %v10219_v55 }
 0xc47   :  { %7137 = vmatprep.subr.mxu1 %v9990_v26 }
 0xc4a   :  { %7138 = vmatpush3.xpose.msra.mxu1 %v10220_v28 }
 0xc4b   :  { %7177 = vmatprep.subr.mxu1 %v9990_v26 }
 0xccd   :  { %v4506_v4 = vpop.f32.mrf.mxu1 }
 0xcce   :  { %v4510_v45 = vadd.f32 %v4506_v4, %v9382_v44 }
 0xccf   :  { %v7071_v42 = vpop.f32.mrf.mxu1 }
 0xcd0   :  { %v4511_v6 = vrot.slane %v4510_v45, 4 }
 0xcd2   :  { %v4512_v18 = vmax.f32 %v4510_v45, %v4511_v6 }
 0xcd4   :  { %v4513_v12 = vrot.slane %v4512_v18, 2 }
 0xcd6   :  { %v4514_v37 = vmax.f32 %v4512_v18, %v4513_v12 }
 0xcd8   :  { %v4515_v46 = vrot.slane %v4514_v37, 1 }
 0xcda   :  { %v4516_v38 = vmax.f32 %v4514_v37, %v4515_v46 }
 0xcdc   :  { %v4517_v3 = vsub.f32 %v4510_v45, %v4516_v38 }
 0xcde   :  { %v4518_v62 = vmul.f32 1.442695, %v4517_v3 }
 0xce0   :  { %7322 = vpow2.f32 %v4518_v62 }
 0xced   :  { %v7323_v31 = vpop.eup %7322 }
 0xcee   :  { %v4520_v33 = vrot.slane %v7323_v31, 4 }
 0xcf0   :  { %v4521_v60 = vadd.f32 %v7323_v31, %v4520_v33 }
 0xcf2   :  { %v4522_v21 = vrot.slane %v4521_v60, 2 }
 0xcf4   :  { %v4523_v39 = vadd.f32 %v4522_v21, %v4521_v60 }
 0xcf6   :  { %v4524_v61 = vrot.slane %v4523_v39, 1 }
 0xcf8   :  { %v4525_v52 = vadd.f32 %v4524_v61, %v4523_v39 }
 0xcfa   :  { %7324 = vrcp.f32 %v4525_v52 }
 0xd07   :  { %v7325_v2 = vpop.eup %7324 }
 0xd08   :  { %v4527_v44 = vmul.f32 %v7325_v2, %v7323_v31 }
 0xd0a   :  { %v9639_v20 = vand.u32 4294901760, %v4527_v44 }
 0xd0c   :  { %v9642_v43 = vsub.f32 %v4527_v44, %v9639_v20  ;;  %7140 = vmatmul.mubr.f32.vlgmr.msra.gmra.mxu1 %v9639_v20 }
 0xd0d   :  { %7178 = vmatpush3.xpose.msra.mxu1 %v8663_v32  ;;  %7209 = vmatprep.mubr.msk.f32.mxu1 %vm7402_vm0, %v9990_v26 }
 0xd0e   :  { %7179 = vmatprep.subr.mxu1 %v9990_v26  ;;  %v4611_v51 = vand.u32 4294901760, %v9642_v43 }
 0xd10   :  { %v4612_v49 = vsub.f32 %v9642_v43, %v4611_v51 }
 0xd11   :  { %7180 = vmatpush3.xpose.msra.mxu1 %v8685_v56 }
 0xd12   :  { %7181 = vmatprep.subr.mxu1 %v9990_v26  ;;  %v4613_v55 = vand.u32 4294901760, %v4612_v49 }
 0xd14   :  { %7105 = vmatmul.mubr.f32.vlgmr.msra.gmra.mxu0 %v4613_v55 }
 0xd15   :  { %7143 = vmatpush3.xpose.msra.mxu0 %v8682_v16  ;;  %7182 = vmatpush3.xpose.msra.mxu1 %v8688_v34  ;;  %v10222_v16 = vld [vmem:[#allocation32_spill] sm:$0xff] }
 0xd16   :  { %7144 = vmatprep.subr.mxu0 %v9990_v26  ;;  %7183 = vmatprep.subr.mxu1 %v9990_v26 }
 0xd17   :  { %7174 = vmatprep.mubr.msk.f32.mxu0 %vm7402_vm0, %v9990_v26 }
 0xd19   :  { %7145 = vmatpush3.xpose.msra.mxu0 %v8708_v53  ;;  %7184 = vmatpush3.xpose.msra.mxu1 %v8691_v15  ;;  %v10226_v53 = vld [vmem:[#allocation41_spill] sm:$0xff] }
 0xd1a   :  { %7146 = vmatprep.subr.mxu0 %v9990_v26  ;;  %7185 = vmatprep.subr.mxu1 %v9990_v26 }
 0xd1d   :  { %7147 = vmatpush3.xpose.msra.mxu0 %v8712_v27  ;;  %7186 = vmatpush3.xpose.msra.mxu1 %v8742_v25  ;;  %v10227_v27 = vld [vmem:[#allocation50_spill] sm:$0xff] }
 0xd1e   :  { %7148 = vmatprep.subr.mxu0 %v9990_v26  ;;  %7187 = vmatprep.subr.mxu1 %v9990_v26 }
 0xd21   :  { %7149 = vmatpush3.xpose.msra.mxu0 %v8716_v35  ;;  %7188 = vmatpush3.xpose.msra.mxu1 %v8771_v57  ;;  %v10228_v35 = vld [vmem:[#allocation28_spill] sm:$0xff] }
 0xd22   :  { %7150 = vmatprep.subr.mxu0 %v9990_v26  ;;  %7189 = vmatprep.subr.mxu1 %v9990_v26 }
 0xd25   :  { %7151 = vmatpush3.xpose.msra.mxu0 %v8764_v1  ;;  %7190 = vmatpush3.xpose.msra.mxu1 %v8815_v9  ;;  %v10230_v1 = vld [vmem:[#allocation51_spill] sm:$0xff] }
 0xd26   :  { %7152 = vmatprep.subr.mxu0 %v9990_v26  ;;  %7191 = vmatprep.subr.mxu1 %v9990_v26 }
 0xd29   :  { %7153 = vmatpush3.xpose.msra.mxu0 %v8790_v24  ;;  %7192 = vmatpush3.xpose.msra.mxu1 %v8869_v10  ;;  %v10232_v24 = vld [vmem:[#allocation58_spill] sm:$0xff] }
 0xd2a   :  { %7154 = vmatprep.subr.mxu0 %v9990_v26  ;;  %7193 = vmatprep.subr.mxu1 %v9990_v26 }
 0xd2d   :  { %7155 = vmatpush3.xpose.msra.mxu0 %v8838_v23  ;;  %7194 = vmatpush3.xpose.msra.mxu1 %v8893_v59 }
 0xd2e   :  { %7156 = vmatprep.subr.mxu0 %v9990_v26  ;;  %7195 = vmatprep.subr.mxu1 %v9990_v26 }
 0xd31   :  { %7157 = vmatpush3.xpose.msra.mxu0 %v8890_v41  ;;  %7196 = vmatpush3.xpose.msra.mxu1 %v8924_v36 }
 0xd32   :  { %7158 = vmatprep.subr.mxu0 %v9990_v26  ;;  %7197 = vmatprep.subr.mxu1 %v9990_v26 }
 0xd35   :  { %7159 = vmatpush3.xpose.msra.mxu0 %v8921_v47  ;;  %7198 = vmatpush3.xpose.msra.mxu1 %v8952_v48 }
 0xd36   :  { %7160 = vmatprep.subr.mxu0 %v9990_v26  ;;  %7199 = vmatprep.subr.mxu1 %v9990_v26 }
 0xd39   :  { %7161 = vmatpush3.xpose.msra.mxu0 %v8949_v19  ;;  %7200 = vmatpush3.xpose.msra.mxu1 %v8977_v8 }
 0xd3a   :  { %7162 = vmatprep.subr.mxu0 %v9990_v26  ;;  %7201 = vmatprep.subr.mxu1 %v9990_v26 }
 0xd3d   :  { %7163 = vmatpush3.xpose.msra.mxu0 %v8973_v0  ;;  %7202 = vmatpush3.xpose.msra.mxu1 %v8999_v22 }
 0xd3e   :  { %7164 = vmatprep.subr.mxu0 %v9990_v26  ;;  %7203 = vmatprep.subr.mxu1 %v9990_v26 }
 0xd41   :  { %7165 = vmatpush3.xpose.msra.mxu0 %v8996_v14  ;;  %7204 = vmatpush3.xpose.msra.mxu1 %v9025_v54 }
 0xd42   :  { %7166 = vmatprep.subr.mxu0 %v9990_v26  ;;  %7205 = vmatprep.subr.mxu1 %v9990_v26 }
 0xd45   :  { %7167 = vmatpush3.xpose.msra.mxu0 %v10183_v11  ;;  %7206 = vmatpush3.xpose.msra.mxu1 %v9046_v17 }
 0xd46   :  { %7168 = vmatprep.subr.mxu0 %v9990_v26  ;;  %7207 = vmatprep.subr.mxu1 %v9990_v26 }
 0xd49   :  { %7169 = vmatpush3.xpose.msra.mxu0 %v10184_v5  ;;  %7208 = vmatpush3.xpose.msra.mxu1 %v9066_v50 }
 0xd4a   :  { %7170 = vmatprep.subr.mxu0 %v9990_v26  ;;  %7247 = vmatprep.subr.mxu1 %v9990_v26 }
 0xd4c   :  { %7210 = vmatmul.mubr.f32.vlgmr.msra.gmra.mxu1 %v4611_v51 }
 0xd4d   :  { %7171 = vmatpush3.xpose.msra.mxu0 %v10185_v29  ;;  %7248 = vmatpush3.xpose.msra.mxu1 %v8663_v32  ;;  %v10221_v32 = vld [vmem:[#allocation25_spill] sm:$0xff] }
 0xd4e   :  { %7172 = vmatprep.subr.mxu0 %v9990_v26  ;;  %7249 = vmatprep.subr.mxu1 %v9990_v26 }
 0xd4f   :  { %7279 = vmatprep.mubr.msk.f32.mxu1 %vm7402_vm0, %v9990_v26 }
 0xd51   :  { %7173 = vmatpush3.xpose.msra.mxu0 %v10186_v30  ;;  %7250 = vmatpush3.xpose.msra.mxu1 %v8685_v56  ;;  %v10223_v56 = vld [vmem:[#allocation47_spill] sm:$0xff] }
 0xd52   :  { %7212 = vmatprep.subr.mxu0 %v9990_v26  ;;  %7251 = vmatprep.subr.mxu1 %v9990_v26 }
 0xd54   :  { %7175 = vmatmul.mubr.f32.vlgmr.msra.gmra.mxu0 %v9642_v43 }
 0xd55   :  { %7213 = vmatpush3.xpose.msra.mxu0 %v10160_v40  ;;  %7252 = vmatpush3.xpose.msra.mxu1 %v8688_v34  ;;  %v10224_v34 = vld [vmem:[#allocation23_spill] sm:$0xff] }
 0xd56   :  { %7214 = vmatprep.subr.mxu0 %v9990_v26  ;;  %7253 = vmatprep.subr.mxu1 %v9990_v26 }
 0xd57   :  { %7244 = vmatprep.mubr.msk.f32.mxu0 %vm7402_vm0, %v9990_v26 }
 0xd59   :  { %7215 = vmatpush3.xpose.msra.mxu0 %v10161_v13  ;;  %7254 = vmatpush3.xpose.msra.mxu1 %v8691_v15  ;;  %v10225_v15 = vld [vmem:[#allocation33_spill] sm:$0xff] }
 0xd5a   :  { %7216 = vmatprep.subr.mxu0 %v9990_v26  ;;  %7255 = vmatprep.subr.mxu1 %v9990_v26 }
 0xd5d   :  { %7217 = vmatpush3.xpose.msra.mxu0 %v10162_v63  ;;  %7256 = vmatpush3.xpose.msra.mxu1 %v8742_v25  ;;  %v10229_v25 = vld [vmem:[#allocation40_spill] sm:$0xff] }
 0xd5e   :  { %7218 = vmatprep.subr.mxu0 %v9990_v26  ;;  %7257 = vmatprep.subr.mxu1 %v9990_v26 }
 0xd61   :  { %7219 = vmatpush3.xpose.msra.mxu0 %v10163_v58  ;;  %7258 = vmatpush3.xpose.msra.mxu1 %v8771_v57  ;;  %v10231_v57 = vld [vmem:[#allocation55_spill] sm:$0xff] }
 0xd62   :  { %7220 = vmatprep.subr.mxu0 %v9990_v26  ;;  %7259 = vmatprep.subr.mxu1 %v9990_v26 }
 0xd65   :  { %7221 = vmatpush3.xpose.msra.mxu0 %v10221_v32  ;;  %7260 = vmatpush3.xpose.msra.mxu1 %v8815_v9 }
 0xd66   :  { %7222 = vmatprep.subr.mxu0 %v9990_v26  ;;  %7261 = vmatprep.subr.mxu1 %v9990_v26 }
 0xd69   :  { %7223 = vmatpush3.xpose.msra.mxu0 %v10222_v16  ;;  %7262 = vmatpush3.xpose.msra.mxu1 %v8869_v10 }
 0xd6a   :  { %7224 = vmatprep.subr.mxu0 %v9990_v26  ;;  %7263 = vmatprep.subr.mxu1 %v9990_v26 }
 0xd6d   :  { %7225 = vmatpush3.xpose.msra.mxu0 %v10223_v56  ;;  %7264 = vmatpush3.xpose.msra.mxu1 %v8893_v59 }
 0xd6e   :  { %7226 = vmatprep.subr.mxu0 %v9990_v26  ;;  %7265 = vmatprep.subr.mxu1 %v9990_v26 }
 0xd71   :  { %7227 = vmatpush3.xpose.msra.mxu0 %v10224_v34  ;;  %7266 = vmatpush3.xpose.msra.mxu1 %v8924_v36 }
 0xd72   :  { %7228 = vmatprep.subr.mxu0 %v9990_v26  ;;  %7267 = vmatprep.subr.mxu1 %v9990_v26 }
 0xd75   :  { %7229 = vmatpush3.xpose.msra.mxu0 %v10225_v15  ;;  %7268 = vmatpush3.xpose.msra.mxu1 %v8952_v48 }
 0xd76   :  { %7230 = vmatprep.subr.mxu0 %v9990_v26  ;;  %7269 = vmatprep.subr.mxu1 %v9990_v26 }
 0xd79   :  { %7231 = vmatpush3.xpose.msra.mxu0 %v10226_v53  ;;  %7270 = vmatpush3.xpose.msra.mxu1 %v8977_v8 }
 0xd7a   :  { %7232 = vmatprep.subr.mxu0 %v9990_v26  ;;  %7271 = vmatprep.subr.mxu1 %v9990_v26 }
 0xd7d   :  { %7233 = vmatpush3.xpose.msra.mxu0 %v10227_v27  ;;  %7272 = vmatpush3.xpose.msra.mxu1 %v8999_v22 }
 0xd7e   :  { %7234 = vmatprep.subr.mxu0 %v9990_v26  ;;  %7273 = vmatprep.subr.mxu1 %v9990_v26 }
 0xd81   :  { %7235 = vmatpush3.xpose.msra.mxu0 %v10228_v35  ;;  %7274 = vmatpush3.xpose.msra.mxu1 %v9025_v54 }
 0xd82   :  { %7236 = vmatprep.subr.mxu0 %v9990_v26  ;;  %7275 = vmatprep.subr.mxu1 %v9990_v26 }
 0xd85   :  { %7237 = vmatpush3.xpose.msra.mxu0 %v10229_v25  ;;  %7276 = vmatpush3.xpose.msra.mxu1 %v9046_v17 }
 0xd86   :  { %7238 = vmatprep.subr.mxu0 %v9990_v26  ;;  %7277 = vmatprep.subr.mxu1 %v9990_v26 }
 0xd89   :  { %7239 = vmatpush3.xpose.msra.mxu0 %v10230_v1  ;;  %7278 = vmatpush3.xpose.msra.mxu1 %v9066_v50  ;;  %v7331_v50 = vld [vmem:[#allocation6] sm:$0xff] }
 0xd8a   :  { %7240 = vmatprep.subr.mxu0 %v9990_v26 }
 0xd8c   :  { %7280 = vmatmul.mubr.f32.vlgmr.msra.gmra.mxu1 %v9639_v20 }
 0xd8d   :  { %7241 = vmatpush3.xpose.msra.mxu0 %v10231_v57 }
 0xd8e   :  { %7242 = vmatprep.subr.mxu0 %v9990_v26 }
 0xd91   :  { %7243 = vmatpush3.xpose.msra.mxu0 %v10232_v24 }
 0xd94   :  { %7245 = vmatmul.mubr.f32.vlgmr.msra.gmra.mxu0 %v9639_v20 }
 0xdcc   :  { %v4766_v9 = vpop.f32.mrf.mxu1 }
 0xdce   :  { %v7141_v23 = vpop.f32.mrf.mxu1 }
 0xdd4   :  { %v4615_v10 = vpop.f32.mrf.mxu0 }
 0xdd5   :  { %v4767_v41 = vadd.f32 %v4766_v9, %v4615_v10 }
 0xdd6   :  { %v7106_v59 = vpop.f32.mrf.mxu0 }
 0xe0c   :  { %v4959_v47 = vpop.f32.mrf.mxu1 }
 0xe0e   :  { %v7211_v36 = vpop.f32.mrf.mxu1 }
 0xe14   :  { %v4870_v19 = vpop.f32.mrf.mxu0 }
 0xe15   :  { %v4871_v48 = vadd.f32 %v4870_v19, %v4767_v41 }
 0xe16   :  { %v7176_v0 = vpop.f32.mrf.mxu0 }
 0xe17   :  { %v4960_v8 = vadd.f32 %v4959_v47, %v4871_v48 }
 0xe4c   :  { %v5165_v14 = vpop.f32.mrf.mxu1 }
 0xe4e   :  { %v7281_v22 = vpop.f32.mrf.mxu1 }
 0xe54   :  { %v5078_v13 = vpop.f32.mrf.mxu0 }
 0xe55   :  { %v5079_v54 = vadd.f32 %v5078_v13, %v4960_v8 }
 0xe56   :  { %v7246_v26 = vpop.f32.mrf.mxu0 }
 0xe57   :  { %v5166_v17 = vadd.f32 %v5165_v14, %v5079_v54 }
 0xe59   :  { %v5169_v40 = vmul.f32 %v10166_v7, %v5166_v17 }
 0xe5b   :  { %v5170_v63 = vadd.f32 %v7331_v50, %v5169_v40 }
 0xe5d   :  { %v5171_v58 = vmul.f32 %v5170_v63, %v5170_v63 }
 0xe5f   :  { %5172 = vadd.xlane.f32.xlu1 %v5171_v58 }
 0xee8   :  { %v5173_v11 = vpop.xlane.xlu1 %5172 }
 0xee9   :  { %7326 = vrsqrt.f32 %v5173_v11  ;;  %v5181_v5 = vadd.f32 1.0, %v5173_v11  ;;  %vm5176_vm14 = vcmp.eq.f32.partialorder %v5173_v11, inf  ;;  %v5179_v4 = vand.u32 2147483648, %v5173_v11 }
 0xeea   :  { %vm5178_vm15 = vcmp.eq.f32.partialorder %v5173_v11, 0.0 }
 0xeeb   :  { %v5182_v29 = vadd.f32 1e-20, %v5181_v5 }
 0xeed   :  { %7328 = vrcp.f32 %v5182_v29 }
 0xef6   :  { %v7327_v30 = vpop.eup %7326 }
 0xef7   :  { %v5175_v28 = vmul.f32 %v7327_v30, %v5173_v11 }
 0xef9   :  { %v5177_v45 = vsel %vm5176_vm14, %v5173_v11, %v5175_v28 }
 0xefa   :  { %v5180_v42 = vsel %vm5178_vm15, %v5179_v4, %v5177_v45  ;;  %v7329_v6 = vpop.eup %7328 }
 0xefb   :  { %v5184_v18 = vmul.f32 %v7329_v6, %v5180_v42 }
 0xefd   :  { %v5185_v12 = vmul.f32 %v5184_v18, %v5170_v63 }
 0xeff   :  { %v5186_v7 = vrot.slane %v5185_v12, 4 }
 0xf01   :  { %v5187_v37 = vadd.f32 %v5186_v7, %v5185_v12 }
 0xf03   :  { %v5188_v46 = vrot.slane %v5187_v37, 2 }
 0xf05   :  { %v5189_v38 = vadd.f32 %v5188_v46, %v5187_v37 }
 0xf07   :  { %v5190_v3 = vrot.slane %v5189_v38, 1 }
 0xf09   :  { %v5191_v62 = vadd.f32 %v5190_v3, %v5189_v38 }
 0xf0b   :  { %5201 = vst [vmem:[%s9791_s3 + $0x1] sm:$0x1] %v5191_v62 }
 0xf0c   :  { %5198 = vsyncpa [#allocation3], 1 }
 0xf0d   :  { %5199 = vsyncpa [#allocation5], 1 }

</bundles_post_ra>
